<compile_context>
chip_gen: v7x
topology: tpu7x:2x2x1
jax: 0.10.0
libtpu: 0.0.40
codegen_flags: <defaults>
</compile_context>

<pallas_src>
import functools

import jax
import jax.numpy as jnp
import numpy as np
from jax.experimental import pallas as pl
from jax.experimental.pallas import tpu as pltpu


def _round_up(x, m):
    return (x + m - 1) // m * m


# ---------------------------------------------------------------------------
# The single fused kernel.
# ---------------------------------------------------------------------------
def _qhead_kernel(p3_ref, w1_ref, s1_ref, t1_ref,
                  p4_ref, wcat_ref, bcat_ref,
                  w2_ref, b2_ref,
                  ycat_ref, y2_ref, *, tap_offsets):
    # --- categorical heads: one lane-dense matmul for all class heads ------
    ycat = jnp.dot(p4_ref[...], wcat_ref[...], preferred_element_type=jnp.float32)
    ycat_ref[...] = (ycat + bcat_ref[...]).astype(ycat_ref.dtype)

    # --- conv1 (3x3, pad 1) + folded BN + LeakyReLU(0), both branches ------
    h = jnp.dot(p3_ref[...], w1_ref[...], preferred_element_type=jnp.float32)
    h = jnp.maximum(h * s1_ref[...] + t1_ref[...], 0.0)      # h stays on-chip

    # --- conv2 (4x4 valid) as a 16-tap accumulation over h -----------------
    # For tap offset `off` we need hs[r, :] = h[r + off, :].  `off` is not a
    # multiple of 8 (sublane axis), so instead of an unaligned sublane shift
    # we gather with a 0/1 selection matrix on the idle MXU (exact: at most
    # one nonzero per output row; rows running past the end come out zero and
    # correspond to pixels the wrapper discards anyway).
    M1 = h.shape[0]
    rows = jax.lax.broadcasted_iota(jnp.int32, (M1, M1), 0)
    cols = jax.lax.broadcasted_iota(jnp.int32, (M1, M1), 1)
    shift = cols - rows                                       # hoisted out of the tap loop
    acc = jnp.zeros((M1, y2_ref.shape[1]), jnp.float32)
    for t, off in enumerate(tap_offsets):
        if off == 0:
            hs = h
        else:
            sel = (shift == off).astype(jnp.float32)
            hs = jnp.dot(sel, h, preferred_element_type=jnp.float32)
        acc = acc + jnp.dot(hs, w2_ref[t], preferred_element_type=jnp.float32)
    y2_ref[...] = (acc + b2_ref[...]).astype(y2_ref.dtype)


# ---------------------------------------------------------------------------
# Wrapper-side layout plumbing (im2col, weight reshape, BN folding, padding).
# ---------------------------------------------------------------------------
def _im2col(x, kh, kw):
    """x: (B, H, W, C) -> (B, Ho, Wo, kh*kw*C); patch order (kh, kw, c)."""
    _, H, W, _ = x.shape
    ho, wo = H - kh + 1, W - kw + 1
    cols = [x[:, i:i + ho, j:j + wo, :] for i in range(kh) for j in range(kw)]
    return jnp.concatenate(cols, axis=-1)


def _conv_weight_matrix(w):
    """PyTorch OIHW conv weight -> (KH*KW*I, O), matching _im2col order."""
    o, i, kh, kw = w.shape
    return jnp.transpose(w, (2, 3, 1, 0)).reshape(kh * kw * i, o)


def _fold_bn(conv_bias, gamma, beta, rmean, rvar, eps):
    """Fold conv bias + inference BatchNorm into per-channel (scale, shift)."""
    inv = gamma / jnp.sqrt(rvar + eps)
    return inv, (conv_bias - rmean) * inv + beta


def qhead_forward(feature, params, eps=1e-5):
    B, C, H, W = feature.shape
    Ho, Wo = H - 3, W - 3
    x = jnp.transpose(feature, (0, 2, 3, 1)).astype(jnp.float32)   # NHWC, C on lanes

    # ---- patch matrices (layout plumbing only) -----------------------------
    xp = jnp.pad(x, ((0, 0), (1, 1), (1, 1), (0, 0)))
    p3 = _im2col(xp, 3, 3).reshape(B * H * W, 9 * C)       # conv1 input patches
    p4 = _im2col(x, 4, 4).reshape(B * Ho * Wo, 16 * C)     # cat-head input patches

    M1, K1 = p3.shape
    M2, K2 = p4.shape
    M1p, K1p = _round_up(M1, 8), _round_up(K1, 128)        # K padded to 128 lanes
    M2p, K2p = _round_up(M2, 8), _round_up(K2, 128)
    p3 = jnp.pad(p3, ((0, M1p - M1), (0, K1p - K1)))
    p4 = jnp.pad(p4, ((0, M2p - M2), (0, K2p - K2)))

    # ---- cat head weights: concat all heads on N, pad to 128 lanes ---------
    w_cat = jnp.concatenate([_conv_weight_matrix(w) for w in params["cat_w"]], axis=1)
    b_cat = jnp.concatenate(params["cat_b"])
    Ncat = w_cat.shape[1]
    Ncatp = _round_up(Ncat, 128)
    w_cat = jnp.pad(w_cat, ((0, K2p - w_cat.shape[0]), (0, Ncatp - Ncat)))
    b_cat = jnp.pad(b_cat, (0, Ncatp - Ncat)).reshape(1, Ncatp).astype(jnp.float32)

    # ---- conv1 weights (both branches), BN folded into (scale, shift) ------
    pm, pv = params["mean"], params["logvar"]
    n_hid = pm["w1"].shape[0]
    w1 = jnp.concatenate(
        [_conv_weight_matrix(pm["w1"]), _conv_weight_matrix(pv["w1"])], axis=1)
    N1 = w1.shape[1]                                        # 2*n_hid (=128)
    N1p = _round_up(N1, 128)
    w1 = jnp.pad(w1, ((0, K1p - w1.shape[0]), (0, N1p - N1)))
    s_m, t_m = _fold_bn(pm["b1"], pm["gamma"], pm["beta"], pm["rmean"], pm["rvar"], eps)
    s_v, t_v = _fold_bn(pv["b1"], pv["gamma"], pv["beta"], pv["rmean"], pv["rvar"], eps)
    s1 = jnp.pad(jnp.concatenate([s_m, s_v]), (0, N1p - N1)).reshape(1, N1p)
    t1 = jnp.pad(jnp.concatenate([t_m, t_v]), (0, N1p - N1)).reshape(1, N1p)
    s1 = s1.astype(jnp.float32)
    t1 = t1.astype(jnp.float32)

    # ---- conv2 weights: per-tap (channels, 2*num_con_var) block matrices ---
    num_con = pm["w2"].shape[0]
    N2 = 2 * num_con
    N2p = _round_up(N2, 128)
    wm = jnp.transpose(pm["w2"], (2, 3, 1, 0))              # (4, 4, n_hid, num_con)
    wv = jnp.transpose(pv["w2"], (2, 3, 1, 0))
    taps, tap_offsets = [], []
    for kh in range(4):
        for kw in range(4):
            top = jnp.concatenate(
                [wm[kh, kw], jnp.zeros((n_hid, num_con), jnp.float32)], axis=1)
            bot = jnp.concatenate(
                [jnp.zeros((n_hid, num_con), jnp.float32), wv[kh, kw]], axis=1)
            wt = jnp.concatenate([top, bot], axis=0)        # (2*n_hid, 2*num_con)
            taps.append(jnp.pad(wt, ((0, N1p - 2 * n_hid), (0, N2p - N2))))
            tap_offsets.append(kh * W + kw)                 # row offset in flattened h
    w2 = jnp.stack(taps, axis=0)                            # (16, N1p, N2p)
    b2 = jnp.pad(jnp.concatenate([pm["b2"], pv["b2"]]),
                 (0, N2p - N2)).reshape(1, N2p).astype(jnp.float32)

    n_taps = len(tap_offsets)
    flops = 2 * (M2p * K2p * Ncatp + M1p * K1p * N1p
                 + n_taps * (M1p * M1p * N1p + M1p * N1p * N2p))
    bytes_accessed = 4 * (p3.size + w1.size + s1.size + t1.size + p4.size
                          + w_cat.size + b_cat.size + w2.size + b2.size
                          + M2p * Ncatp + M1p * N2p)

    # Single grid step: everything (≈1.5 MiB of operands) fits comfortably in
    # VMEM on v5e/v6e/v7x; more steps would only add per-step overhead here.
    ycat, y2 = pl.pallas_call(
        functools.partial(_qhead_kernel, tap_offsets=tuple(tap_offsets)),
        out_shape=(jax.ShapeDtypeStruct((M2p, Ncatp), jnp.float32),
                   jax.ShapeDtypeStruct((M1p, N2p), jnp.float32)),
        grid=(1,),
        in_specs=[
            pl.BlockSpec((M1p, K1p), lambda i: (0, 0)),          # p3
            pl.BlockSpec((K1p, N1p), lambda i: (0, 0)),          # w1
            pl.BlockSpec((1, N1p), lambda i: (0, 0)),            # scale1
            pl.BlockSpec((1, N1p), lambda i: (0, 0)),            # shift1
            pl.BlockSpec((M2p, K2p), lambda i: (0, 0)),          # p4
            pl.BlockSpec((K2p, Ncatp), lambda i: (0, 0)),        # w_cat
            pl.BlockSpec((1, Ncatp), lambda i: (0, 0)),          # b_cat
            pl.BlockSpec((n_taps, N1p, N2p), lambda i: (0, 0, 0)),  # w2 taps
            pl.BlockSpec((1, N2p), lambda i: (0, 0)),            # b2
        ],
        out_specs=[
            pl.BlockSpec((M2p, Ncatp), lambda i: (0, 0)),        # cat logits
            pl.BlockSpec((M1p, N2p), lambda i: (0, 0)),          # mean/logvar conv2
        ],
        compiler_params=pltpu.CompilerParams(
            dimension_semantics=("arbitrary",)),
        cost_estimate=pl.CostEstimate(
            flops=flops, transcendentals=0, bytes_accessed=bytes_accessed),
    )(p3, w1, s1, t1, p4, w_cat, b_cat, w2, b2)

    # ---- slice off padding, restore PyTorch NCHW .view(B, -1) flatten ------
    ycat = ycat[:M2]
    dis_out, off = [], 0
    for b in params["cat_b"]:
        n = b.shape[0]
        yk = ycat[:, off:off + n].reshape(B, Ho, Wo, n)
        dis_out.append(jnp.transpose(yk, (0, 3, 1, 2)).reshape(B, -1))
        off += n

    y2 = y2[:M1].reshape(B, H, W, N2p)[:, :Ho, :Wo, :N2]
    mean_out = jnp.transpose(y2[..., :num_con], (0, 3, 1, 2)).reshape(B, -1)
    logvar_out = jnp.transpose(y2[..., num_con:], (0, 3, 1, 2)).reshape(B, -1)
    return [dis_out, (mean_out, logvar_out)]


# ---------------------------------------------------------------------------
# Pure-JAX reference (lax.conv), inference-mode BN, for the sanity check.
# ---------------------------------------------------------------------------
def qhead_reference(feature, params, eps=1e-5):
    B = feature.shape[0]

    def conv(x, w, b, padding):
        y = jax.lax.conv_general_dilated(
            x, w, window_strides=(1, 1), padding=padding,
            dimension_numbers=("NCHW", "OIHW", "NCHW"))
        return y + b.reshape(1, -1, 1, 1)

    dis = [conv(feature, w, b, "VALID").reshape(B, -1)
           for w, b in zip(params["cat_w"], params["cat_b"])]

    def branch(p):
        h = conv(feature, p["w1"], p["b1"], ((1, 1), (1, 1)))
        inv = (p["gamma"] / jnp.sqrt(p["rvar"] + eps)).reshape(1, -1, 1, 1)
        h = (h - p["rmean"].reshape(1, -1, 1, 1)) * inv + p["beta"].reshape(1, -1, 1, 1)
        h = jnp.maximum(h, 0.0)                       # LeakyReLU(negative_slope=0)
        return conv(h, p["w2"], p["b2"], "VALID").reshape(B, -1)

    return [dis, (branch(params["mean"]), branch(params["logvar"]))]


if __name__ == "__main__":
    B, C, H, W = 2, 8, 8, 8
    num_clsses = [10, 10]
    num_con_var = 4
    n_hidden = 64          # hard-coded to 64 in the PyTorch module

    key = jax.random.PRNGKey(0)
    kiter = iter(jax.random.split(key, 32))
    nk = lambda: next(kiter)

    feature = jax.random.normal(nk(), (B, C, H, W), dtype=jnp.float32)

    def make_branch():
        return dict(
            w1=jax.random.normal(nk(), (n_hidden, C, 3, 3), jnp.float32) * 0.05,
            b1=jax.random.normal(nk(), (n_hidden,), jnp.float32) * 0.05,
            gamma=jax.random.uniform(nk(), (n_hidden,), jnp.float32, 0.5, 1.5),
            beta=jax.random.normal(nk(), (n_hidden,), jnp.float32) * 0.1,
            rmean=jax.random.normal(nk(), (n_hidden,), jnp.float32) * 0.1,
            rvar=jax.random.uniform(nk(), (n_hidden,), jnp.float32, 0.5, 1.5),
            w2=jax.random.normal(nk(), (num_con_var, n_hidden, 4, 4), jnp.float32) * 0.05,
            b2=jax.random.normal(nk(), (num_con_var,), jnp.float32) * 0.05,
        )

    params = dict(
        cat_w=[jax.random.normal(nk(), (c, C, 4, 4), jnp.float32) * 0.05
               for c in num_clsses],
        cat_b=[jax.random.normal(nk(), (c,), jnp.float32) * 0.05
               for c in num_clsses],
        mean=make_branch(),
        logvar=make_branch(),
    )

    out = jax.jit(qhead_forward)(feature, params)
    out = jax.block_until_ready(out)
    dis_out, (mean_out, logvar_out) = out

    dis_ref, (mean_ref, logvar_ref) = qhead_reference(feature, params)

    Ho, Wo = H - 3, W - 3
    for o, r, c in zip(dis_out, dis_ref, num_clsses):
        assert o.shape == (B, c * Ho * Wo), o.shape
        np.testing.assert_allclose(np.asarray(o), np.asarray(r), rtol=5e-4, atol=5e-4)
    assert mean_out.shape == (B, num_con_var * Ho * Wo), mean_out.shape
    np.testing.assert_allclose(np.asarray(mean_out), np.asarray(mean_ref),
                               rtol=5e-4, atol=5e-4)
    np.testing.assert_allclose(np.asarray(logvar_out), np.asarray(logvar_ref),
                               rtol=5e-4, atol=5e-4)
    print("KERNEL_OK")
</pallas_src>

<mosaic_0001>
module attributes {stable_mosaic.version = 11 : i64} {
  func.func @_qhead_kernel(%arg0: i32, %arg1: memref<128x128xf32, #tpu.memory_space<vmem>>, %arg2: memref<128x128xf32, #tpu.memory_space<vmem>>, %arg3: memref<1x128xf32, #tpu.memory_space<vmem>>, %arg4: memref<1x128xf32, #tpu.memory_space<vmem>>, %arg5: memref<56x128xf32, #tpu.memory_space<vmem>>, %arg6: memref<128x128xf32, #tpu.memory_space<vmem>>, %arg7: memref<1x128xf32, #tpu.memory_space<vmem>>, %arg8: memref<16x128x128xf32, #tpu.memory_space<vmem>>, %arg9: memref<1x128xf32, #tpu.memory_space<vmem>>, %arg10: memref<56x128xf32, #tpu.memory_space<vmem>>, %arg11: memref<128x128xf32, #tpu.memory_space<vmem>>) attributes {dimension_semantics = [#tpu.dimension_semantics<arbitrary>], iteration_bounds = array<i64: 1>, scalar_prefetch = 0 : i64, scratch_operands = 0 : i64, tpu.core_type = #tpu.core_type<tc>, window_params = [{pipeline_mode = #tpu.pipeline_mode<synchronous>, transform_indices = @transform_0, window_bounds = array<i64: 128, 128>}, {pipeline_mode = #tpu.pipeline_mode<synchronous>, transform_indices = @transform_1, window_bounds = array<i64: 128, 128>}, {pipeline_mode = #tpu.pipeline_mode<synchronous>, transform_indices = @transform_2, window_bounds = array<i64: 1, 128>}, {pipeline_mode = #tpu.pipeline_mode<synchronous>, transform_indices = @transform_3, window_bounds = array<i64: 1, 128>}, {pipeline_mode = #tpu.pipeline_mode<synchronous>, transform_indices = @transform_4, window_bounds = array<i64: 56, 128>}, {pipeline_mode = #tpu.pipeline_mode<synchronous>, transform_indices = @transform_5, window_bounds = array<i64: 128, 128>}, {pipeline_mode = #tpu.pipeline_mode<synchronous>, transform_indices = @transform_6, window_bounds = array<i64: 1, 128>}, {pipeline_mode = #tpu.pipeline_mode<synchronous>, transform_indices = @transform_7, window_bounds = array<i64: 16, 128, 128>}, {pipeline_mode = #tpu.pipeline_mode<synchronous>, transform_indices = @transform_8, window_bounds = array<i64: 1, 128>}, {pipeline_mode = #tpu.pipeline_mode<synchronous>, transform_indices = @transform_9, window_bounds = array<i64: 56, 128>}, {pipeline_mode = #tpu.pipeline_mode<synchronous>, transform_indices = @transform_10, window_bounds = array<i64: 128, 128>}]} {
    %c0 = arith.constant 0 : index
    %c0_0 = arith.constant 0 : index
    %0 = vector.load %arg5[%c0, %c0_0] : memref<56x128xf32, #tpu.memory_space<vmem>>, vector<56x128xf32>
    %c0_1 = arith.constant 0 : index
    %c0_2 = arith.constant 0 : index
    %1 = vector.load %arg6[%c0_1, %c0_2] : memref<128x128xf32, #tpu.memory_space<vmem>>, vector<128x128xf32>
    %cst = arith.constant dense<0.000000e+00> : vector<56x128xf32>
    %2 = tpu.matmul %0, %1, %cst {dimension_numbers = #tpu.dot_dimension_numbers<[1], [0], [0], [1], [0, 0, 1, 1], [], []>} : vector<56x128xf32>, vector<128x128xf32>, vector<56x128xf32> -> vector<56x128xf32>
    %c0_3 = arith.constant 0 : index
    %c0_4 = arith.constant 0 : index
    %3 = vector.load %arg7[%c0_3, %c0_4] : memref<1x128xf32, #tpu.memory_space<vmem>>, vector<1x128xf32>
    %4 = vector.broadcast %3 : vector<1x128xf32> to vector<56x128xf32>
    %5 = arith.addf %2, %4 : vector<56x128xf32>
    %c0_5 = arith.constant 0 : index
    %c0_6 = arith.constant 0 : index
    %6 = vector.load %arg10[%c0_5, %c0_6] : memref<56x128xf32, #tpu.memory_space<vmem>>, vector<56x128xf32>
    tpu.vector_store %arg10[%c0_5, %c0_6], %5 {strides = array<i32>} : memref<56x128xf32, #tpu.memory_space<vmem>>, vector<56x128xf32>,
    %c0_7 = arith.constant 0 : index
    %c0_8 = arith.constant 0 : index
    %7 = vector.load %arg1[%c0_7, %c0_8] : memref<128x128xf32, #tpu.memory_space<vmem>>, vector<128x128xf32>
    %c0_9 = arith.constant 0 : index
    %c0_10 = arith.constant 0 : index
    %8 = vector.load %arg2[%c0_9, %c0_10] : memref<128x128xf32, #tpu.memory_space<vmem>>, vector<128x128xf32>
    %cst_11 = arith.constant dense<0.000000e+00> : vector<128x128xf32>
    %9 = tpu.matmul %7, %8, %cst_11 {dimension_numbers = #tpu.dot_dimension_numbers<[1], [0], [0], [1], [0, 0, 1, 1], [], []>} : vector<128x128xf32>, vector<128x128xf32>, vector<128x128xf32> -> vector<128x128xf32>
    %c0_12 = arith.constant 0 : index
    %c0_13 = arith.constant 0 : index
    %10 = vector.load %arg3[%c0_12, %c0_13] : memref<1x128xf32, #tpu.memory_space<vmem>>, vector<1x128xf32>
    %11 = vector.broadcast %10 : vector<1x128xf32> to vector<128x128xf32>
    %12 = arith.mulf %9, %11 : vector<128x128xf32>
    %c0_14 = arith.constant 0 : index
    %c0_15 = arith.constant 0 : index
    %13 = vector.load %arg4[%c0_14, %c0_15] : memref<1x128xf32, #tpu.memory_space<vmem>>, vector<1x128xf32>
    %14 = vector.broadcast %13 : vector<1x128xf32> to vector<128x128xf32>
    %15 = arith.addf %12, %14 : vector<128x128xf32>
    %cst_16 = arith.constant 0.000000e+00 : f32
    %16 = vector.broadcast %cst_16 : f32 to vector<128x128xf32>
    %17 = arith.maximumf %15, %16 : vector<128x128xf32>
    %18 = tpu.iota {dimensions = array<i32: 0>} : vector<128x128xi32>
    %19 = tpu.iota {dimensions = array<i32: 1>} : vector<128x128xi32>
    %20 = arith.subi %19, %18 : vector<128x128xi32>
    %cst_17 = arith.constant 0.000000e+00 : f32
    %21 = vector.broadcast %cst_17 : f32 to vector<128x128xf32>
    %c0_18 = arith.constant 0 : index
    %c0_19 = arith.constant 0 : index
    %c0_20 = arith.constant 0 : index
    %22 = vector.load %arg8[%c0_18, %c0_19, %c0_20] : memref<16x128x128xf32, #tpu.memory_space<vmem>>, vector<1x128x128xf32>
    %23 = vector.shape_cast %22 : vector<1x128x128xf32> to vector<128x128xf32>
    %cst_21 = arith.constant dense<0.000000e+00> : vector<128x128xf32>
    %24 = tpu.matmul %17, %23, %cst_21 {dimension_numbers = #tpu.dot_dimension_numbers<[1], [0], [0], [1], [0, 0, 1, 1], [], []>} : vector<128x128xf32>, vector<128x128xf32>, vector<128x128xf32> -> vector<128x128xf32>
    %25 = arith.addf %21, %24 : vector<128x128xf32>
    %c1_i32 = arith.constant 1 : i32
    %26 = vector.broadcast %c1_i32 : i32 to vector<128x128xi32>
    %27 = arith.cmpi eq, %20, %26 : vector<128x128xi32>
    %28 = arith.extui %27 : vector<128x128xi1> to vector<128x128xi32>
    %29 = arith.sitofp %28 : vector<128x128xi32> to vector<128x128xf32>
    %cst_22 = arith.constant dense<0.000000e+00> : vector<128x128xf32>
    %30 = tpu.matmul %29, %17, %cst_22 {dimension_numbers = #tpu.dot_dimension_numbers<[1], [0], [0], [1], [0, 0, 1, 1], [], []>} : vector<128x128xf32>, vector<128x128xf32>, vector<128x128xf32> -> vector<128x128xf32>
    %c1 = arith.constant 1 : index
    %c0_23 = arith.constant 0 : index
    %c0_24 = arith.constant 0 : index
    %31 = vector.load %arg8[%c1, %c0_23, %c0_24] : memref<16x128x128xf32, #tpu.memory_space<vmem>>, vector<1x128x128xf32>
    %32 = vector.shape_cast %31 : vector<1x128x128xf32> to vector<128x128xf32>
    %cst_25 = arith.constant dense<0.000000e+00> : vector<128x128xf32>
    %33 = tpu.matmul %30, %32, %cst_25 {dimension_numbers = #tpu.dot_dimension_numbers<[1], [0], [0], [1], [0, 0, 1, 1], [], []>} : vector<128x128xf32>, vector<128x128xf32>, vector<128x128xf32> -> vector<128x128xf32>
    %34 = arith.addf %25, %33 : vector<128x128xf32>
    %c2_i32 = arith.constant 2 : i32
    %35 = vector.broadcast %c2_i32 : i32 to vector<128x128xi32>
    %36 = arith.cmpi eq, %20, %35 : vector<128x128xi32>
    %37 = arith.extui %36 : vector<128x128xi1> to vector<128x128xi32>
    %38 = arith.sitofp %37 : vector<128x128xi32> to vector<128x128xf32>
    %cst_26 = arith.constant dense<0.000000e+00> : vector<128x128xf32>
    %39 = tpu.matmul %38, %17, %cst_26 {dimension_numbers = #tpu.dot_dimension_numbers<[1], [0], [0], [1], [0, 0, 1, 1], [], []>} : vector<128x128xf32>, vector<128x128xf32>, vector<128x128xf32> -> vector<128x128xf32>
    %c2 = arith.constant 2 : index
    %c0_27 = arith.constant 0 : index
    %c0_28 = arith.constant 0 : index
    %40 = vector.load %arg8[%c2, %c0_27, %c0_28] : memref<16x128x128xf32, #tpu.memory_space<vmem>>, vector<1x128x128xf32>
    %41 = vector.shape_cast %40 : vector<1x128x128xf32> to vector<128x128xf32>
    %cst_29 = arith.constant dense<0.000000e+00> : vector<128x128xf32>
    %42 = tpu.matmul %39, %41, %cst_29 {dimension_numbers = #tpu.dot_dimension_numbers<[1], [0], [0], [1], [0, 0, 1, 1], [], []>} : vector<128x128xf32>, vector<128x128xf32>, vector<128x128xf32> -> vector<128x128xf32>
    %43 = arith.addf %34, %42 : vector<128x128xf32>
    %c3_i32 = arith.constant 3 : i32
    %44 = vector.broadcast %c3_i32 : i32 to vector<128x128xi32>
    %45 = arith.cmpi eq, %20, %44 : vector<128x128xi32>
    %46 = arith.extui %45 : vector<128x128xi1> to vector<128x128xi32>
    %47 = arith.sitofp %46 : vector<128x128xi32> to vector<128x128xf32>
    %cst_30 = arith.constant dense<0.000000e+00> : vector<128x128xf32>
    %48 = tpu.matmul %47, %17, %cst_30 {dimension_numbers = #tpu.dot_dimension_numbers<[1], [0], [0], [1], [0, 0, 1, 1], [], []>} : vector<128x128xf32>, vector<128x128xf32>, vector<128x128xf32> -> vector<128x128xf32>
    %c3 = arith.constant 3 : index
    %c0_31 = arith.constant 0 : index
    %c0_32 = arith.constant 0 : index
    %49 = vector.load %arg8[%c3, %c0_31, %c0_32] : memref<16x128x128xf32, #tpu.memory_space<vmem>>, vector<1x128x128xf32>
    %50 = vector.shape_cast %49 : vector<1x128x128xf32> to vector<128x128xf32>
    %cst_33 = arith.constant dense<0.000000e+00> : vector<128x128xf32>
    %51 = tpu.matmul %48, %50, %cst_33 {dimension_numbers = #tpu.dot_dimension_numbers<[1], [0], [0], [1], [0, 0, 1, 1], [], []>} : vector<128x128xf32>, vector<128x128xf32>, vector<128x128xf32> -> vector<128x128xf32>
    %52 = arith.addf %43, %51 : vector<128x128xf32>
    %c8_i32 = arith.constant 8 : i32
    %53 = vector.broadcast %c8_i32 : i32 to vector<128x128xi32>
    %54 = arith.cmpi eq, %20, %53 : vector<128x128xi32>
    %55 = arith.extui %54 : vector<128x128xi1> to vector<128x128xi32>
    %56 = arith.sitofp %55 : vector<128x128xi32> to vector<128x128xf32>
    %cst_34 = arith.constant dense<0.000000e+00> : vector<128x128xf32>
    %57 = tpu.matmul %56, %17, %cst_34 {dimension_numbers = #tpu.dot_dimension_numbers<[1], [0], [0], [1], [0, 0, 1, 1], [], []>} : vector<128x128xf32>, vector<128x128xf32>, vector<128x128xf32> -> vector<128x128xf32>
    %c4 = arith.constant 4 : index
    %c0_35 = arith.constant 0 : index
    %c0_36 = arith.constant 0 : index
    %58 = vector.load %arg8[%c4, %c0_35, %c0_36] : memref<16x128x128xf32, #tpu.memory_space<vmem>>, vector<1x128x128xf32>
    %59 = vector.shape_cast %58 : vector<1x128x128xf32> to vector<128x128xf32>
    %cst_37 = arith.constant dense<0.000000e+00> : vector<128x128xf32>
    %60 = tpu.matmul %57, %59, %cst_37 {dimension_numbers = #tpu.dot_dimension_numbers<[1], [0], [0], [1], [0, 0, 1, 1], [], []>} : vector<128x128xf32>, vector<128x128xf32>, vector<128x128xf32> -> vector<128x128xf32>
    %61 = arith.addf %52, %60 : vector<128x128xf32>
    %c9_i32 = arith.constant 9 : i32
    %62 = vector.broadcast %c9_i32 : i32 to vector<128x128xi32>
    %63 = arith.cmpi eq, %20, %62 : vector<128x128xi32>
    %64 = arith.extui %63 : vector<128x128xi1> to vector<128x128xi32>
    %65 = arith.sitofp %64 : vector<128x128xi32> to vector<128x128xf32>
    %cst_38 = arith.constant dense<0.000000e+00> : vector<128x128xf32>
    %66 = tpu.matmul %65, %17, %cst_38 {dimension_numbers = #tpu.dot_dimension_numbers<[1], [0], [0], [1], [0, 0, 1, 1], [], []>} : vector<128x128xf32>, vector<128x128xf32>, vector<128x128xf32> -> vector<128x128xf32>
    %c5 = arith.constant 5 : index
    %c0_39 = arith.constant 0 : index
    %c0_40 = arith.constant 0 : index
    %67 = vector.load %arg8[%c5, %c0_39, %c0_40] : memref<16x128x128xf32, #tpu.memory_space<vmem>>, vector<1x128x128xf32>
    %68 = vector.shape_cast %67 : vector<1x128x128xf32> to vector<128x128xf32>
    %cst_41 = arith.constant dense<0.000000e+00> : vector<128x128xf32>
    %69 = tpu.matmul %66, %68, %cst_41 {dimension_numbers = #tpu.dot_dimension_numbers<[1], [0], [0], [1], [0, 0, 1, 1], [], []>} : vector<128x128xf32>, vector<128x128xf32>, vector<128x128xf32> -> vector<128x128xf32>
    %70 = arith.addf %61, %69 : vector<128x128xf32>
    %c10_i32 = arith.constant 10 : i32
    %71 = vector.broadcast %c10_i32 : i32 to vector<128x128xi32>
    %72 = arith.cmpi eq, %20, %71 : vector<128x128xi32>
    %73 = arith.extui %72 : vector<128x128xi1> to vector<128x128xi32>
    %74 = arith.sitofp %73 : vector<128x128xi32> to vector<128x128xf32>
    %cst_42 = arith.constant dense<0.000000e+00> : vector<128x128xf32>
    %75 = tpu.matmul %74, %17, %cst_42 {dimension_numbers = #tpu.dot_dimension_numbers<[1], [0], [0], [1], [0, 0, 1, 1], [], []>} : vector<128x128xf32>, vector<128x128xf32>, vector<128x128xf32> -> vector<128x128xf32>
    %c6 = arith.constant 6 : index
    %c0_43 = arith.constant 0 : index
    %c0_44 = arith.constant 0 : index
    %76 = vector.load %arg8[%c6, %c0_43, %c0_44] : memref<16x128x128xf32, #tpu.memory_space<vmem>>, vector<1x128x128xf32>
    %77 = vector.shape_cast %76 : vector<1x128x128xf32> to vector<128x128xf32>
    %cst_45 = arith.constant dense<0.000000e+00> : vector<128x128xf32>
    %78 = tpu.matmul %75, %77, %cst_45 {dimension_numbers = #tpu.dot_dimension_numbers<[1], [0], [0], [1], [0, 0, 1, 1], [], []>} : vector<128x128xf32>, vector<128x128xf32>, vector<128x128xf32> -> vector<128x128xf32>
    %79 = arith.addf %70, %78 : vector<128x128xf32>
    %c11_i32 = arith.constant 11 : i32
    %80 = vector.broadcast %c11_i32 : i32 to vector<128x128xi32>
    %81 = arith.cmpi eq, %20, %80 : vector<128x128xi32>
    %82 = arith.extui %81 : vector<128x128xi1> to vector<128x128xi32>
    %83 = arith.sitofp %82 : vector<128x128xi32> to vector<128x128xf32>
    %cst_46 = arith.constant dense<0.000000e+00> : vector<128x128xf32>
    %84 = tpu.matmul %83, %17, %cst_46 {dimension_numbers = #tpu.dot_dimension_numbers<[1], [0], [0], [1], [0, 0, 1, 1], [], []>} : vector<128x128xf32>, vector<128x128xf32>, vector<128x128xf32> -> vector<128x128xf32>
    %c7 = arith.constant 7 : index
    %c0_47 = arith.constant 0 : index
    %c0_48 = arith.constant 0 : index
    %85 = vector.load %arg8[%c7, %c0_47, %c0_48] : memref<16x128x128xf32, #tpu.memory_space<vmem>>, vector<1x128x128xf32>
    %86 = vector.shape_cast %85 : vector<1x128x128xf32> to vector<128x128xf32>
    %cst_49 = arith.constant dense<0.000000e+00> : vector<128x128xf32>
    %87 = tpu.matmul %84, %86, %cst_49 {dimension_numbers = #tpu.dot_dimension_numbers<[1], [0], [0], [1], [0, 0, 1, 1], [], []>} : vector<128x128xf32>, vector<128x128xf32>, vector<128x128xf32> -> vector<128x128xf32>
    %88 = arith.addf %79, %87 : vector<128x128xf32>
    %c16_i32 = arith.constant 16 : i32
    %89 = vector.broadcast %c16_i32 : i32 to vector<128x128xi32>
    %90 = arith.cmpi eq, %20, %89 : vector<128x128xi32>
    %91 = arith.extui %90 : vector<128x128xi1> to vector<128x128xi32>
    %92 = arith.sitofp %91 : vector<128x128xi32> to vector<128x128xf32>
    %cst_50 = arith.constant dense<0.000000e+00> : vector<128x128xf32>
    %93 = tpu.matmul %92, %17, %cst_50 {dimension_numbers = #tpu.dot_dimension_numbers<[1], [0], [0], [1], [0, 0, 1, 1], [], []>} : vector<128x128xf32>, vector<128x128xf32>, vector<128x128xf32> -> vector<128x128xf32>
    %c8 = arith.constant 8 : index
    %c0_51 = arith.constant 0 : index
    %c0_52 = arith.constant 0 : index
    %94 = vector.load %arg8[%c8, %c0_51, %c0_52] : memref<16x128x128xf32, #tpu.memory_space<vmem>>, vector<1x128x128xf32>
    %95 = vector.shape_cast %94 : vector<1x128x128xf32> to vector<128x128xf32>
    %cst_53 = arith.constant dense<0.000000e+00> : vector<128x128xf32>
    %96 = tpu.matmul %93, %95, %cst_53 {dimension_numbers = #tpu.dot_dimension_numbers<[1], [0], [0], [1], [0, 0, 1, 1], [], []>} : vector<128x128xf32>, vector<128x128xf32>, vector<128x128xf32> -> vector<128x128xf32>
    %97 = arith.addf %88, %96 : vector<128x128xf32>
    %c17_i32 = arith.constant 17 : i32
    %98 = vector.broadcast %c17_i32 : i32 to vector<128x128xi32>
    %99 = arith.cmpi eq, %20, %98 : vector<128x128xi32>
    %100 = arith.extui %99 : vector<128x128xi1> to vector<128x128xi32>
    %101 = arith.sitofp %100 : vector<128x128xi32> to vector<128x128xf32>
    %cst_54 = arith.constant dense<0.000000e+00> : vector<128x128xf32>
    %102 = tpu.matmul %101, %17, %cst_54 {dimension_numbers = #tpu.dot_dimension_numbers<[1], [0], [0], [1], [0, 0, 1, 1], [], []>} : vector<128x128xf32>, vector<128x128xf32>, vector<128x128xf32> -> vector<128x128xf32>
    %c9 = arith.constant 9 : index
    %c0_55 = arith.constant 0 : index
    %c0_56 = arith.constant 0 : index
    %103 = vector.load %arg8[%c9, %c0_55, %c0_56] : memref<16x128x128xf32, #tpu.memory_space<vmem>>, vector<1x128x128xf32>
    %104 = vector.shape_cast %103 : vector<1x128x128xf32> to vector<128x128xf32>
    %cst_57 = arith.constant dense<0.000000e+00> : vector<128x128xf32>
    %105 = tpu.matmul %102, %104, %cst_57 {dimension_numbers = #tpu.dot_dimension_numbers<[1], [0], [0], [1], [0, 0, 1, 1], [], []>} : vector<128x128xf32>, vector<128x128xf32>, vector<128x128xf32> -> vector<128x128xf32>
    %106 = arith.addf %97, %105 : vector<128x128xf32>
    %c18_i32 = arith.constant 18 : i32
    %107 = vector.broadcast %c18_i32 : i32 to vector<128x128xi32>
    %108 = arith.cmpi eq, %20, %107 : vector<128x128xi32>
    %109 = arith.extui %108 : vector<128x128xi1> to vector<128x128xi32>
    %110 = arith.sitofp %109 : vector<128x128xi32> to vector<128x128xf32>
    %cst_58 = arith.constant dense<0.000000e+00> : vector<128x128xf32>
    %111 = tpu.matmul %110, %17, %cst_58 {dimension_numbers = #tpu.dot_dimension_numbers<[1], [0], [0], [1], [0, 0, 1, 1], [], []>} : vector<128x128xf32>, vector<128x128xf32>, vector<128x128xf32> -> vector<128x128xf32>
    %c10 = arith.constant 10 : index
    %c0_59 = arith.constant 0 : index
    %c0_60 = arith.constant 0 : index
    %112 = vector.load %arg8[%c10, %c0_59, %c0_60] : memref<16x128x128xf32, #tpu.memory_space<vmem>>, vector<1x128x128xf32>
    %113 = vector.shape_cast %112 : vector<1x128x128xf32> to vector<128x128xf32>
    %cst_61 = arith.constant dense<0.000000e+00> : vector<128x128xf32>
    %114 = tpu.matmul %111, %113, %cst_61 {dimension_numbers = #tpu.dot_dimension_numbers<[1], [0], [0], [1], [0, 0, 1, 1], [], []>} : vector<128x128xf32>, vector<128x128xf32>, vector<128x128xf32> -> vector<128x128xf32>
    %115 = arith.addf %106, %114 : vector<128x128xf32>
    %c19_i32 = arith.constant 19 : i32
    %116 = vector.broadcast %c19_i32 : i32 to vector<128x128xi32>
    %117 = arith.cmpi eq, %20, %116 : vector<128x128xi32>
    %118 = arith.extui %117 : vector<128x128xi1> to vector<128x128xi32>
    %119 = arith.sitofp %118 : vector<128x128xi32> to vector<128x128xf32>
    %cst_62 = arith.constant dense<0.000000e+00> : vector<128x128xf32>
    %120 = tpu.matmul %119, %17, %cst_62 {dimension_numbers = #tpu.dot_dimension_numbers<[1], [0], [0], [1], [0, 0, 1, 1], [], []>} : vector<128x128xf32>, vector<128x128xf32>, vector<128x128xf32> -> vector<128x128xf32>
    %c11 = arith.constant 11 : index
    %c0_63 = arith.constant 0 : index
    %c0_64 = arith.constant 0 : index
    %121 = vector.load %arg8[%c11, %c0_63, %c0_64] : memref<16x128x128xf32, #tpu.memory_space<vmem>>, vector<1x128x128xf32>
    %122 = vector.shape_cast %121 : vector<1x128x128xf32> to vector<128x128xf32>
    %cst_65 = arith.constant dense<0.000000e+00> : vector<128x128xf32>
    %123 = tpu.matmul %120, %122, %cst_65 {dimension_numbers = #tpu.dot_dimension_numbers<[1], [0], [0], [1], [0, 0, 1, 1], [], []>} : vector<128x128xf32>, vector<128x128xf32>, vector<128x128xf32> -> vector<128x128xf32>
    %124 = arith.addf %115, %123 : vector<128x128xf32>
    %c24_i32 = arith.constant 24 : i32
    %125 = vector.broadcast %c24_i32 : i32 to vector<128x128xi32>
    %126 = arith.cmpi eq, %20, %125 : vector<128x128xi32>
    %127 = arith.extui %126 : vector<128x128xi1> to vector<128x128xi32>
    %128 = arith.sitofp %127 : vector<128x128xi32> to vector<128x128xf32>
    %cst_66 = arith.constant dense<0.000000e+00> : vector<128x128xf32>
    %129 = tpu.matmul %128, %17, %cst_66 {dimension_numbers = #tpu.dot_dimension_numbers<[1], [0], [0], [1], [0, 0, 1, 1], [], []>} : vector<128x128xf32>, vector<128x128xf32>, vector<128x128xf32> -> vector<128x128xf32>
    %c12 = arith.constant 12 : index
    %c0_67 = arith.constant 0 : index
    %c0_68 = arith.constant 0 : index
    %130 = vector.load %arg8[%c12, %c0_67, %c0_68] : memref<16x128x128xf32, #tpu.memory_space<vmem>>, vector<1x128x128xf32>
    %131 = vector.shape_cast %130 : vector<1x128x128xf32> to vector<128x128xf32>
    %cst_69 = arith.constant dense<0.000000e+00> : vector<128x128xf32>
    %132 = tpu.matmul %129, %131, %cst_69 {dimension_numbers = #tpu.dot_dimension_numbers<[1], [0], [0], [1], [0, 0, 1, 1], [], []>} : vector<128x128xf32>, vector<128x128xf32>, vector<128x128xf32> -> vector<128x128xf32>
    %133 = arith.addf %124, %132 : vector<128x128xf32>
    %c25_i32 = arith.constant 25 : i32
    %134 = vector.broadcast %c25_i32 : i32 to vector<128x128xi32>
    %135 = arith.cmpi eq, %20, %134 : vector<128x128xi32>
    %136 = arith.extui %135 : vector<128x128xi1> to vector<128x128xi32>
    %137 = arith.sitofp %136 : vector<128x128xi32> to vector<128x128xf32>
    %cst_70 = arith.constant dense<0.000000e+00> : vector<128x128xf32>
    %138 = tpu.matmul %137, %17, %cst_70 {dimension_numbers = #tpu.dot_dimension_numbers<[1], [0], [0], [1], [0, 0, 1, 1], [], []>} : vector<128x128xf32>, vector<128x128xf32>, vector<128x128xf32> -> vector<128x128xf32>
    %c13 = arith.constant 13 : index
    %c0_71 = arith.constant 0 : index
    %c0_72 = arith.constant 0 : index
    %139 = vector.load %arg8[%c13, %c0_71, %c0_72] : memref<16x128x128xf32, #tpu.memory_space<vmem>>, vector<1x128x128xf32>
    %140 = vector.shape_cast %139 : vector<1x128x128xf32> to vector<128x128xf32>
    %cst_73 = arith.constant dense<0.000000e+00> : vector<128x128xf32>
    %141 = tpu.matmul %138, %140, %cst_73 {dimension_numbers = #tpu.dot_dimension_numbers<[1], [0], [0], [1], [0, 0, 1, 1], [], []>} : vector<128x128xf32>, vector<128x128xf32>, vector<128x128xf32> -> vector<128x128xf32>
    %142 = arith.addf %133, %141 : vector<128x128xf32>
    %c26_i32 = arith.constant 26 : i32
    %143 = vector.broadcast %c26_i32 : i32 to vector<128x128xi32>
    %144 = arith.cmpi eq, %20, %143 : vector<128x128xi32>
    %145 = arith.extui %144 : vector<128x128xi1> to vector<128x128xi32>
    %146 = arith.sitofp %145 : vector<128x128xi32> to vector<128x128xf32>
    %cst_74 = arith.constant dense<0.000000e+00> : vector<128x128xf32>
    %147 = tpu.matmul %146, %17, %cst_74 {dimension_numbers = #tpu.dot_dimension_numbers<[1], [0], [0], [1], [0, 0, 1, 1], [], []>} : vector<128x128xf32>, vector<128x128xf32>, vector<128x128xf32> -> vector<128x128xf32>
    %c14 = arith.constant 14 : index
    %c0_75 = arith.constant 0 : index
    %c0_76 = arith.constant 0 : index
    %148 = vector.load %arg8[%c14, %c0_75, %c0_76] : memref<16x128x128xf32, #tpu.memory_space<vmem>>, vector<1x128x128xf32>
    %149 = vector.shape_cast %148 : vector<1x128x128xf32> to vector<128x128xf32>
    %cst_77 = arith.constant dense<0.000000e+00> : vector<128x128xf32>
    %150 = tpu.matmul %147, %149, %cst_77 {dimension_numbers = #tpu.dot_dimension_numbers<[1], [0], [0], [1], [0, 0, 1, 1], [], []>} : vector<128x128xf32>, vector<128x128xf32>, vector<128x128xf32> -> vector<128x128xf32>
    %151 = arith.addf %142, %150 : vector<128x128xf32>
    %c27_i32 = arith.constant 27 : i32
    %152 = vector.broadcast %c27_i32 : i32 to vector<128x128xi32>
    %153 = arith.cmpi eq, %20, %152 : vector<128x128xi32>
    %154 = arith.extui %153 : vector<128x128xi1> to vector<128x128xi32>
    %155 = arith.sitofp %154 : vector<128x128xi32> to vector<128x128xf32>
    %cst_78 = arith.constant dense<0.000000e+00> : vector<128x128xf32>
    %156 = tpu.matmul %155, %17, %cst_78 {dimension_numbers = #tpu.dot_dimension_numbers<[1], [0], [0], [1], [0, 0, 1, 1], [], []>} : vector<128x128xf32>, vector<128x128xf32>, vector<128x128xf32> -> vector<128x128xf32>
    %c15 = arith.constant 15 : index
    %c0_79 = arith.constant 0 : index
    %c0_80 = arith.constant 0 : index
    %157 = vector.load %arg8[%c15, %c0_79, %c0_80] : memref<16x128x128xf32, #tpu.memory_space<vmem>>, vector<1x128x128xf32>
    %158 = vector.shape_cast %157 : vector<1x128x128xf32> to vector<128x128xf32>
    %cst_81 = arith.constant dense<0.000000e+00> : vector<128x128xf32>
    %159 = tpu.matmul %156, %158, %cst_81 {dimension_numbers = #tpu.dot_dimension_numbers<[1], [0], [0], [1], [0, 0, 1, 1], [], []>} : vector<128x128xf32>, vector<128x128xf32>, vector<128x128xf32> -> vector<128x128xf32>
    %160 = arith.addf %151, %159 : vector<128x128xf32>
    %c0_82 = arith.constant 0 : index
    %c0_83 = arith.constant 0 : index
    %161 = vector.load %arg9[%c0_82, %c0_83] : memref<1x128xf32, #tpu.memory_space<vmem>>, vector<1x128xf32>
    %162 = vector.broadcast %161 : vector<1x128xf32> to vector<128x128xf32>
    %163 = arith.addf %160, %162 : vector<128x128xf32>
    %c0_84 = arith.constant 0 : index
    %c0_85 = arith.constant 0 : index
    %164 = vector.load %arg11[%c0_84, %c0_85] : memref<128x128xf32, #tpu.memory_space<vmem>>, vector<128x128xf32>
    tpu.vector_store %arg11[%c0_84, %c0_85], %163 {strides = array<i32>} : memref<128x128xf32, #tpu.memory_space<vmem>>, vector<128x128xf32>,
    return
  }
  func.func @transform_0(%arg0: i32) -> (i32, i32) {
    %c0_i32 = arith.constant 0 : i32
    %c0_i32_0 = arith.constant 0 : i32
    %c0_i32_1 = arith.constant 0 : i32
    return %c0_i32, %c0_i32_0 : i32, i32
  }
  func.func @transform_1(%arg0: i32) -> (i32, i32) {
    %c0_i32 = arith.constant 0 : i32
    %c0_i32_0 = arith.constant 0 : i32
    %c0_i32_1 = arith.constant 0 : i32
    return %c0_i32, %c0_i32_0 : i32, i32
  }
  func.func @transform_2(%arg0: i32) -> (i32, i32) {
    %c0_i32 = arith.constant 0 : i32
    %c0_i32_0 = arith.constant 0 : i32
    %c0_i32_1 = arith.constant 0 : i32
    return %c0_i32, %c0_i32_0 : i32, i32
  }
  func.func @transform_3(%arg0: i32) -> (i32, i32) {
    %c0_i32 = arith.constant 0 : i32
    %c0_i32_0 = arith.constant 0 : i32
    %c0_i32_1 = arith.constant 0 : i32
    return %c0_i32, %c0_i32_0 : i32, i32
  }
  func.func @transform_4(%arg0: i32) -> (i32, i32) {
    %c0_i32 = arith.constant 0 : i32
    %c0_i32_0 = arith.constant 0 : i32
    %c0_i32_1 = arith.constant 0 : i32
    return %c0_i32, %c0_i32_0 : i32, i32
  }
  func.func @transform_5(%arg0: i32) -> (i32, i32) {
    %c0_i32 = arith.constant 0 : i32
    %c0_i32_0 = arith.constant 0 : i32
    %c0_i32_1 = arith.constant 0 : i32
    return %c0_i32, %c0_i32_0 : i32, i32
  }
  func.func @transform_6(%arg0: i32) -> (i32, i32) {
    %c0_i32 = arith.constant 0 : i32
    %c0_i32_0 = arith.constant 0 : i32
    %c0_i32_1 = arith.constant 0 : i32
    return %c0_i32, %c0_i32_0 : i32, i32
  }
  func.func @transform_7(%arg0: i32) -> (i32, i32, i32) {
    %c0_i32 = arith.constant 0 : i32
    %c0_i32_0 = arith.constant 0 : i32
    %c0_i32_1 = arith.constant 0 : i32
    %c0_i32_2 = arith.constant 0 : i32
    return %c0_i32, %c0_i32_0, %c0_i32_1 : i32, i32, i32
  }
  func.func @transform_8(%arg0: i32) -> (i32, i32) {
    %c0_i32 = arith.constant 0 : i32
    %c0_i32_0 = arith.constant 0 : i32
    %c0_i32_1 = arith.constant 0 : i32
    return %c0_i32, %c0_i32_0 : i32, i32
  }
  func.func @transform_9(%arg0: i32) -> (i32, i32) {
    %c0_i32 = arith.constant 0 : i32
    %c0_i32_0 = arith.constant 0 : i32
    %c0_i32_1 = arith.constant 0 : i32
    return %c0_i32, %c0_i32_0 : i32, i32
  }
  func.func @transform_10(%arg0: i32) -> (i32, i32) {
    %c0_i32 = arith.constant 0 : i32
    %c0_i32_0 = arith.constant 0 : i32
    %c0_i32_1 = arith.constant 0 : i32
    return %c0_i32, %c0_i32_0 : i32, i32
  }
}

</mosaic_0001>

<bundles_post_ra>
// kernel: qhead_forward.1
= control target key start
LH: loop header
LB: loop body
LE: loop exit
PB: predicated region body
PF: predicated region fallthrough
CT: control target
= control target key end

     0   :  { %v11078_v3 = vmov 0.0|0.0   ;;  %vm11079_vm0 = vmmov 0   ;;  %s13717_s1 = inlined_call_operand.vmem [shape: f32[128,128], index: 1, kind: input, shape index: {}]   ;;  %s13718_s0 = inlined_call_operand.vmem [shape: f32[128,128], index: 0, kind: input, shape index: {}]   ;;  %s13719_s5 = inlined_call_operand.vmem [shape: f32[128,128], index: 5, kind: input, shape index: {}]   ;;  %s13720_s4 = inlined_call_operand.vmem [shape: f32[56,128], index: 4, kind: input, shape index: {}]   ;;  %s13721_s2 = inlined_call_operand.vmem [shape: f32[1,128], index: 2, kind: input, shape index: {}]   ;;  %s13722_s3 = inlined_call_operand.vmem [shape: f32[1,128], index: 3, kind: input, shape index: {}]   ;;  %s13723_s6 = inlined_call_operand.vmem [shape: f32[1,128], index: 6, kind: input, shape index: {}]   ;;  %s13724_s7 = inlined_call_operand.vmem [shape: f32[16,128,128], index: 7, kind: input, shape index: {}]   ;;  %s13725_s9 = inlined_call_operand.vmem [shape: f32[56,128], index: 9, kind: output, shape index: {0}]   ;;  %s13726_s8 = inlined_call_operand.vmem [shape: f32[1,128], index: 8, kind: input, shape index: {}]   ;;  %s13727_s10 = inlined_call_operand.vmem [shape: f32[128,128], index: 10, kind: output, shape index: {1}]  }
   0x1   :  { %v187_v0 = vld [vmem:[%s13717_s1] sm:$0xff]  ;;  %v188_v1 = vld [vmem:[%s13717_s1 + $0x8] sm:$0xff]  ;;  %v189_v2 = vld [vmem:[%s13717_s1 + $0x10] sm:$0xff]  ;;  %9770 = vmatprep.subr.bf16.mxu0 %v11078_v3 }
   0x2   :  { %v9794_v4 = vpack.c.bf16 %v188_v1, %v187_v0  ;;  %v190_v5 = vld [vmem:[%s13717_s1 + $0x18] sm:$0xff]  ;;  %v191_v7 = vld [vmem:[%s13717_s1 + $0x20] sm:$0xff]  ;;  %v192_v8 = vld [vmem:[%s13717_s1 + $0x28] sm:$0xff]  ;;  %v11080_v1 = vmov 0.0  }
   0x3   :  { %v9798_v6 = vpack.c.bf16 %v190_v5, %v189_v2  ;;  %v9802_v9 = vpack.c.bf16 %v192_v8, %v191_v7  ;;  %v171_v10 = vld [vmem:[%s13718_s0] sm:$0xff]  ;;  %v193_v11 = vld [vmem:[%s13717_s1 + $0x30] sm:$0xff]  ;;  %v194_v12 = vld [vmem:[%s13717_s1 + $0x38] sm:$0xff]  ;;  %7957 = vmatprep.mubr.msk.f32.mxu0 %vm11079_vm0, %v11080_v1  ;;  %v410_v8 = vlaneseq }
   0x4   :  { %9795 = vmatprep.subr.bf16.mxu1 %v9794_v4  ;;  %8010 = vmatprep.mubr.f32.mxu1 %v171_v10  ;;  %v9806_v13 = vpack.c.bf16 %v194_v12, %v193_v11  ;;  %v195_v14 = vld [vmem:[%s13717_s1 + $0x40] sm:$0xff]  ;;  %v196_v15 = vld [vmem:[%s13717_s1 + $0x48] sm:$0xff]  ;;  %v43_v18 = vld [vmem:[%s13719_s5 + $0x10] sm:$0xff] }
   0x5   :  { %9797 = vmatpush3.bf16.msra.mxu1 %v9794_v4  ;;  %v41_v16 = vld [vmem:[%s13719_s5] sm:$0xff]  ;;  %v42_v17 = vld [vmem:[%s13719_s5 + $0x8] sm:$0xff]  ;;  %v44_v19 = vld [vmem:[%s13719_s5 + $0x18] sm:$0xff]  ;;  %v9810_v21 = vpack.c.bf16 %v196_v15, %v195_v14  ;;  %v428_v11 = vand.u32 127, %v410_v8 }
   0x6   :  { %9799 = vmatprep.subr.bf16.mxu1 %v9798_v6  ;;  %v9771_v20 = vpack.c.bf16 %v42_v17, %v41_v16  ;;  %v197_v22 = vld [vmem:[%s13717_s1 + $0x50] sm:$0xff]  ;;  %v198_v23 = vld [vmem:[%s13717_s1 + $0x58] sm:$0xff]  ;;  %v9774_v24 = vpack.c.bf16 %v44_v19, %v43_v18  ;;  %v45_v25 = vld [vmem:[%s13719_s5 + $0x20] sm:$0xff]  ;;  %v11081_v16 = vmov 1.0  }
   0x7   :  { %v46_v26 = vld [vmem:[%s13719_s5 + $0x28] sm:$0xff]  ;;  %v9814_v27 = vpack.c.bf16 %v198_v23, %v197_v22  ;;  %v199_v28 = vld [vmem:[%s13717_s1 + $0x60] sm:$0xff]  ;;  %v47_v31 = vld [vmem:[%s13719_s5 + $0x30] sm:$0xff] }
   0x8   :  { %9772 = vmatpush3.bf16.msra.mxu0 %v9771_v20  ;;  %v200_v29 = vld [vmem:[%s13717_s1 + $0x68] sm:$0xff]  ;;  %v9777_v30 = vpack.c.bf16 %v46_v26, %v45_v25  ;;  %v48_v32 = vld [vmem:[%s13719_s5 + $0x38] sm:$0xff]  ;;  %v201_v34 = vld [vmem:[%s13717_s1 + $0x70] sm:$0xff] }
   0x9   :  { %9801 = vmatpush3.bf16.msra.mxu1 %v9798_v6  ;;  %9773 = vmatprep.subr.bf16.mxu0 %v11078_v3  ;;  %v9818_v33 = vpack.c.bf16 %v200_v29, %v199_v28  ;;  %v202_v35 = vld [vmem:[%s13717_s1 + $0x78] sm:$0xff]  ;;  %v9780_v36 = vpack.c.bf16 %v48_v32, %v47_v31  ;;  %v49_v37 = vld [vmem:[%s13719_s5 + $0x40] sm:$0xff]  ;;  %v50_v38 = vld [vmem:[%s13719_s5 + $0x48] sm:$0xff] }
   0xa   :  { %9803 = vmatprep.subr.bf16.mxu1 %v9802_v9  ;;  %v9822_v39 = vpack.c.bf16 %v202_v35, %v201_v34  ;;  %v9783_v40 = vpack.c.bf16 %v50_v38, %v49_v37  ;;  %v51_v41 = vld [vmem:[%s13719_s5 + $0x50] sm:$0xff]  ;;  %v52_v42 = vld [vmem:[%s13719_s5 + $0x58] sm:$0xff]  ;;  %v172_v44 = vld [vmem:[%s13718_s0 + $0x8] sm:$0xff] }
   0xb   :  { %v9786_v43 = vpack.c.bf16 %v52_v42, %v51_v41  ;;  %v173_v45 = vld [vmem:[%s13718_s0 + $0x10] sm:$0xff]  ;;  %v174_v46 = vld [vmem:[%s13718_s0 + $0x18] sm:$0xff]  ;;  %v175_v47 = vld [vmem:[%s13718_s0 + $0x20] sm:$0xff] }
   0xc   :  { %9775 = vmatpush3.bf16.msra.mxu0 %v9774_v24  ;;  %v176_v48 = vld [vmem:[%s13718_s0 + $0x28] sm:$0xff]  ;;  %v177_v49 = vld [vmem:[%s13718_s0 + $0x30] sm:$0xff]  ;;  %v178_v50 = vld [vmem:[%s13718_s0 + $0x38] sm:$0xff] }
   0xd   :  { %9805 = vmatpush3.bf16.msra.mxu1 %v9802_v9  ;;  %9776 = vmatprep.subr.bf16.mxu0 %v11078_v3  ;;  %v179_v51 = vld [vmem:[%s13718_s0 + $0x40] sm:$0xff]  ;;  %v180_v52 = vld [vmem:[%s13718_s0 + $0x48] sm:$0xff]  ;;  %v181_v53 = vld [vmem:[%s13718_s0 + $0x50] sm:$0xff]  ;;  %v411_v9 = vshrl.u32 %v410_v8, 7 }
   0xe   :  { %9807 = vmatprep.subr.bf16.mxu1 %v9806_v13  ;;  %v182_v54 = vld [vmem:[%s13718_s0 + $0x58] sm:$0xff]  ;;  %v183_v55 = vld [vmem:[%s13718_s0 + $0x60] sm:$0xff]  ;;  %v184_v56 = vld [vmem:[%s13718_s0 + $0x68] sm:$0xff] }
   0xf   :  { %v185_v57 = vld [vmem:[%s13718_s0 + $0x70] sm:$0xff]  ;;  %v186_v58 = vld [vmem:[%s13718_s0 + $0x78] sm:$0xff]  ;;  %v53_v59 = vld [vmem:[%s13719_s5 + $0x60] sm:$0xff]  ;;  %v412_v12 = vadd.s32 8, %v411_v9  ;;  %v413_v15 = vadd.s32 16, %v411_v9  ;;  %v414_v17 = vadd.s32 24, %v411_v9 }
  0x10   :  { %9778 = vmatpush3.bf16.msra.mxu0 %v9777_v30  ;;  %v54_v60 = vld [vmem:[%s13719_s5 + $0x68] sm:$0xff]  ;;  %v55_v62 = vld [vmem:[%s13719_s5 + $0x70] sm:$0xff]  ;;  %v56_v63 = vld [vmem:[%s13719_s5 + $0x78] sm:$0xff]  ;;  %v415_v20 = vadd.s32 32, %v411_v9  ;;  %v417_v24 = vadd.s32 48, %v411_v9  ;;  %v418_v25 = vadd.s32 56, %v411_v9 }
  0x11   :  { %9809 = vmatpush3.bf16.msra.mxu1 %v9806_v13  ;;  %9779 = vmatprep.subr.bf16.mxu0 %v11078_v3  ;;  %v9789_v61 = vpack.c.bf16 %v54_v60, %v53_v59  ;;  %v9792_v0 = vpack.c.bf16 %v56_v63, %v55_v62  ;;  %v34_v2 = vld [vmem:[%s13720_s4] sm:$0xff]  ;;  %v36_v4 = vld [vmem:[%s13720_s4 + $0x10] sm:$0xff]  ;;  %v37_v5 = vld [vmem:[%s13720_s4 + $0x18] sm:$0xff]  ;;  %v11324_v13 = vsub.s32 %v428_v11, %v411_v9  ;;  %v419_v28 = vadd.s32 64, %v411_v9 }
  0x12   :  { %9811 = vmatprep.subr.bf16.mxu1 %v9810_v21  ;;  %v38_v6 = vld [vmem:[%s13720_s4 + $0x20] sm:$0xff]  ;;  %v39_v7 = vld [vmem:[%s13720_s4 + $0x28] sm:$0xff]  ;;  %v40_v10 = vld [vmem:[%s13720_s4 + $0x30] sm:$0xff]  ;;  %v11326_v14 = vsub.s32 %v428_v11, %v412_v12  ;;  %v11330_v18 = vsub.s32 %v428_v11, %v413_v15  ;;  %v11332_v19 = vsub.s32 %v428_v11, %v414_v17  ;;  %v11334_v22 = vsub.s32 %v428_v11, %v415_v20 }
  0x13   :  { %vm461_vm1 = vcmp.eq.s32.totalorder %v11324_v13, 1  ;;  %v11338_v26 = vsub.s32 %v428_v11, %v417_v24  ;;  %v420_v29 = vadd.s32 72, %v411_v9  ;;  %v11342_v30 = vsub.s32 %v428_v11, %v419_v28 }
  0x14   :  { %9781 = vmatpush3.bf16.msra.mxu0 %v9780_v36  ;;  %v421_v32 = vadd.s32 80, %v411_v9  ;;  %v423_v36 = vadd.s32 96, %v411_v9  ;;  %v424_v37 = vadd.s32 104, %v411_v9  ;;  %v426_v41 = vadd.s32 120, %v411_v9 }
  0x15   :  { %9813 = vmatpush3.bf16.msra.mxu1 %v9810_v21  ;;  %9782 = vmatprep.subr.bf16.mxu0 %v11078_v3  ;;  %v416_v21 = vadd.s32 40, %v411_v9  ;;  %v11344_v31 = vsub.s32 %v428_v11, %v420_v29  ;;  %vm462_vm2 = vcmp.eq.s32.totalorder %v11326_v14, 1  ;;  %vm463_vm3 = vcmp.eq.s32.totalorder %v11330_v18, 1 }
  0x16   :  { %9815 = vmatprep.subr.bf16.mxu1 %v9814_v27  ;;  %v11346_v34 = vsub.s32 %v428_v11, %v421_v32  ;;  %v11350_v38 = vsub.s32 %v428_v11, %v423_v36  ;;  %vm464_vm4 = vcmp.eq.s32.totalorder %v11332_v19, 1  ;;  %vm465_vm5 = vcmp.eq.s32.totalorder %v11334_v22, 1 }
  0x17   :  { %v11336_v23 = vsub.s32 %v428_v11, %v416_v21  ;;  %vm467_vm7 = vcmp.eq.s32.totalorder %v11338_v26, 1  ;;  %vm469_vm9 = vcmp.eq.s32.totalorder %v11342_v30, 1  ;;  %vm470_vm10 = vcmp.eq.s32.totalorder %v11344_v31, 1 }
  0x18   :  { %9784 = vmatpush3.bf16.msra.mxu0 %v9783_v40  ;;  %v425_v40 = vadd.s32 112, %v411_v9  ;;  %vm471_vm11 = vcmp.eq.s32.totalorder %v11346_v34, 1  ;;  %vm473_vm13 = vcmp.eq.s32.totalorder %v11350_v38, 1 }
  0x19   :  { %9817 = vmatpush3.bf16.msra.mxu1 %v9814_v27  ;;  %9785 = vmatprep.subr.bf16.mxu0 %v11078_v3  ;;  %v11340_v27 = vsub.s32 %v428_v11, %v418_v25  ;;  %vm466_vm6 = vcmp.eq.s32.totalorder %v11336_v23, 1 }
  0x1a   :  { %9819 = vmatprep.subr.bf16.mxu1 %v9818_v33  ;;  %v11354_v42 = vsub.s32 %v428_v11, %v425_v40 }
  0x1b   :  { %vm468_vm8 = vcmp.eq.s32.totalorder %v11340_v27, 1 }
  0x1c   :  { %9787 = vmatpush3.bf16.msra.mxu0 %v9786_v43  ;;  %v11356_v43 = vsub.s32 %v428_v11, %v426_v41  ;;  %vm475_vm15 = vcmp.eq.s32.totalorder %v11354_v42, 1 }
  0x1d   :  { %9821 = vmatpush3.bf16.msra.mxu1 %v9818_v33  ;;  %9788 = vmatprep.subr.bf16.mxu0 %v11078_v3  ;;  %v422_v33 = vadd.s32 88, %v411_v9 }
  0x1e   :  { %9823 = vmatprep.subr.bf16.mxu1 %v9822_v39 }
  0x1f   :  { %v11348_v35 = vsub.s32 %v428_v11, %v422_v33 }
  0x20   :  { %9790 = vmatpush3.bf16.msra.mxu0 %v9789_v61 }
  0x21   :  { %9825 = vmatpush3.bf16.msra.mxu1 %v9822_v39  ;;  %9791 = vmatprep.subr.bf16.mxu0 %v11078_v3  ;;  %v35_v3 = vld [vmem:[%s13720_s4 + $0x8] sm:$0xff]  ;;  %v11352_v39 = vsub.s32 %v428_v11, %v424_v37  ;;  %vm472_vm12 = vcmp.eq.s32.totalorder %v11348_v35, 1 }
  0x23   :  { %vm474_vm14 = vcmp.eq.s32.totalorder %v11352_v39, 1 }
  0x24   :  { %8011 = vmatmul.mubr.f32.vlgmr.msra.gmra.mrb[0].mxu1 %v172_v44  ;;  %9793 = vmatpush3.bf16.msra.mxu0 %v9792_v0  ;;  %v11361_v44 = vld [vmem:[%s13721_s2] ss:$0 sm:$0xff] }
  0x25   :  { %8013 = vmatprep.mubr.f32.mxu1 %v173_v45 }
  0x27   :  { %7958 = vmatmul.mubr.f32.vlgmr.msra.gmra.mrb[0].mxu0 %v34_v2 }
  0x28   :  { %8014 = vmatmul.mubr.f32.gmra.mrb[2].mxu1 %v174_v46  ;;  %7960 = vmatprep.mubr.msk.f32.mxu0 %vm11079_vm0, %v11080_v1  ;;  %v11366_v46 = vld [vmem:[%s13722_s3] ss:$0 sm:$0xff] }
  0x29   :  { %8016 = vmatprep.mubr.f32.mxu1 %v175_v47 }
  0x2b   :  { %7961 = vmatmul.mubr.f32.gmra.mrb[2].mxu0 %v35_v3 }
  0x2c   :  { %8017 = vmatmul.mubr.f32.gmra.mrb[4].mxu1 %v176_v48  ;;  %7963 = vmatprep.mubr.msk.f32.mxu0 %vm11079_vm0, %v11080_v1 }
  0x2d   :  { %8019 = vmatprep.mubr.f32.mxu1 %v177_v49 }
  0x2f   :  { %7964 = vmatmul.mubr.f32.gmra.mrb[4].mxu0 %v36_v4 }
  0x30   :  { %8020 = vmatmul.mubr.f32.gmra.mrb[6].mxu1 %v178_v50  ;;  %7966 = vmatprep.mubr.msk.f32.mxu0 %vm11079_vm0, %v11080_v1 }
  0x31   :  { %8022 = vmatprep.mubr.f32.mxu1 %v179_v51 }
  0x33   :  { %7967 = vmatmul.mubr.f32.gmra.mrb[6].mxu0 %v37_v5 }
  0x34   :  { %8023 = vmatmul.mubr.f32.gmra.mrb[8].mxu1 %v180_v52  ;;  %7969 = vmatprep.mubr.msk.f32.mxu0 %vm11079_vm0, %v11080_v1 }
  0x35   :  { %8025 = vmatprep.mubr.f32.mxu1 %v181_v53 }
  0x37   :  { %7970 = vmatmul.mubr.f32.gmra.mrb[8].mxu0 %v38_v6 }
  0x38   :  { %8026 = vmatmul.mubr.f32.gmra.mrb[10].mxu1 %v182_v54  ;;  %7972 = vmatprep.mubr.msk.f32.mxu0 %vm11079_vm0, %v11080_v1 }
  0x39   :  { %8028 = vmatprep.mubr.f32.mxu1 %v183_v55 }
  0x3b   :  { %7973 = vmatmul.mubr.f32.gmra.mrb[10].mxu0 %v39_v7 }
  0x3c   :  { %8029 = vmatmul.mubr.f32.gmra.mrb[12].mxu1 %v184_v56  ;;  %7975 = vmatprep.mubr.msk.f32.mxu0 %vm11079_vm0, %v11080_v1  ;;  %vm476_vm0 = vcmp.eq.s32.totalorder %v11356_v43, 1 }
  0x3d   :  { %8031 = vmatprep.mubr.f32.mxu1 %v185_v57 }
  0x3f   :  { %7976 = vmatmul.mubr.f32.gmra.mrb[12].mxu0 %v40_v10 }
  0x40   :  { %8032 = vmatmul.mubr.f32.gmra.mrb[14].mxu1 %v186_v58  ;;  %8066 = vmatprep.mubr.msk.f32.mxu0 %vm461_vm1, %v11081_v16  ;;  %vm961_vm1 = vcmp.eq.s32.totalorder %v11324_v13, 2 }
  0xf7   :  { %v8012_v45 = vpop.f32.mrb[0].mxu1 }
  0xf8   :  { %v356_v47 = vmul.f32 %v8012_v45, %v11361_v44  ;;  %v269_v48 = vpop.f32.mrb[1].mxu1 }
  0xf9   :  { %v355_v49 = vmul.f32 %v11361_v44, %v269_v48 }
  0xfa   :  { %v11371_v50 = vadd.f32 %v11366_v46, %v356_v47 }
  0xfb   :  { %v11374_v51 = vadd.f32 %v11366_v46, %v355_v49  ;;  %v8015_v52 = vpop.f32.mrb[2].mxu1 }
  0xfc   :  { %v395_v53 = vmax.f32 %v11371_v50, 0.0  ;;  %v358_v54 = vmul.f32 %v8015_v52, %v11361_v44  ;;  %v279_v55 = vpop.f32.mrb[3].mxu1 }
  0xfd   :  { %v394_v56 = vmax.f32 %v11374_v51, 0.0  ;;  %v357_v57 = vmul.f32 %v11361_v44, %v279_v55  ;;  %v6289_v51 = vld [vmem:[%s13724_s7 + $0x120] sm:$0xff] }
  0xfe   :  { %v11381_v58 = vadd.f32 %v11366_v46, %v358_v54 }
  0xff   :  { %v11387_v59 = vpack.c.bf16 %v395_v53, %v394_v56  ;;  %v11390_v60 = vadd.f32 %v11366_v46, %v357_v57  ;;  %v8018_v61 = vpop.f32.mrb[4].mxu1 }
 0x100   :  { %v397_v62 = vmax.f32 %v11381_v58, 0.0  ;;  %v360_v63 = vmul.f32 %v8018_v61, %v11361_v44  ;;  %v289_v0 = vpop.f32.mrb[5].mxu1 }
 0x101   :  { %v396_v2 = vmax.f32 %v11390_v60, 0.0  ;;  %v359_v3 = vmul.f32 %v11361_v44, %v289_v0  ;;  %9827 = vmatprep.subr.bf16.mxu0 %v11387_v59  ;;  %v6292_v60 = vld [vmem:[%s13724_s7 + $0x138] sm:$0xff] }
 0x102   :  { %v11398_v4 = vadd.f32 %v11366_v46, %v360_v63  ;;  %9829 = vmatpush3.bf16.msra.mxu0 %v11387_v59 }
 0x103   :  { %v11405_v5 = vpack.c.bf16 %v397_v62, %v396_v2  ;;  %v11408_v6 = vadd.f32 %v11366_v46, %v359_v3  ;;  %v8021_v7 = vpop.f32.mrb[6].mxu1 }
 0x104   :  { %v399_v8 = vmax.f32 %v11398_v4, 0.0  ;;  %v362_v9 = vmul.f32 %v8021_v7, %v11361_v44  ;;  %v299_v10 = vpop.f32.mrb[7].mxu1 }
 0x105   :  { %v398_v11 = vmax.f32 %v11408_v6, 0.0  ;;  %v361_v12 = vmul.f32 %v11361_v44, %v299_v10  ;;  %9831 = vmatprep.subr.bf16.mxu0 %v11405_v5  ;;  %v6293_v6 = vld [vmem:[%s13724_s7 + $0x140] sm:$0xff] }
 0x106   :  { %v11416_v15 = vadd.f32 %v11366_v46, %v362_v9  ;;  %9833 = vmatpush3.bf16.msra.mxu0 %v11405_v5 }
 0x107   :  { %v11423_v17 = vpack.c.bf16 %v399_v8, %v398_v11  ;;  %v11426_v20 = vadd.f32 %v11366_v46, %v361_v12  ;;  %v8024_v21 = vpop.f32.mrb[8].mxu1 }
 0x108   :  { %v401_v24 = vmax.f32 %v11416_v15, 0.0  ;;  %v364_v25 = vmul.f32 %v8024_v21, %v11361_v44  ;;  %v309_v28 = vpop.f32.mrb[9].mxu1 }
 0x109   :  { %v400_v29 = vmax.f32 %v11426_v20, 0.0  ;;  %v363_v32 = vmul.f32 %v11361_v44, %v309_v28  ;;  %9835 = vmatprep.subr.bf16.mxu0 %v11423_v17  ;;  %v6295_v20 = vld [vmem:[%s13724_s7 + $0x150] sm:$0xff] }
 0x10a   :  { %v11434_v33 = vadd.f32 %v11366_v46, %v364_v25  ;;  %9837 = vmatpush3.bf16.msra.mxu0 %v11423_v17 }
 0x10b   :  { %v11441_v36 = vpack.c.bf16 %v401_v24, %v400_v29  ;;  %v11444_v37 = vadd.f32 %v11366_v46, %v363_v32  ;;  %v8027_v40 = vpop.f32.mrb[10].mxu1 }
 0x10c   :  { %v403_v41 = vmax.f32 %v11434_v33, 0.0  ;;  %v366_v45 = vmul.f32 %v8027_v40, %v11361_v44  ;;  %v319_v47 = vpop.f32.mrb[11].mxu1 }
 0x10d   :  { %v402_v48 = vmax.f32 %v11444_v37, 0.0  ;;  %v365_v49 = vmul.f32 %v11361_v44, %v319_v47  ;;  %9839 = vmatprep.subr.bf16.mxu0 %v11441_v36  ;;  %v6297_v37 = vld [vmem:[%s13724_s7 + $0x160] sm:$0xff] }
 0x10e   :  { %v11452_v52 = vadd.f32 %v11366_v46, %v366_v45  ;;  %9841 = vmatpush3.bf16.msra.mxu0 %v11441_v36 }
 0x10f   :  { %v11459_v54 = vpack.c.bf16 %v403_v41, %v402_v48  ;;  %v11462_v55 = vadd.f32 %v11366_v46, %v365_v49  ;;  %v8030_v57 = vpop.f32.mrb[12].mxu1 }
 0x110   :  { %v405_v61 = vmax.f32 %v11452_v52, 0.0  ;;  %v368_v63 = vmul.f32 %v8030_v57, %v11361_v44  ;;  %v329_v0 = vpop.f32.mrb[13].mxu1 }
 0x111   :  { %v404_v3 = vmax.f32 %v11462_v55, 0.0  ;;  %v367_v7 = vmul.f32 %v11361_v44, %v329_v0  ;;  %9843 = vmatprep.subr.bf16.mxu0 %v11459_v54  ;;  %v6299_v55 = vld [vmem:[%s13724_s7 + $0x170] sm:$0xff] }
 0x112   :  { %v11470_v9 = vadd.f32 %v11366_v46, %v368_v63  ;;  %9845 = vmatpush3.bf16.msra.mxu0 %v11459_v54 }
 0x113   :  { %v11477_v10 = vpack.c.bf16 %v405_v61, %v404_v3  ;;  %v11480_v12 = vadd.f32 %v11366_v46, %v367_v7  ;;  %v8033_v21 = vpop.f32.mrb[14].mxu1  ;;  %v130_v7 = vpop.f32.mrb[0].mxu0 }
 0x114   :  { %v407_v25 = vmax.f32 %v11470_v9, 0.0  ;;  %v370_v28 = vmul.f32 %v8033_v21, %v11361_v44  ;;  %v339_v32 = vpop.f32.mrb[15].mxu1  ;;  %v6237_v21 = vld [vmem:[%s13724_s7 + $0x80] sm:$0xff] }
 0x115   :  { %v406_v40 = vmax.f32 %v11480_v12, 0.0  ;;  %v369_v45 = vmul.f32 %v11361_v44, %v339_v32  ;;  %9847 = vmatprep.subr.bf16.mxu0 %v11477_v10  ;;  %v6333_v12 = vld [vmem:[%s13724_s7 + $0x180] sm:$0xff] }
 0x116   :  { %v11488_v47 = vadd.f32 %v11366_v46, %v370_v28  ;;  %9849 = vmatpush3.bf16.msra.mxu0 %v11477_v10  ;;  %v6238_v28 = vld [vmem:[%s13724_s7 + $0x88] sm:$0xff] }
 0x117   :  { %v11495_v49 = vpack.c.bf16 %v407_v25, %v406_v40  ;;  %v11498_v57 = vadd.f32 %v11366_v46, %v369_v45  ;;  %v11596_v46 = vld [vmem:[%s13723_s6] ss:$0 sm:$0xff]  ;;  %v7959_v45 = vpop.f32.mrb[1].mxu0 }
 0x118   :  { %v13728_v63 = vmax.f32 %v11488_v47, 0.0  ;;  %v131_v32 = vadd.f32 %v11596_v46, %v130_v7  ;;  %v6239_v7 = vld [vmem:[%s13724_s7 + $0x90] sm:$0xff] }
 0x119   :  { %v13729_v44 = vmax.f32 %v11498_v57, 0.0  ;;  %9851 = vmatprep.subr.bf16.mxu0 %v11495_v49 }
 0x11a   :  { %9853 = vmatpush3.bf16.msra.mxu0 %v11495_v49  ;;  %164 = vst [vmem:[%s13725_s9] sm:$0xff] %v131_v32 }
 0x11b   :  { %v11508_v0 = vpack.c.bf16 %v13728_v63, %v13729_v44  ;;  %v9858_v63 = vpack.c.bf16 %v6238_v28, %v6237_v21  ;;  %v6240_v21 = vld [vmem:[%s13724_s7 + $0x98] sm:$0xff] }
 0x11c   :  { %v9862_v28 = vpack.c.bf16 %v6240_v21, %v6239_v7  ;;  %v6241_v7 = vld [vmem:[%s13724_s7 + $0xa0] sm:$0xff]  ;;  %v6242_v21 = vld [vmem:[%s13724_s7 + $0xa8] sm:$0xff] }
 0x11d   :  { %9855 = vmatprep.subr.bf16.mxu0 %v11508_v0  ;;  %9859 = vmatprep.subr.bf16.mxu1 %v9858_v63  ;;  %v9866_v44 = vpack.c.bf16 %v6242_v21, %v6241_v7  ;;  %v6243_v7 = vld [vmem:[%s13724_s7 + $0xb0] sm:$0xff]  ;;  %v6244_v21 = vld [vmem:[%s13724_s7 + $0xb8] sm:$0xff] }
 0x11e   :  { %9857 = vmatpush3.bf16.msra.mxu0 %v11508_v0  ;;  %9861 = vmatpush3.bf16.msra.mxu1 %v9858_v63  ;;  %v135_v63 = vpop.f32.mrb[2].mxu0 }
 0x11f   :  { %9923 = vmatprep.subr.bf16.mxu0 %v11387_v59  ;;  %9863 = vmatprep.subr.bf16.mxu1 %v9862_v28  ;;  %v136_v32 = vadd.f32 %v11596_v46, %v135_v63  ;;  %v7962_v45 = vpop.f32.mrb[3].mxu0 }
 0x121   :  { %8067 = vmatmul.mubr.msk.f32.vlgmr.msra.gmra.mrb[14].mxu0 %vm462_vm2, %v11081_v16  ;;  %vm962_vm2 = vcmp.eq.s32.totalorder %v11326_v14, 2  ;;  %165 = vst [vmem:[%s13725_s9 + $0x8] sm:$0xff] %v136_v32  ;;  %v9870_v32 = vpack.c.bf16 %v6244_v21, %v6243_v7  ;;  %v6245_v7 = vld [vmem:[%s13724_s7 + $0xc0] sm:$0xff]  ;;  %v6246_v21 = vld [vmem:[%s13724_s7 + $0xc8] sm:$0xff] }
 0x122   :  { %9925 = vmatpush3.bf16.msra.mxu0 %v11387_v59  ;;  %8069 = vmatprep.mubr.msk.f32.mxu0 %vm463_vm3, %v11081_v16  ;;  %vm963_vm3 = vcmp.eq.s32.totalorder %v11330_v18, 2 }
 0x123   :  { %9927 = vmatprep.subr.bf16.mxu0 %v11405_v5  ;;  %9865 = vmatpush3.bf16.msra.mxu1 %v9862_v28  ;;  %v140_v28 = vpop.f32.mrb[4].mxu0 }
 0x124   :  { %9867 = vmatprep.subr.bf16.mxu1 %v9866_v44  ;;  %v141_v63 = vadd.f32 %v11596_v46, %v140_v28  ;;  %v7965_v45 = vpop.f32.mrb[5].mxu0 }
 0x125   :  { %8070 = vmatmul.mubr.msk.f32.gmra.mrb[16].mxu0 %vm464_vm4, %v11081_v16  ;;  %vm964_vm4 = vcmp.eq.s32.totalorder %v11332_v19, 2 }
 0x126   :  { %9929 = vmatpush3.bf16.msra.mxu0 %v11405_v5  ;;  %8072 = vmatprep.mubr.msk.f32.mxu0 %vm465_vm5, %v11081_v16  ;;  %vm965_vm5 = vcmp.eq.s32.totalorder %v11334_v22, 2  ;;  %166 = vst [vmem:[%s13725_s9 + $0x10] sm:$0xff] %v141_v63  ;;  %v9874_v63 = vpack.c.bf16 %v6246_v21, %v6245_v7  ;;  %v6247_v7 = vld [vmem:[%s13724_s7 + $0xd0] sm:$0xff]  ;;  %v6248_v21 = vld [vmem:[%s13724_s7 + $0xd8] sm:$0xff] }
 0x127   :  { %9931 = vmatprep.subr.bf16.mxu0 %v11423_v17  ;;  %9869 = vmatpush3.bf16.msra.mxu1 %v9866_v44  ;;  %v145_v44 = vpop.f32.mrb[6].mxu0 }
 0x128   :  { %9871 = vmatprep.subr.bf16.mxu1 %v9870_v32  ;;  %v146_v28 = vadd.f32 %v11596_v46, %v145_v44  ;;  %v7968_v45 = vpop.f32.mrb[7].mxu0 }
 0x129   :  { %8073 = vmatmul.mubr.msk.f32.gmra.mrb[18].mxu0 %vm466_vm6, %v11081_v16  ;;  %vm966_vm6 = vcmp.eq.s32.totalorder %v11336_v23, 2 }
 0x12a   :  { %9933 = vmatpush3.bf16.msra.mxu0 %v11423_v17  ;;  %8075 = vmatprep.mubr.msk.f32.mxu0 %vm467_vm7, %v11081_v16  ;;  %vm967_vm7 = vcmp.eq.s32.totalorder %v11338_v26, 2  ;;  %167 = vst [vmem:[%s13725_s9 + $0x18] sm:$0xff] %v146_v28  ;;  %v9878_v28 = vpack.c.bf16 %v6248_v21, %v6247_v7  ;;  %v6249_v7 = vld [vmem:[%s13724_s7 + $0xe0] sm:$0xff]  ;;  %v6250_v21 = vld [vmem:[%s13724_s7 + $0xe8] sm:$0xff] }
 0x12b   :  { %9935 = vmatprep.subr.bf16.mxu0 %v11441_v36  ;;  %9873 = vmatpush3.bf16.msra.mxu1 %v9870_v32  ;;  %v150_v32 = vpop.f32.mrb[8].mxu0 }
 0x12c   :  { %9875 = vmatprep.subr.bf16.mxu1 %v9874_v63  ;;  %v151_v44 = vadd.f32 %v11596_v46, %v150_v32  ;;  %v7971_v45 = vpop.f32.mrb[9].mxu0 }
 0x12d   :  { %8076 = vmatmul.mubr.msk.f32.gmra.mrb[20].mxu0 %vm468_vm8, %v11081_v16  ;;  %vm968_vm8 = vcmp.eq.s32.totalorder %v11340_v27, 2 }
 0x12e   :  { %9937 = vmatpush3.bf16.msra.mxu0 %v11441_v36  ;;  %8078 = vmatprep.mubr.msk.f32.mxu0 %vm469_vm9, %v11081_v16  ;;  %vm969_vm9 = vcmp.eq.s32.totalorder %v11342_v30, 2  ;;  %168 = vst [vmem:[%s13725_s9 + $0x20] sm:$0xff] %v151_v44  ;;  %v9882_v44 = vpack.c.bf16 %v6250_v21, %v6249_v7  ;;  %v6251_v7 = vld [vmem:[%s13724_s7 + $0xf0] sm:$0xff]  ;;  %v6252_v21 = vld [vmem:[%s13724_s7 + $0xf8] sm:$0xff] }
 0x12f   :  { %9939 = vmatprep.subr.bf16.mxu0 %v11459_v54  ;;  %9877 = vmatpush3.bf16.msra.mxu1 %v9874_v63  ;;  %v155_v63 = vpop.f32.mrb[10].mxu0 }
 0x130   :  { %9879 = vmatprep.subr.bf16.mxu1 %v9878_v28  ;;  %v156_v32 = vadd.f32 %v11596_v46, %v155_v63  ;;  %v7974_v45 = vpop.f32.mrb[11].mxu0 }
 0x131   :  { %8079 = vmatmul.mubr.msk.f32.gmra.mrb[22].mxu0 %vm470_vm10, %v11081_v16  ;;  %vm970_vm10 = vcmp.eq.s32.totalorder %v11344_v31, 2 }
 0x132   :  { %9941 = vmatpush3.bf16.msra.mxu0 %v11459_v54  ;;  %8081 = vmatprep.mubr.msk.f32.mxu0 %vm471_vm11, %v11081_v16  ;;  %vm971_vm11 = vcmp.eq.s32.totalorder %v11346_v34, 2  ;;  %169 = vst [vmem:[%s13725_s9 + $0x28] sm:$0xff] %v156_v32  ;;  %v9886_v32 = vpack.c.bf16 %v6252_v21, %v6251_v7 }
 0x133   :  { %9943 = vmatprep.subr.bf16.mxu0 %v11477_v10  ;;  %9881 = vmatpush3.bf16.msra.mxu1 %v9878_v28  ;;  %v160_v28 = vpop.f32.mrb[12].mxu0 }
 0x134   :  { %9883 = vmatprep.subr.bf16.mxu1 %v9882_v44  ;;  %v161_v63 = vadd.f32 %v11596_v46, %v160_v28  ;;  %v7977_v45 = vpop.f32.mrb[13].mxu0  ;;  %v445_v46 = vld [vmem:[%s13724_s7] sm:$0xff] }
 0x135   :  { %8082 = vmatmul.mubr.msk.f32.gmra.mrb[24].mxu0 %vm472_vm12, %v11081_v16  ;;  %vm972_vm12 = vcmp.eq.s32.totalorder %v11348_v35, 2 }
 0x136   :  { %9945 = vmatpush3.bf16.msra.mxu0 %v11477_v10  ;;  %8084 = vmatprep.mubr.msk.f32.mxu0 %vm473_vm13, %v11081_v16  ;;  %vm973_vm13 = vcmp.eq.s32.totalorder %v11350_v38, 2  ;;  %170 = vst [vmem:[%s13725_s9 + $0x30] sm:$0xff] %v161_v63  ;;  %v448_v63 = vld [vmem:[%s13724_s7 + $0x18] sm:$0xff] }
 0x137   :  { %9947 = vmatprep.subr.bf16.mxu0 %v11495_v49  ;;  %9885 = vmatpush3.bf16.msra.mxu1 %v9882_v44  ;;  %v446_v44 = vld [vmem:[%s13724_s7 + $0x8] sm:$0xff] }
 0x138   :  { %9887 = vmatprep.subr.bf16.mxu1 %v9886_v32  ;;  %v11729_v28 = vpack.c.bf16 %v446_v44, %v445_v46  ;;  %v450_v46 = vld [vmem:[%s13724_s7 + $0x28] sm:$0xff] }
 0x139   :  { %8085 = vmatmul.mubr.msk.f32.gmra.mrb[26].mxu0 %vm474_vm14, %v11081_v16  ;;  %vm974_vm14 = vcmp.eq.s32.totalorder %v11352_v39, 2 }
 0x13a   :  { %9949 = vmatpush3.bf16.msra.mxu0 %v11495_v49  ;;  %8087 = vmatprep.mubr.msk.f32.mxu0 %vm475_vm15, %v11081_v16  ;;  %vm975_vm15 = vcmp.eq.s32.totalorder %v11354_v42, 2 }
 0x13b   :  { %9951 = vmatprep.subr.bf16.mxu0 %v11508_v0  ;;  %9889 = vmatpush3.bf16.msra.mxu1 %v9886_v32  ;;  %v449_v32 = vld [vmem:[%s13724_s7 + $0x20] sm:$0xff] }
 0x13c   :  { %9891 = vmatprep.subr.bf16.mxu1 %v11729_v28 }
 0x13d   :  { %8088 = vmatmul.mubr.msk.f32.gmra.mrb[28].mxu0 %vm476_vm0, %v11081_v16  ;;  %vm976_vm0 = vcmp.eq.s32.totalorder %v11356_v43, 2 }
 0x13e   :  { %9953 = vmatpush3.bf16.msra.mxu0 %v11508_v0  ;;  %8234 = vmatprep.mubr.msk.f32.mxu0 %vm961_vm1, %v11081_v16  ;;  %vm1332_vm1 = vcmp.eq.s32.totalorder %v11324_v13, 3 }
 0x13f   :  { %9987 = vmatprep.subr.bf16.mxu0 %v11387_v59 }
 0x141   :  { %8235 = vmatmul.mubr.msk.f32.vlgmr.msra.gmra.mrb[30].mxu0 %vm962_vm2, %v11081_v16  ;;  %vm1333_vm2 = vcmp.eq.s32.totalorder %v11326_v14, 3 }
 0x142   :  { %9989 = vmatpush3.bf16.msra.mxu0 %v11387_v59  ;;  %8237 = vmatprep.mubr.msk.f32.mxu0 %vm963_vm3, %v11081_v16  ;;  %vm1334_vm3 = vcmp.eq.s32.totalorder %v11330_v18, 3 }
 0x143   :  { %9991 = vmatprep.subr.bf16.mxu0 %v11405_v5 }
 0x145   :  { %8238 = vmatmul.mubr.msk.f32.gmra.mrb[32].mxu0 %vm964_vm4, %v11081_v16  ;;  %vm1335_vm4 = vcmp.eq.s32.totalorder %v11332_v19, 3 }
 0x146   :  { %9993 = vmatpush3.bf16.msra.mxu0 %v11405_v5  ;;  %8240 = vmatprep.mubr.msk.f32.mxu0 %vm965_vm5, %v11081_v16  ;;  %vm1336_vm5 = vcmp.eq.s32.totalorder %v11334_v22, 3 }
 0x147   :  { %9995 = vmatprep.subr.bf16.mxu0 %v11423_v17 }
 0x149   :  { %8241 = vmatmul.mubr.msk.f32.gmra.mrb[34].mxu0 %vm966_vm6, %v11081_v16  ;;  %vm1337_vm6 = vcmp.eq.s32.totalorder %v11336_v23, 3 }
 0x14a   :  { %9997 = vmatpush3.bf16.msra.mxu0 %v11423_v17  ;;  %8243 = vmatprep.mubr.msk.f32.mxu0 %vm967_vm7, %v11081_v16  ;;  %vm1338_vm7 = vcmp.eq.s32.totalorder %v11338_v26, 3 }
 0x14b   :  { %9999 = vmatprep.subr.bf16.mxu0 %v11441_v36 }
 0x14d   :  { %8244 = vmatmul.mubr.msk.f32.gmra.mrb[36].mxu0 %vm968_vm8, %v11081_v16  ;;  %vm1339_vm8 = vcmp.eq.s32.totalorder %v11340_v27, 3 }
 0x14e   :  { %10001 = vmatpush3.bf16.msra.mxu0 %v11441_v36  ;;  %8246 = vmatprep.mubr.msk.f32.mxu0 %vm969_vm9, %v11081_v16  ;;  %vm1340_vm9 = vcmp.eq.s32.totalorder %v11342_v30, 3 }
 0x14f   :  { %10003 = vmatprep.subr.bf16.mxu0 %v11459_v54 }
 0x151   :  { %8247 = vmatmul.mubr.msk.f32.gmra.mrb[38].mxu0 %vm970_vm10, %v11081_v16  ;;  %vm1341_vm10 = vcmp.eq.s32.totalorder %v11344_v31, 3 }
 0x152   :  { %10005 = vmatpush3.bf16.msra.mxu0 %v11459_v54  ;;  %8249 = vmatprep.mubr.msk.f32.mxu0 %vm971_vm11, %v11081_v16  ;;  %vm1342_vm11 = vcmp.eq.s32.totalorder %v11346_v34, 3 }
 0x153   :  { %10007 = vmatprep.subr.bf16.mxu0 %v11477_v10 }
 0x155   :  { %8250 = vmatmul.mubr.msk.f32.gmra.mrb[40].mxu0 %vm972_vm12, %v11081_v16  ;;  %vm1343_vm12 = vcmp.eq.s32.totalorder %v11348_v35, 3 }
 0x156   :  { %10009 = vmatpush3.bf16.msra.mxu0 %v11477_v10  ;;  %8252 = vmatprep.mubr.msk.f32.mxu0 %vm973_vm13, %v11081_v16  ;;  %vm1344_vm13 = vcmp.eq.s32.totalorder %v11350_v38, 3 }
 0x157   :  { %10011 = vmatprep.subr.bf16.mxu0 %v11495_v49 }
 0x159   :  { %8253 = vmatmul.mubr.msk.f32.gmra.mrb[42].mxu0 %vm974_vm14, %v11081_v16  ;;  %vm1345_vm14 = vcmp.eq.s32.totalorder %v11352_v39, 3 }
 0x15a   :  { %10013 = vmatpush3.bf16.msra.mxu0 %v11495_v49  ;;  %8255 = vmatprep.mubr.msk.f32.mxu0 %vm975_vm15, %v11081_v16  ;;  %vm1346_vm15 = vcmp.eq.s32.totalorder %v11354_v42, 3 }
 0x15b   :  { %10015 = vmatprep.subr.bf16.mxu0 %v11508_v0 }
 0x15d   :  { %8256 = vmatmul.mubr.msk.f32.gmra.mrb[44].mxu0 %vm976_vm0, %v11081_v16  ;;  %vm1347_vm0 = vcmp.eq.s32.totalorder %v11356_v43, 3  ;;  %v447_v43 = vld [vmem:[%s13724_s7 + $0x10] sm:$0xff] }
 0x15e   :  { %10017 = vmatpush3.bf16.msra.mxu0 %v11508_v0  ;;  %8346 = vmatprep.mubr.msk.f32.mxu0 %vm1332_vm1, %v11081_v16  ;;  %vm1703_vm1 = vcmp.eq.s32.totalorder %v11324_v13, 8  ;;  %v9894_v21 = vpack.c.bf16 %v448_v63, %v447_v43  ;;  %v9898_v63 = vpack.c.bf16 %v450_v46, %v449_v32  ;;  %v453_v46 = vld [vmem:[%s13724_s7 + $0x40] sm:$0xff] }
 0x15f   :  { %10051 = vmatprep.subr.bf16.mxu0 %v11387_v59 }
 0x161   :  { %8347 = vmatmul.mubr.msk.f32.vlgmr.msra.gmra.mrb[46].mxu0 %vm1333_vm2, %v11081_v16  ;;  %vm1704_vm2 = vcmp.eq.s32.totalorder %v11326_v14, 8 }
 0x162   :  { %10053 = vmatpush3.bf16.msra.mxu0 %v11387_v59  ;;  %8349 = vmatprep.mubr.msk.f32.mxu0 %vm1334_vm3, %v11081_v16  ;;  %vm1705_vm3 = vcmp.eq.s32.totalorder %v11330_v18, 8 }
 0x163   :  { %10055 = vmatprep.subr.bf16.mxu0 %v11405_v5 }
 0x165   :  { %8350 = vmatmul.mubr.msk.f32.gmra.mrb[48].mxu0 %vm1335_vm4, %v11081_v16  ;;  %vm1706_vm4 = vcmp.eq.s32.totalorder %v11332_v19, 8 }
 0x166   :  { %10057 = vmatpush3.bf16.msra.mxu0 %v11405_v5  ;;  %8352 = vmatprep.mubr.msk.f32.mxu0 %vm1336_vm5, %v11081_v16  ;;  %vm1707_vm5 = vcmp.eq.s32.totalorder %v11334_v22, 8 }
 0x167   :  { %10059 = vmatprep.subr.bf16.mxu0 %v11423_v17 }
 0x169   :  { %8353 = vmatmul.mubr.msk.f32.gmra.mrb[50].mxu0 %vm1337_vm6, %v11081_v16  ;;  %vm1708_vm6 = vcmp.eq.s32.totalorder %v11336_v23, 8 }
 0x16a   :  { %10061 = vmatpush3.bf16.msra.mxu0 %v11423_v17  ;;  %8355 = vmatprep.mubr.msk.f32.mxu0 %vm1338_vm7, %v11081_v16  ;;  %vm1709_vm7 = vcmp.eq.s32.totalorder %v11338_v26, 8 }
 0x16b   :  { %10063 = vmatprep.subr.bf16.mxu0 %v11441_v36 }
 0x16d   :  { %8356 = vmatmul.mubr.msk.f32.gmra.mrb[52].mxu0 %vm1339_vm8, %v11081_v16  ;;  %vm1710_vm8 = vcmp.eq.s32.totalorder %v11340_v27, 8 }
 0x16e   :  { %10065 = vmatpush3.bf16.msra.mxu0 %v11441_v36  ;;  %8358 = vmatprep.mubr.msk.f32.mxu0 %vm1340_vm9, %v11081_v16  ;;  %vm1711_vm9 = vcmp.eq.s32.totalorder %v11342_v30, 8 }
 0x16f   :  { %10067 = vmatprep.subr.bf16.mxu0 %v11459_v54 }
 0x171   :  { %8359 = vmatmul.mubr.msk.f32.gmra.mrb[54].mxu0 %vm1341_vm10, %v11081_v16  ;;  %vm1712_vm10 = vcmp.eq.s32.totalorder %v11344_v31, 8 }
 0x172   :  { %10069 = vmatpush3.bf16.msra.mxu0 %v11459_v54  ;;  %8361 = vmatprep.mubr.msk.f32.mxu0 %vm1342_vm11, %v11081_v16  ;;  %vm1713_vm11 = vcmp.eq.s32.totalorder %v11346_v34, 8 }
 0x173   :  { %10071 = vmatprep.subr.bf16.mxu0 %v11477_v10 }
 0x175   :  { %8362 = vmatmul.mubr.msk.f32.gmra.mrb[56].mxu0 %vm1343_vm12, %v11081_v16  ;;  %vm1714_vm12 = vcmp.eq.s32.totalorder %v11348_v35, 8 }
 0x176   :  { %10073 = vmatpush3.bf16.msra.mxu0 %v11477_v10  ;;  %8364 = vmatprep.mubr.msk.f32.mxu0 %vm1344_vm13, %v11081_v16  ;;  %vm1715_vm13 = vcmp.eq.s32.totalorder %v11350_v38, 8 }
 0x177   :  { %10075 = vmatprep.subr.bf16.mxu0 %v11495_v49 }
 0x179   :  { %8365 = vmatmul.mubr.msk.f32.gmra.mrb[58].mxu0 %vm1345_vm14, %v11081_v16  ;;  %vm1716_vm14 = vcmp.eq.s32.totalorder %v11352_v39, 8 }
 0x17a   :  { %10077 = vmatpush3.bf16.msra.mxu0 %v11495_v49  ;;  %8367 = vmatprep.mubr.msk.f32.mxu0 %vm1346_vm15, %v11081_v16  ;;  %vm1717_vm15 = vcmp.eq.s32.totalorder %v11354_v42, 8 }
 0x17b   :  { %10079 = vmatprep.subr.bf16.mxu0 %v11508_v0 }
 0x17d   :  { %8368 = vmatmul.mubr.msk.f32.gmra.mrb[60].mxu0 %vm1347_vm0, %v11081_v16  ;;  %vm2074_vm0 = vcmp.eq.s32.totalorder %v11324_v13, 9 }
 0x17e   :  { %10081 = vmatpush3.bf16.msra.mxu0 %v11508_v0  ;;  %8458 = vmatprep.mubr.msk.f32.mxu0 %vm1703_vm1, %v11081_v16  ;;  %vm2075_vm1 = vcmp.eq.s32.totalorder %v11326_v14, 9 }
 0x17f   :  { %10115 = vmatprep.subr.bf16.mxu0 %v11387_v59 }
 0x181   :  { %8459 = vmatmul.mubr.msk.f32.vlgmr.msra.gmra.mrb[62].mxu0 %vm1704_vm2, %v11081_v16  ;;  %vm2076_vm2 = vcmp.eq.s32.totalorder %v11330_v18, 9 }
 0x182   :  { %10117 = vmatpush3.bf16.msra.mxu0 %v11387_v59  ;;  %8461 = vmatprep.mubr.msk.f32.mxu0 %vm1705_vm3, %v11081_v16  ;;  %vm2077_vm3 = vcmp.eq.s32.totalorder %v11332_v19, 9 }
 0x183   :  { %10119 = vmatprep.subr.bf16.mxu0 %v11405_v5 }
 0x185   :  { %8462 = vmatmul.mubr.msk.f32.gmra.mrb[64].mxu0 %vm1706_vm4, %v11081_v16  ;;  %vm2078_vm4 = vcmp.eq.s32.totalorder %v11334_v22, 9 }
 0x186   :  { %10121 = vmatpush3.bf16.msra.mxu0 %v11405_v5  ;;  %8464 = vmatprep.mubr.msk.f32.mxu0 %vm1707_vm5, %v11081_v16  ;;  %vm2079_vm5 = vcmp.eq.s32.totalorder %v11336_v23, 9 }
 0x187   :  { %10123 = vmatprep.subr.bf16.mxu0 %v11423_v17 }
 0x189   :  { %8465 = vmatmul.mubr.msk.f32.gmra.mrb[66].mxu0 %vm1708_vm6, %v11081_v16  ;;  %vm2080_vm6 = vcmp.eq.s32.totalorder %v11338_v26, 9 }
 0x18a   :  { %10125 = vmatpush3.bf16.msra.mxu0 %v11423_v17  ;;  %8467 = vmatprep.mubr.msk.f32.mxu0 %vm1709_vm7, %v11081_v16  ;;  %vm2081_vm7 = vcmp.eq.s32.totalorder %v11340_v27, 9 }
 0x18b   :  { %10127 = vmatprep.subr.bf16.mxu0 %v11441_v36 }
 0x18d   :  { %8468 = vmatmul.mubr.msk.f32.gmra.mrb[68].mxu0 %vm1710_vm8, %v11081_v16  ;;  %vm2082_vm8 = vcmp.eq.s32.totalorder %v11342_v30, 9 }
 0x18e   :  { %10129 = vmatpush3.bf16.msra.mxu0 %v11441_v36  ;;  %8470 = vmatprep.mubr.msk.f32.mxu0 %vm1711_vm9, %v11081_v16  ;;  %vm2083_vm9 = vcmp.eq.s32.totalorder %v11344_v31, 9 }
 0x18f   :  { %10131 = vmatprep.subr.bf16.mxu0 %v11459_v54 }
 0x191   :  { %8471 = vmatmul.mubr.msk.f32.gmra.mrb[70].mxu0 %vm1712_vm10, %v11081_v16  ;;  %vm2084_vm10 = vcmp.eq.s32.totalorder %v11346_v34, 9 }
 0x192   :  { %10133 = vmatpush3.bf16.msra.mxu0 %v11459_v54  ;;  %8473 = vmatprep.mubr.msk.f32.mxu0 %vm1713_vm11, %v11081_v16  ;;  %vm2085_vm11 = vcmp.eq.s32.totalorder %v11348_v35, 9 }
 0x193   :  { %10135 = vmatprep.subr.bf16.mxu0 %v11477_v10 }
 0x195   :  { %8474 = vmatmul.mubr.msk.f32.gmra.mrb[72].mxu0 %vm1714_vm12, %v11081_v16  ;;  %vm2086_vm12 = vcmp.eq.s32.totalorder %v11350_v38, 9 }
 0x196   :  { %10137 = vmatpush3.bf16.msra.mxu0 %v11477_v10  ;;  %8476 = vmatprep.mubr.msk.f32.mxu0 %vm1715_vm13, %v11081_v16  ;;  %vm2087_vm13 = vcmp.eq.s32.totalorder %v11352_v39, 9 }
 0x197   :  { %10139 = vmatprep.subr.bf16.mxu0 %v11495_v49 }
 0x199   :  { %8477 = vmatmul.mubr.msk.f32.gmra.mrb[74].mxu0 %vm1716_vm14, %v11081_v16  ;;  %vm2088_vm14 = vcmp.eq.s32.totalorder %v11354_v42, 9 }
 0x19a   :  { %10141 = vmatpush3.bf16.msra.mxu0 %v11495_v49  ;;  %8479 = vmatprep.mubr.msk.f32.mxu0 %vm1717_vm15, %v11081_v16  ;;  %vm2445_vm15 = vcmp.eq.s32.totalorder %v11324_v13, 10 }
 0x19b   :  { %10143 = vmatprep.subr.bf16.mxu0 %v11508_v0 }
 0x19d   :  { %8480 = vmatmul.mubr.f32.gmra.mrb[76].mxu0 %v11080_v1 }
 0x19e   :  { %10145 = vmatpush3.bf16.msra.mxu0 %v11508_v0  ;;  %8570 = vmatprep.mubr.msk.f32.mxu0 %vm2074_vm0, %v11081_v16  ;;  %vm2446_vm0 = vcmp.eq.s32.totalorder %v11326_v14, 10 }
 0x19f   :  { %10179 = vmatprep.subr.bf16.mxu0 %v11387_v59 }
 0x1a1   :  { %8571 = vmatmul.mubr.msk.f32.vlgmr.msra.gmra.mrb[78].mxu0 %vm2075_vm1, %v11081_v16  ;;  %vm2447_vm1 = vcmp.eq.s32.totalorder %v11330_v18, 10 }
 0x1a2   :  { %10181 = vmatpush3.bf16.msra.mxu0 %v11387_v59  ;;  %8573 = vmatprep.mubr.msk.f32.mxu0 %vm2076_vm2, %v11081_v16  ;;  %vm2448_vm2 = vcmp.eq.s32.totalorder %v11332_v19, 10 }
 0x1a3   :  { %10183 = vmatprep.subr.bf16.mxu0 %v11405_v5 }
 0x1a5   :  { %8574 = vmatmul.mubr.msk.f32.gmra.mrb[80].mxu0 %vm2077_vm3, %v11081_v16  ;;  %vm2449_vm3 = vcmp.eq.s32.totalorder %v11334_v22, 10 }
 0x1a6   :  { %10185 = vmatpush3.bf16.msra.mxu0 %v11405_v5  ;;  %8576 = vmatprep.mubr.msk.f32.mxu0 %vm2078_vm4, %v11081_v16  ;;  %vm2450_vm4 = vcmp.eq.s32.totalorder %v11336_v23, 10 }
 0x1a7   :  { %10187 = vmatprep.subr.bf16.mxu0 %v11423_v17 }
 0x1a9   :  { %8577 = vmatmul.mubr.msk.f32.gmra.mrb[82].mxu0 %vm2079_vm5, %v11081_v16  ;;  %vm2451_vm5 = vcmp.eq.s32.totalorder %v11338_v26, 10 }
 0x1aa   :  { %10189 = vmatpush3.bf16.msra.mxu0 %v11423_v17  ;;  %8579 = vmatprep.mubr.msk.f32.mxu0 %vm2080_vm6, %v11081_v16  ;;  %vm2452_vm6 = vcmp.eq.s32.totalorder %v11340_v27, 10 }
 0x1ab   :  { %10191 = vmatprep.subr.bf16.mxu0 %v11441_v36 }
 0x1ad   :  { %8580 = vmatmul.mubr.msk.f32.gmra.mrb[84].mxu0 %vm2081_vm7, %v11081_v16  ;;  %vm2453_vm7 = vcmp.eq.s32.totalorder %v11342_v30, 10 }
 0x1ae   :  { %10193 = vmatpush3.bf16.msra.mxu0 %v11441_v36  ;;  %8582 = vmatprep.mubr.msk.f32.mxu0 %vm2082_vm8, %v11081_v16  ;;  %vm2454_vm8 = vcmp.eq.s32.totalorder %v11344_v31, 10 }
 0x1af   :  { %10195 = vmatprep.subr.bf16.mxu0 %v11459_v54 }
 0x1b1   :  { %8583 = vmatmul.mubr.msk.f32.gmra.mrb[86].mxu0 %vm2083_vm9, %v11081_v16  ;;  %vm2455_vm9 = vcmp.eq.s32.totalorder %v11346_v34, 10 }
 0x1b2   :  { %10197 = vmatpush3.bf16.msra.mxu0 %v11459_v54  ;;  %8585 = vmatprep.mubr.msk.f32.mxu0 %vm2084_vm10, %v11081_v16  ;;  %vm2456_vm10 = vcmp.eq.s32.totalorder %v11348_v35, 10 }
 0x1b3   :  { %10199 = vmatprep.subr.bf16.mxu0 %v11477_v10 }
 0x1b5   :  { %8586 = vmatmul.mubr.msk.f32.gmra.mrb[88].mxu0 %vm2085_vm11, %v11081_v16  ;;  %vm2457_vm11 = vcmp.eq.s32.totalorder %v11350_v38, 10 }
 0x1b6   :  { %10201 = vmatpush3.bf16.msra.mxu0 %v11477_v10  ;;  %8588 = vmatprep.mubr.msk.f32.mxu0 %vm2086_vm12, %v11081_v16  ;;  %vm2458_vm12 = vcmp.eq.s32.totalorder %v11352_v39, 10 }
 0x1b7   :  { %10203 = vmatprep.subr.bf16.mxu0 %v11495_v49 }
 0x1b9   :  { %8589 = vmatmul.mubr.msk.f32.gmra.mrb[90].mxu0 %vm2087_vm13, %v11081_v16  ;;  %vm2459_vm13 = vcmp.eq.s32.totalorder %v11354_v42, 10 }
 0x1ba   :  { %10205 = vmatpush3.bf16.msra.mxu0 %v11495_v49  ;;  %8591 = vmatprep.mubr.msk.f32.mxu0 %vm2088_vm14, %v11081_v16  ;;  %vm2816_vm14 = vcmp.eq.s32.totalorder %v11324_v13, 11 }
 0x1bb   :  { %10207 = vmatprep.subr.bf16.mxu0 %v11508_v0 }
 0x1bd   :  { %8592 = vmatmul.mubr.f32.gmra.mrb[92].mxu0 %v11080_v1 }
 0x1be   :  { %10209 = vmatpush3.bf16.msra.mxu0 %v11508_v0  ;;  %8682 = vmatprep.mubr.msk.f32.mxu0 %vm2445_vm15, %v11081_v16  ;;  %vm2817_vm15 = vcmp.eq.s32.totalorder %v11326_v14, 11 }
 0x1bf   :  { %10243 = vmatprep.subr.bf16.mxu0 %v11387_v59 }
 0x1c1   :  { %8683 = vmatmul.mubr.msk.f32.vlgmr.msra.gmra.mrb[94].mxu0 %vm2446_vm0, %v11081_v16  ;;  %vm2818_vm0 = vcmp.eq.s32.totalorder %v11330_v18, 11 }
 0x1c2   :  { %10245 = vmatpush3.bf16.msra.mxu0 %v11387_v59  ;;  %8685 = vmatprep.mubr.msk.f32.mxu0 %vm2447_vm1, %v11081_v16  ;;  %vm2819_vm1 = vcmp.eq.s32.totalorder %v11332_v19, 11 }
 0x1c3   :  { %10247 = vmatprep.subr.bf16.mxu0 %v11405_v5 }
 0x1c5   :  { %8686 = vmatmul.mubr.msk.f32.gmra.mrb[96].mxu0 %vm2448_vm2, %v11081_v16  ;;  %vm2820_vm2 = vcmp.eq.s32.totalorder %v11334_v22, 11 }
 0x1c6   :  { %10249 = vmatpush3.bf16.msra.mxu0 %v11405_v5  ;;  %8688 = vmatprep.mubr.msk.f32.mxu0 %vm2449_vm3, %v11081_v16  ;;  %vm2821_vm3 = vcmp.eq.s32.totalorder %v11336_v23, 11 }
 0x1c7   :  { %10251 = vmatprep.subr.bf16.mxu0 %v11423_v17 }
 0x1c9   :  { %8689 = vmatmul.mubr.msk.f32.gmra.mrb[98].mxu0 %vm2450_vm4, %v11081_v16  ;;  %vm2822_vm4 = vcmp.eq.s32.totalorder %v11338_v26, 11 }
 0x1ca   :  { %10253 = vmatpush3.bf16.msra.mxu0 %v11423_v17  ;;  %8691 = vmatprep.mubr.msk.f32.mxu0 %vm2451_vm5, %v11081_v16  ;;  %vm2823_vm5 = vcmp.eq.s32.totalorder %v11340_v27, 11 }
 0x1cb   :  { %10255 = vmatprep.subr.bf16.mxu0 %v11441_v36 }
 0x1cd   :  { %8692 = vmatmul.mubr.msk.f32.gmra.mrb[100].mxu0 %vm2452_vm6, %v11081_v16  ;;  %vm2824_vm6 = vcmp.eq.s32.totalorder %v11342_v30, 11 }
 0x1ce   :  { %10257 = vmatpush3.bf16.msra.mxu0 %v11441_v36  ;;  %8694 = vmatprep.mubr.msk.f32.mxu0 %vm2453_vm7, %v11081_v16  ;;  %vm2825_vm7 = vcmp.eq.s32.totalorder %v11344_v31, 11 }
 0x1cf   :  { %10259 = vmatprep.subr.bf16.mxu0 %v11459_v54 }
 0x1d1   :  { %8695 = vmatmul.mubr.msk.f32.gmra.mrb[102].mxu0 %vm2454_vm8, %v11081_v16  ;;  %vm2826_vm8 = vcmp.eq.s32.totalorder %v11346_v34, 11 }
 0x1d2   :  { %10261 = vmatpush3.bf16.msra.mxu0 %v11459_v54  ;;  %8697 = vmatprep.mubr.msk.f32.mxu0 %vm2455_vm9, %v11081_v16  ;;  %vm2827_vm9 = vcmp.eq.s32.totalorder %v11348_v35, 11 }
 0x1d3   :  { %10263 = vmatprep.subr.bf16.mxu0 %v11477_v10 }
 0x1d5   :  { %8698 = vmatmul.mubr.msk.f32.gmra.mrb[104].mxu0 %vm2456_vm10, %v11081_v16  ;;  %vm2828_vm10 = vcmp.eq.s32.totalorder %v11350_v38, 11 }
 0x1d6   :  { %10265 = vmatpush3.bf16.msra.mxu0 %v11477_v10  ;;  %8700 = vmatprep.mubr.msk.f32.mxu0 %vm2457_vm11, %v11081_v16  ;;  %vm2829_vm11 = vcmp.eq.s32.totalorder %v11352_v39, 11 }
 0x1d7   :  { %10267 = vmatprep.subr.bf16.mxu0 %v11495_v49 }
 0x1d9   :  { %8701 = vmatmul.mubr.msk.f32.gmra.mrb[106].mxu0 %vm2458_vm12, %v11081_v16  ;;  %vm2830_vm12 = vcmp.eq.s32.totalorder %v11354_v42, 11 }
 0x1da   :  { %10269 = vmatpush3.bf16.msra.mxu0 %v11495_v49  ;;  %8703 = vmatprep.mubr.msk.f32.mxu0 %vm2459_vm13, %v11081_v16  ;;  %vm3187_vm13 = vcmp.eq.s32.totalorder %v11324_v13, 16 }
 0x1db   :  { %10271 = vmatprep.subr.bf16.mxu0 %v11508_v0 }
 0x1dd   :  { %8704 = vmatmul.mubr.f32.gmra.mrb[108].mxu0 %v11080_v1 }
 0x1de   :  { %10273 = vmatpush3.bf16.msra.mxu0 %v11508_v0  ;;  %8794 = vmatprep.mubr.msk.f32.mxu0 %vm2816_vm14, %v11081_v16  ;;  %vm3188_vm14 = vcmp.eq.s32.totalorder %v11326_v14, 16 }
 0x1df   :  { %10307 = vmatprep.subr.bf16.mxu0 %v11387_v59 }
 0x1e1   :  { %8795 = vmatmul.mubr.msk.f32.vlgmr.msra.gmra.mrb[110].mxu0 %vm2817_vm15, %v11081_v16  ;;  %vm3189_vm15 = vcmp.eq.s32.totalorder %v11330_v18, 16 }
 0x1e2   :  { %10309 = vmatpush3.bf16.msra.mxu0 %v11387_v59  ;;  %8797 = vmatprep.mubr.msk.f32.mxu0 %vm2818_vm0, %v11081_v16  ;;  %vm3190_vm0 = vcmp.eq.s32.totalorder %v11332_v19, 16 }
 0x1e3   :  { %10311 = vmatprep.subr.bf16.mxu0 %v11405_v5 }
 0x1e5   :  { %8798 = vmatmul.mubr.msk.f32.gmra.mrb[112].mxu0 %vm2819_vm1, %v11081_v16  ;;  %vm3191_vm1 = vcmp.eq.s32.totalorder %v11334_v22, 16 }
 0x1e6   :  { %10313 = vmatpush3.bf16.msra.mxu0 %v11405_v5  ;;  %8800 = vmatprep.mubr.msk.f32.mxu0 %vm2820_vm2, %v11081_v16  ;;  %vm3192_vm2 = vcmp.eq.s32.totalorder %v11336_v23, 16 }
 0x1e7   :  { %10315 = vmatprep.subr.bf16.mxu0 %v11423_v17 }
 0x1e9   :  { %8801 = vmatmul.mubr.msk.f32.gmra.mrb[114].mxu0 %vm2821_vm3, %v11081_v16  ;;  %vm3193_vm3 = vcmp.eq.s32.totalorder %v11338_v26, 16 }
 0x1ea   :  { %10317 = vmatpush3.bf16.msra.mxu0 %v11423_v17  ;;  %8803 = vmatprep.mubr.msk.f32.mxu0 %vm2822_vm4, %v11081_v16  ;;  %vm3194_vm4 = vcmp.eq.s32.totalorder %v11340_v27, 16 }
 0x1eb   :  { %10319 = vmatprep.subr.bf16.mxu0 %v11441_v36 }
 0x1ed   :  { %8804 = vmatmul.mubr.msk.f32.gmra.mrb[116].mxu0 %vm2823_vm5, %v11081_v16  ;;  %vm3195_vm5 = vcmp.eq.s32.totalorder %v11342_v30, 16 }
 0x1ee   :  { %10321 = vmatpush3.bf16.msra.mxu0 %v11441_v36  ;;  %8806 = vmatprep.mubr.msk.f32.mxu0 %vm2824_vm6, %v11081_v16  ;;  %vm3196_vm6 = vcmp.eq.s32.totalorder %v11344_v31, 16 }
 0x1ef   :  { %10323 = vmatprep.subr.bf16.mxu0 %v11459_v54 }
 0x1f1   :  { %8807 = vmatmul.mubr.msk.f32.gmra.mrb[118].mxu0 %vm2825_vm7, %v11081_v16  ;;  %vm3197_vm7 = vcmp.eq.s32.totalorder %v11346_v34, 16 }
 0x1f2   :  { %10325 = vmatpush3.bf16.msra.mxu0 %v11459_v54  ;;  %8809 = vmatprep.mubr.msk.f32.mxu0 %vm2826_vm8, %v11081_v16  ;;  %vm3198_vm8 = vcmp.eq.s32.totalorder %v11348_v35, 16 }
 0x1f3   :  { %10327 = vmatprep.subr.bf16.mxu0 %v11477_v10 }
 0x1f4   :  { %v8068_v45 = vpop.f32.mrb[14].mxu0 }
 0x1f5   :  { %v575_v7 = vpop.f32.mrb[15].mxu0  ;;  %8810 = vmatmul.mubr.msk.f32.gmra.mrb[120].mxu0 %vm2827_vm9, %v11081_v16  ;;  %vm3199_vm9 = vcmp.eq.s32.totalorder %v11350_v38, 16 }
 0x1f6   :  { %8122 = vmatprep.mubr.f32.mxu1 %v575_v7  ;;  %10329 = vmatpush3.bf16.msra.mxu0 %v11477_v10 }
 0x1f7   :  { %8123 = vmatmul.mubr.f32.vlgmr.msra.gmra.mrb[16].mxu1 %v8068_v45  ;;  %10331 = vmatprep.subr.bf16.mxu0 %v11495_v49  ;;  %v451_v45 = vld [vmem:[%s13724_s7 + $0x30] sm:$0xff] }
 0x1f8   :  { %9893 = vmatpush3.bf16.msra.mxu1 %v11729_v28  ;;  %v8071_v44 = vpop.f32.mrb[16].mxu0  ;;  %8812 = vmatprep.mubr.msk.f32.mxu0 %vm2828_vm10, %v11081_v16  ;;  %v452_v28 = vld [vmem:[%s13724_s7 + $0x38] sm:$0xff]  ;;  %vm3200_vm10 = vcmp.eq.s32.totalorder %v11352_v39, 16 }
 0x1f9   :  { %v585_v43 = vpop.f32.mrb[17].mxu0  ;;  %8813 = vmatmul.mubr.msk.f32.gmra.mrb[122].mxu0 %vm2829_vm11, %v11081_v16  ;;  %9895 = vmatprep.subr.bf16.mxu1 %v9894_v21  ;;  %v9902_v32 = vpack.c.bf16 %v452_v28, %v451_v45  ;;  %v455_v28 = vld [vmem:[%s13724_s7 + $0x50] sm:$0xff]  ;;  %vm3558_vm11 = vcmp.eq.s32.totalorder %v11324_v13, 17 }
 0x1fa   :  { %8125 = vmatprep.mubr.f32.mxu1 %v585_v43  ;;  %10333 = vmatpush3.bf16.msra.mxu0 %v11495_v49 }
 0x1fb   :  { %8126 = vmatmul.mubr.f32.gmra.mrb[18].mxu1 %v8071_v44  ;;  %10335 = vmatprep.subr.bf16.mxu0 %v11508_v0 }
 0x1fc   :  { %9897 = vmatpush3.bf16.msra.mxu1 %v9894_v21  ;;  %v8074_v7 = vpop.f32.mrb[18].mxu0  ;;  %8815 = vmatprep.mubr.msk.f32.mxu0 %vm2830_vm12, %v11081_v16  ;;  %v454_v21 = vld [vmem:[%s13724_s7 + $0x48] sm:$0xff]  ;;  %vm3559_vm12 = vcmp.eq.s32.totalorder %v11326_v14, 17 }
 0x1fd   :  { %v595_v42 = vpop.f32.mrb[19].mxu0  ;;  %8816 = vmatmul.mubr.f32.gmra.mrb[124].mxu0 %v11080_v1  ;;  %9899 = vmatprep.subr.bf16.mxu1 %v9898_v63  ;;  %v9906_v45 = vpack.c.bf16 %v454_v21, %v453_v46  ;;  %v457_v21 = vld [vmem:[%s13724_s7 + $0x60] sm:$0xff] }
 0x1fe   :  { %8128 = vmatprep.mubr.f32.mxu1 %v595_v42  ;;  %10337 = vmatpush3.bf16.msra.mxu0 %v11508_v0 }
 0x1ff   :  { %8129 = vmatmul.mubr.f32.gmra.mrb[20].mxu1 %v8074_v7  ;;  %10371 = vmatprep.subr.bf16.mxu0 %v11387_v59 }
 0x200   :  { %9901 = vmatpush3.bf16.msra.mxu1 %v9898_v63  ;;  %v8077_v44 = vpop.f32.mrb[20].mxu0  ;;  %8906 = vmatprep.mubr.msk.f32.mxu0 %vm3187_vm13, %v11081_v16  ;;  %v456_v63 = vld [vmem:[%s13724_s7 + $0x58] sm:$0xff]  ;;  %vm3560_vm13 = vcmp.eq.s32.totalorder %v11330_v18, 17 }
 0x201   :  { %v605_v43 = vpop.f32.mrb[21].mxu0  ;;  %8907 = vmatmul.mubr.msk.f32.vlgmr.msra.gmra.mrb[126].mxu0 %vm3188_vm14, %v11081_v16  ;;  %9903 = vmatprep.subr.bf16.mxu1 %v9902_v32  ;;  %v9910_v46 = vpack.c.bf16 %v456_v63, %v455_v28  ;;  %v459_v63 = vld [vmem:[%s13724_s7 + $0x70] sm:$0xff]  ;;  %vm3561_vm14 = vcmp.eq.s32.totalorder %v11332_v19, 17 }
 0x202   :  { %8131 = vmatprep.mubr.f32.mxu1 %v605_v43  ;;  %10373 = vmatpush3.bf16.msra.mxu0 %v11387_v59 }
 0x203   :  { %8132 = vmatmul.mubr.f32.gmra.mrb[22].mxu1 %v8077_v44  ;;  %10375 = vmatprep.subr.bf16.mxu0 %v11405_v5 }
 0x204   :  { %9905 = vmatpush3.bf16.msra.mxu1 %v9902_v32  ;;  %v8080_v7 = vpop.f32.mrb[22].mxu0  ;;  %8909 = vmatprep.mubr.msk.f32.mxu0 %vm3189_vm15, %v11081_v16  ;;  %v458_v32 = vld [vmem:[%s13724_s7 + $0x68] sm:$0xff]  ;;  %vm3562_vm15 = vcmp.eq.s32.totalorder %v11334_v22, 17 }
 0x205   :  { %v615_v42 = vpop.f32.mrb[23].mxu0  ;;  %8910 = vmatmul.mubr.msk.f32.gmra.mrb[128].mxu0 %vm3190_vm0, %v11081_v16  ;;  %9907 = vmatprep.subr.bf16.mxu1 %v9906_v45  ;;  %v9914_v28 = vpack.c.bf16 %v458_v32, %v457_v21  ;;  %v6285_v32 = vld [vmem:[%s13724_s7 + $0x100] sm:$0xff]  ;;  %vm3563_vm0 = vcmp.eq.s32.totalorder %v11336_v23, 17 }
 0x206   :  { %8134 = vmatprep.mubr.f32.mxu1 %v615_v42  ;;  %10377 = vmatpush3.bf16.msra.mxu0 %v11405_v5 }
 0x207   :  { %8135 = vmatmul.mubr.f32.gmra.mrb[24].mxu1 %v8080_v7  ;;  %10379 = vmatprep.subr.bf16.mxu0 %v11423_v17 }
 0x208   :  { %9909 = vmatpush3.bf16.msra.mxu1 %v9906_v45  ;;  %v8083_v44 = vpop.f32.mrb[24].mxu0  ;;  %8912 = vmatprep.mubr.msk.f32.mxu0 %vm3191_vm1, %v11081_v16  ;;  %v460_v45 = vld [vmem:[%s13724_s7 + $0x78] sm:$0xff]  ;;  %vm3564_vm1 = vcmp.eq.s32.totalorder %v11338_v26, 17 }
 0x209   :  { %v625_v43 = vpop.f32.mrb[25].mxu0  ;;  %8913 = vmatmul.mubr.msk.f32.gmra.mrb[130].mxu0 %vm3192_vm2, %v11081_v16  ;;  %9911 = vmatprep.subr.bf16.mxu1 %v9910_v46  ;;  %v9918_v21 = vpack.c.bf16 %v460_v45, %v459_v63  ;;  %v6288_v45 = vld [vmem:[%s13724_s7 + $0x118] sm:$0xff]  ;;  %vm3565_vm2 = vcmp.eq.s32.totalorder %v11340_v27, 17 }
 0x20a   :  { %8137 = vmatprep.mubr.f32.mxu1 %v625_v43  ;;  %10381 = vmatpush3.bf16.msra.mxu0 %v11423_v17 }
 0x20b   :  { %8138 = vmatmul.mubr.f32.gmra.mrb[26].mxu1 %v8083_v44  ;;  %10383 = vmatprep.subr.bf16.mxu0 %v11441_v36 }
 0x20c   :  { %9913 = vmatpush3.bf16.msra.mxu1 %v9910_v46  ;;  %v8086_v7 = vpop.f32.mrb[26].mxu0  ;;  %8915 = vmatprep.mubr.msk.f32.mxu0 %vm3193_vm3, %v11081_v16  ;;  %v6286_v46 = vld [vmem:[%s13724_s7 + $0x108] sm:$0xff]  ;;  %vm3566_vm3 = vcmp.eq.s32.totalorder %v11342_v30, 17 }
 0x20d   :  { %v635_v42 = vpop.f32.mrb[27].mxu0  ;;  %8916 = vmatmul.mubr.msk.f32.gmra.mrb[132].mxu0 %vm3194_vm4, %v11081_v16  ;;  %9915 = vmatprep.subr.bf16.mxu1 %v9914_v28  ;;  %v9954_v63 = vpack.c.bf16 %v6286_v46, %v6285_v32  ;;  %v6291_v46 = vld [vmem:[%s13724_s7 + $0x130] sm:$0xff]  ;;  %vm3567_vm4 = vcmp.eq.s32.totalorder %v11344_v31, 17 }
 0x20e   :  { %8140 = vmatprep.mubr.f32.mxu1 %v635_v42  ;;  %10385 = vmatpush3.bf16.msra.mxu0 %v11441_v36 }
 0x20f   :  { %8141 = vmatmul.mubr.f32.gmra.mrb[28].mxu1 %v8086_v7  ;;  %10387 = vmatprep.subr.bf16.mxu0 %v11459_v54 }
 0x210   :  { %9917 = vmatpush3.bf16.msra.mxu1 %v9914_v28  ;;  %v8089_v44 = vpop.f32.mrb[28].mxu0  ;;  %8918 = vmatprep.mubr.msk.f32.mxu0 %vm3195_vm5, %v11081_v16  ;;  %v6287_v28 = vld [vmem:[%s13724_s7 + $0x110] sm:$0xff]  ;;  %vm3568_vm5 = vcmp.eq.s32.totalorder %v11346_v34, 17 }
 0x211   :  { %v645_v43 = vpop.f32.mrb[29].mxu0  ;;  %8919 = vmatmul.mubr.msk.f32.gmra.mrb[134].mxu0 %vm3196_vm6, %v11081_v16  ;;  %9919 = vmatprep.subr.bf16.mxu1 %v9918_v21  ;;  %v9958_v32 = vpack.c.bf16 %v6288_v45, %v6287_v28  ;;  %vm3569_vm6 = vcmp.eq.s32.totalorder %v11348_v35, 17 }
 0x212   :  { %8143 = vmatprep.mubr.f32.mxu1 %v645_v43  ;;  %10389 = vmatpush3.bf16.msra.mxu0 %v11459_v54 }
 0x213   :  { %8144 = vmatmul.mubr.f32.gmra.mrb[30].mxu1 %v8089_v44  ;;  %10391 = vmatprep.subr.bf16.mxu0 %v11477_v10 }
 0x214   :  { %9921 = vmatpush3.bf16.msra.mxu1 %v9918_v21  ;;  %8178 = vmatprep.mubr.f32.mxu1 %v394_v56  ;;  %v12022_v7 = vpop.f32.mrb[30].mxu0  ;;  %v6290_v56 = vld [vmem:[%s13724_s7 + $0x128] sm:$0xff] }
 0x215   :  { %8921 = vmatprep.mubr.msk.f32.mxu0 %vm3197_vm7, %v11081_v16  ;;  %9955 = vmatprep.subr.bf16.mxu1 %v9954_v63  ;;  %v12025_v42 = vpop.f32.mrb[31].mxu0  ;;  %vm3570_vm7 = vcmp.eq.s32.totalorder %v11350_v38, 17 }
 0x216   :  { %8922 = vmatmul.mubr.msk.f32.gmra.mrb[136].mxu0 %vm3198_vm8, %v11081_v16  ;;  %vm3571_vm8 = vcmp.eq.s32.totalorder %v11352_v39, 17 }
 0x217   :  { %10393 = vmatpush3.bf16.msra.mxu0 %v11477_v10  ;;  %8179 = vmatmul.mubr.f32.vlgmr.msra.gmra.mrb[16].mxu1 %v395_v53  ;;  %v9962_v53 = vpack.c.bf16 %v6290_v56, %v6289_v51  ;;  %v13731_v51 = vmax.f32 %v11488_v47, 0.0  ;;  %v6336_v56 = vld [vmem:[%s13724_s7 + $0x198] sm:$0xff] }
 0x218   :  { %9957 = vmatpush3.bf16.msra.mxu1 %v9954_v63  ;;  %10395 = vmatprep.subr.bf16.mxu0 %v11495_v49  ;;  %v12040_v21 = vpop.f32.mrb[32].mxu0 }
 0x219   :  { %8181 = vmatprep.mubr.f32.mxu1 %v396_v2  ;;  %8924 = vmatprep.mubr.msk.f32.mxu0 %vm3199_vm9, %v11081_v16  ;;  %v12045_v50 = vpop.f32.mrb[33].mxu0  ;;  %vm3929_vm9 = vcmp.eq.s32.totalorder %v11324_v13, 18 }
 0x21a   :  { %8925 = vmatmul.mubr.msk.f32.gmra.mrb[138].mxu0 %vm3200_vm10, %v11081_v16  ;;  %9959 = vmatprep.subr.bf16.mxu1 %v9958_v32  ;;  %vm3930_vm10 = vcmp.eq.s32.totalorder %v11326_v14, 18 }
 0x21b   :  { %10397 = vmatpush3.bf16.msra.mxu0 %v11495_v49  ;;  %8182 = vmatmul.mubr.f32.gmra.mrb[18].mxu1 %v397_v62  ;;  %v9966_v62 = vpack.c.bf16 %v6292_v60, %v6291_v46  ;;  %v6338_v60 = vld [vmem:[%s13724_s7 + $0x1a8] sm:$0xff] }
 0x21c   :  { %9961 = vmatpush3.bf16.msra.mxu1 %v9958_v32  ;;  %10399 = vmatprep.subr.bf16.mxu0 %v11508_v0  ;;  %v12058_v2 = vpop.f32.mrb[34].mxu0  ;;  %v13730_v32 = vmax.f32 %v11498_v57, 0.0  ;;  %v6335_v57 = vld [vmem:[%s13724_s7 + $0x190] sm:$0xff] }
 0x21d   :  { %8184 = vmatprep.mubr.f32.mxu1 %v398_v11  ;;  %8927 = vmatprep.mubr.f32.mxu0 %v11080_v1  ;;  %v12063_v58 = vpop.f32.mrb[35].mxu0  ;;  %v6294_v11 = vld [vmem:[%s13724_s7 + $0x148] sm:$0xff]  ;;  %v10022_v46 = vpack.c.bf16 %v6336_v56, %v6335_v57 }
 0x21e   :  { %8928 = vmatmul.mubr.f32.gmra.mrb[140].mxu0 %v11080_v1  ;;  %9963 = vmatprep.subr.bf16.mxu1 %v9962_v53 }
 0x21f   :  { %10401 = vmatpush3.bf16.msra.mxu0 %v11508_v0  ;;  %8185 = vmatmul.mubr.f32.gmra.mrb[20].mxu1 %v399_v8  ;;  %v9970_v8 = vpack.c.bf16 %v6294_v11, %v6293_v6  ;;  %v6339_v11 = vld [vmem:[%s13724_s7 + $0x1b0] sm:$0xff] }
 0x220   :  { %9965 = vmatpush3.bf16.msra.mxu1 %v9962_v53  ;;  %10435 = vmatprep.subr.bf16.mxu0 %v11387_v59  ;;  %v12078_v44 = vpop.f32.mrb[36].mxu0 }
 0x221   :  { %8187 = vmatprep.mubr.f32.mxu1 %v400_v29  ;;  %9018 = vmatprep.mubr.msk.f32.mxu0 %vm3558_vm11, %v11081_v16  ;;  %v12083_v4 = vpop.f32.mrb[37].mxu0  ;;  %v6296_v29 = vld [vmem:[%s13724_s7 + $0x158] sm:$0xff]  ;;  %vm3931_vm11 = vcmp.eq.s32.totalorder %v11330_v18, 18 }
 0x222   :  { %9019 = vmatmul.mubr.msk.f32.vlgmr.msra.gmra.mrb[142].mxu0 %vm3559_vm12, %v11081_v16  ;;  %9967 = vmatprep.subr.bf16.mxu1 %v9966_v62  ;;  %vm3932_vm12 = vcmp.eq.s32.totalorder %v11332_v19, 18 }
 0x223   :  { %10437 = vmatpush3.bf16.msra.mxu0 %v11387_v59  ;;  %8188 = vmatmul.mubr.f32.gmra.mrb[22].mxu1 %v401_v24  ;;  %v9974_v24 = vpack.c.bf16 %v6296_v29, %v6295_v20  ;;  %v6342_v29 = vld [vmem:[%s13724_s7 + $0x1c8] sm:$0xff] }
 0x224   :  { %9969 = vmatpush3.bf16.msra.mxu1 %v9966_v62  ;;  %10439 = vmatprep.subr.bf16.mxu0 %v11405_v5  ;;  %v12098_v43 = vpop.f32.mrb[38].mxu0 }
 0x225   :  { %8190 = vmatprep.mubr.f32.mxu1 %v402_v48  ;;  %9021 = vmatprep.mubr.msk.f32.mxu0 %vm3560_vm13, %v11081_v16  ;;  %v12103_v15 = vpop.f32.mrb[39].mxu0  ;;  %v6298_v48 = vld [vmem:[%s13724_s7 + $0x168] sm:$0xff]  ;;  %vm3933_vm13 = vcmp.eq.s32.totalorder %v11334_v22, 18 }
 0x226   :  { %9022 = vmatmul.mubr.msk.f32.gmra.mrb[144].mxu0 %vm3561_vm14, %v11081_v16  ;;  %9971 = vmatprep.subr.bf16.mxu1 %v9970_v8  ;;  %vm3934_vm14 = vcmp.eq.s32.totalorder %v11336_v23, 18 }
 0x227   :  { %10441 = vmatpush3.bf16.msra.mxu0 %v11405_v5  ;;  %8191 = vmatmul.mubr.f32.gmra.mrb[24].mxu1 %v403_v41  ;;  %v9978_v41 = vpack.c.bf16 %v6298_v48, %v6297_v37  ;;  %v6344_v48 = vld [vmem:[%s13724_s7 + $0x1d8] sm:$0xff] }
 0x228   :  { %9973 = vmatpush3.bf16.msra.mxu1 %v9970_v8  ;;  %10443 = vmatprep.subr.bf16.mxu0 %v11423_v17  ;;  %v12118_v63 = vpop.f32.mrb[40].mxu0 }
 0x229   :  { %8193 = vmatprep.mubr.f32.mxu1 %v404_v3  ;;  %9024 = vmatprep.mubr.msk.f32.mxu0 %vm3562_vm15, %v11081_v16  ;;  %v12123_v33 = vpop.f32.mrb[41].mxu0  ;;  %v6300_v3 = vld [vmem:[%s13724_s7 + $0x178] sm:$0xff]  ;;  %vm3935_vm15 = vcmp.eq.s32.totalorder %v11338_v26, 18 }
 0x22a   :  { %9025 = vmatmul.mubr.msk.f32.gmra.mrb[146].mxu0 %vm3563_vm0, %v11081_v16  ;;  %9975 = vmatprep.subr.bf16.mxu1 %v9974_v24  ;;  %vm3936_vm0 = vcmp.eq.s32.totalorder %v11340_v27, 18 }
 0x22b   :  { %10445 = vmatpush3.bf16.msra.mxu0 %v11423_v17  ;;  %8194 = vmatmul.mubr.f32.gmra.mrb[26].mxu1 %v405_v61  ;;  %v9982_v61 = vpack.c.bf16 %v6300_v3, %v6299_v55  ;;  %v6346_v3 = vld [vmem:[%s13724_s7 + $0x1e8] sm:$0xff] }
 0x22c   :  { %9977 = vmatpush3.bf16.msra.mxu1 %v9974_v24  ;;  %10447 = vmatprep.subr.bf16.mxu0 %v11441_v36  ;;  %v12138_v28 = vpop.f32.mrb[42].mxu0 }
 0x22d   :  { %8196 = vmatprep.mubr.f32.mxu1 %v406_v40  ;;  %9027 = vmatprep.mubr.msk.f32.mxu0 %vm3564_vm1, %v11081_v16  ;;  %v12143_v52 = vpop.f32.mrb[43].mxu0  ;;  %v6334_v40 = vld [vmem:[%s13724_s7 + $0x188] sm:$0xff]  ;;  %vm3937_vm1 = vcmp.eq.s32.totalorder %v11342_v30, 18 }
 0x22e   :  { %9028 = vmatmul.mubr.msk.f32.gmra.mrb[148].mxu0 %vm3565_vm2, %v11081_v16  ;;  %9979 = vmatprep.subr.bf16.mxu1 %v9978_v41  ;;  %vm3938_vm2 = vcmp.eq.s32.totalorder %v11344_v31, 18 }
 0x22f   :  { %10449 = vmatpush3.bf16.msra.mxu0 %v11441_v36  ;;  %8197 = vmatmul.mubr.f32.gmra.mrb[28].mxu1 %v407_v25  ;;  %v10018_v25 = vpack.c.bf16 %v6334_v40, %v6333_v12  ;;  %v6348_v40 = vld [vmem:[%s13724_s7 + $0x1f8] sm:$0xff] }
 0x230   :  { %9981 = vmatpush3.bf16.msra.mxu1 %v9978_v41  ;;  %10451 = vmatprep.subr.bf16.mxu0 %v11459_v54  ;;  %v12158_v45 = vpop.f32.mrb[44].mxu0 }
 0x231   :  { %8199 = vmatprep.mubr.f32.mxu1 %v13730_v32  ;;  %9030 = vmatprep.mubr.msk.f32.mxu0 %vm3566_vm3, %v11081_v16  ;;  %v12163_v9 = vpop.f32.mrb[45].mxu0  ;;  %vm3939_vm3 = vcmp.eq.s32.totalorder %v11346_v34, 18 }
 0x232   :  { %9031 = vmatmul.mubr.msk.f32.gmra.mrb[150].mxu0 %vm3567_vm4, %v11081_v16  ;;  %9983 = vmatprep.subr.bf16.mxu1 %v9982_v61  ;;  %vm3940_vm4 = vcmp.eq.s32.totalorder %v11348_v35, 18 }
 0x233   :  { %10453 = vmatpush3.bf16.msra.mxu0 %v11459_v54  ;;  %8200 = vmatmul.mubr.f32.gmra.mrb[30].mxu1 %v13731_v51  ;;  %v6380_v51 = vld [vmem:[%s13724_s7 + $0x208] sm:$0xff] }
 0x234   :  { %9985 = vmatpush3.bf16.msra.mxu1 %v9982_v61  ;;  %10455 = vmatprep.subr.bf16.mxu0 %v11477_v10  ;;  %v12178_v53 = vpop.f32.mrb[46].mxu0 }
 0x235   :  { %8290 = vmatprep.mubr.f32.mxu1 %v12025_v42  ;;  %9033 = vmatprep.mubr.msk.f32.mxu0 %vm3568_vm5, %v11081_v16  ;;  %v12182_v47 = vpop.f32.mrb[47].mxu0  ;;  %v6337_v42 = vld [vmem:[%s13724_s7 + $0x1a0] sm:$0xff]  ;;  %vm3941_vm5 = vcmp.eq.s32.totalorder %v11350_v38, 18 }
 0x236   :  { %9034 = vmatmul.mubr.msk.f32.gmra.mrb[152].mxu0 %vm3569_vm6, %v11081_v16  ;;  %10019 = vmatprep.subr.bf16.mxu1 %v10018_v25  ;;  %v10026_v6 = vpack.c.bf16 %v6338_v60, %v6337_v42  ;;  %vm3942_vm6 = vcmp.eq.s32.totalorder %v11352_v39, 18 }
 0x237   :  { %10457 = vmatpush3.bf16.msra.mxu0 %v11477_v10  ;;  %8291 = vmatmul.mubr.f32.vlgmr.msra.gmra.mrb[16].mxu1 %v12022_v7 }
 0x238   :  { %10021 = vmatpush3.bf16.msra.mxu1 %v10018_v25  ;;  %10459 = vmatprep.subr.bf16.mxu0 %v11495_v49  ;;  %v12196_v62 = vpop.f32.mrb[48].mxu0 }
 0x239   :  { %8293 = vmatprep.mubr.f32.mxu1 %v12045_v50  ;;  %9036 = vmatprep.mubr.msk.f32.mxu0 %vm3570_vm7, %v11081_v16  ;;  %v12200_v7 = vpop.f32.mrb[49].mxu0  ;;  %v6340_v50 = vld [vmem:[%s13724_s7 + $0x1b8] sm:$0xff]  ;;  %vm4300_vm7 = vcmp.eq.s32.totalorder %v11324_v13, 19 }
 0x23a   :  { %9037 = vmatmul.mubr.msk.f32.gmra.mrb[154].mxu0 %vm3571_vm8, %v11081_v16  ;;  %10023 = vmatprep.subr.bf16.mxu1 %v10022_v46  ;;  %vm4301_vm8 = vcmp.eq.s32.totalorder %v11326_v14, 19 }
 0x23b   :  { %10461 = vmatpush3.bf16.msra.mxu0 %v11495_v49  ;;  %8294 = vmatmul.mubr.f32.gmra.mrb[18].mxu1 %v12040_v21  ;;  %v10030_v21 = vpack.c.bf16 %v6340_v50, %v6339_v11 }
 0x23c   :  { %10025 = vmatpush3.bf16.msra.mxu1 %v10022_v46  ;;  %10463 = vmatprep.subr.bf16.mxu0 %v11508_v0  ;;  %v12212_v8 = vpop.f32.mrb[50].mxu0  ;;  %v6382_v46 = vld [vmem:[%s13724_s7 + $0x218] sm:$0xff] }
 0x23d   :  { %8296 = vmatprep.mubr.f32.mxu1 %v12063_v58  ;;  %9039 = vmatprep.mubr.f32.mxu0 %v11080_v1  ;;  %v12216_v20 = vpop.f32.mrb[51].mxu0  ;;  %v6341_v58 = vld [vmem:[%s13724_s7 + $0x1c0] sm:$0xff] }
 0x23e   :  { %9040 = vmatmul.mubr.f32.gmra.mrb[156].mxu0 %v11080_v1  ;;  %10027 = vmatprep.subr.bf16.mxu1 %v10026_v6  ;;  %v10034_v37 = vpack.c.bf16 %v6342_v29, %v6341_v58 }
 0x23f   :  { %10465 = vmatpush3.bf16.msra.mxu0 %v11508_v0  ;;  %8297 = vmatmul.mubr.f32.gmra.mrb[20].mxu1 %v12058_v2 }
 0x240   :  { %10029 = vmatpush3.bf16.msra.mxu1 %v10026_v6  ;;  %10499 = vmatprep.subr.bf16.mxu0 %v11387_v59  ;;  %v12230_v24 = vpop.f32.mrb[52].mxu0  ;;  %v6384_v6 = vld [vmem:[%s13724_s7 + $0x228] sm:$0xff] }
 0x241   :  { %8299 = vmatprep.mubr.f32.mxu1 %v12083_v4  ;;  %9130 = vmatprep.mubr.msk.f32.mxu0 %vm3929_vm9, %v11081_v16  ;;  %v12234_v2 = vpop.f32.mrb[53].mxu0  ;;  %v6343_v4 = vld [vmem:[%s13724_s7 + $0x1d0] sm:$0xff]  ;;  %vm4302_vm9 = vcmp.eq.s32.totalorder %v11330_v18, 19 }
 0x242   :  { %9131 = vmatmul.mubr.msk.f32.vlgmr.msra.gmra.mrb[158].mxu0 %vm3930_vm10, %v11081_v16  ;;  %10031 = vmatprep.subr.bf16.mxu1 %v10030_v21  ;;  %v10038_v55 = vpack.c.bf16 %v6344_v48, %v6343_v4  ;;  %vm4303_vm10 = vcmp.eq.s32.totalorder %v11332_v19, 19 }
 0x243   :  { %10501 = vmatpush3.bf16.msra.mxu0 %v11387_v59  ;;  %8300 = vmatmul.mubr.f32.gmra.mrb[22].mxu1 %v12078_v44 }
 0x244   :  { %10033 = vmatpush3.bf16.msra.mxu1 %v10030_v21  ;;  %10503 = vmatprep.subr.bf16.mxu0 %v11405_v5  ;;  %v12248_v41 = vpop.f32.mrb[54].mxu0  ;;  %v6385_v21 = vld [vmem:[%s13724_s7 + $0x230] sm:$0xff] }
 0x245   :  { %8302 = vmatprep.mubr.f32.mxu1 %v12103_v15  ;;  %9133 = vmatprep.mubr.msk.f32.mxu0 %vm3931_vm11, %v11081_v16  ;;  %v12252_v44 = vpop.f32.mrb[55].mxu0  ;;  %v6345_v15 = vld [vmem:[%s13724_s7 + $0x1e0] sm:$0xff]  ;;  %vm4304_vm11 = vcmp.eq.s32.totalorder %v11334_v22, 19 }
 0x246   :  { %9134 = vmatmul.mubr.msk.f32.gmra.mrb[160].mxu0 %vm3932_vm12, %v11081_v16  ;;  %10035 = vmatprep.subr.bf16.mxu1 %v10034_v37  ;;  %v10042_v12 = vpack.c.bf16 %v6346_v3, %v6345_v15  ;;  %vm4305_vm12 = vcmp.eq.s32.totalorder %v11336_v23, 19 }
 0x247   :  { %10505 = vmatpush3.bf16.msra.mxu0 %v11405_v5  ;;  %8303 = vmatmul.mubr.f32.gmra.mrb[24].mxu1 %v12098_v43 }
 0x248   :  { %10037 = vmatpush3.bf16.msra.mxu1 %v10034_v37  ;;  %10507 = vmatprep.subr.bf16.mxu0 %v11423_v17  ;;  %v12266_v61 = vpop.f32.mrb[56].mxu0  ;;  %v6388_v37 = vld [vmem:[%s13724_s7 + $0x248] sm:$0xff] }
 0x249   :  { %8305 = vmatprep.mubr.f32.mxu1 %v12123_v33  ;;  %9136 = vmatprep.mubr.msk.f32.mxu0 %vm3933_vm13, %v11081_v16  ;;  %v12270_v43 = vpop.f32.mrb[57].mxu0  ;;  %v6347_v33 = vld [vmem:[%s13724_s7 + $0x1f0] sm:$0xff]  ;;  %vm4306_vm13 = vcmp.eq.s32.totalorder %v11338_v26, 19 }
 0x24a   :  { %9137 = vmatmul.mubr.msk.f32.gmra.mrb[162].mxu0 %vm3934_vm14, %v11081_v16  ;;  %10039 = vmatprep.subr.bf16.mxu1 %v10038_v55  ;;  %v10046_v25 = vpack.c.bf16 %v6348_v40, %v6347_v33  ;;  %vm4307_vm14 = vcmp.eq.s32.totalorder %v11340_v27, 19 }
 0x24b   :  { %10509 = vmatpush3.bf16.msra.mxu0 %v11423_v17  ;;  %8306 = vmatmul.mubr.f32.gmra.mrb[26].mxu1 %v12118_v63 }
 0x24c   :  { %10041 = vmatpush3.bf16.msra.mxu1 %v10038_v55  ;;  %10511 = vmatprep.subr.bf16.mxu0 %v11441_v36  ;;  %v12284_v32 = vpop.f32.mrb[58].mxu0  ;;  %v6390_v55 = vld [vmem:[%s13724_s7 + $0x258] sm:$0xff] }
 0x24d   :  { %8308 = vmatprep.mubr.f32.mxu1 %v12143_v52  ;;  %9139 = vmatprep.mubr.msk.f32.mxu0 %vm3935_vm15, %v11081_v16  ;;  %v12288_v63 = vpop.f32.mrb[59].mxu0  ;;  %v6379_v52 = vld [vmem:[%s13724_s7 + $0x200] sm:$0xff]  ;;  %vm4308_vm15 = vcmp.eq.s32.totalorder %v11342_v30, 19 }
 0x24e   :  { %9140 = vmatmul.mubr.msk.f32.gmra.mrb[164].mxu0 %vm3936_vm0, %v11081_v16  ;;  %10043 = vmatprep.subr.bf16.mxu1 %v10042_v12  ;;  %v10082_v56 = vpack.c.bf16 %v6380_v51, %v6379_v52  ;;  %vm4309_vm0 = vcmp.eq.s32.totalorder %v11344_v31, 19 }
 0x24f   :  { %10513 = vmatpush3.bf16.msra.mxu0 %v11441_v36  ;;  %8309 = vmatmul.mubr.f32.gmra.mrb[28].mxu1 %v12138_v28 }
 0x250   :  { %10045 = vmatpush3.bf16.msra.mxu1 %v10042_v12  ;;  %10515 = vmatprep.subr.bf16.mxu0 %v11459_v54  ;;  %v12302_v57 = vpop.f32.mrb[60].mxu0  ;;  %v6392_v12 = vld [vmem:[%s13724_s7 + $0x268] sm:$0xff] }
 0x251   :  { %8311 = vmatprep.mubr.f32.mxu1 %v12163_v9  ;;  %9142 = vmatprep.mubr.msk.f32.mxu0 %vm3937_vm1, %v11081_v16  ;;  %v12306_v28 = vpop.f32.mrb[61].mxu0  ;;  %v6381_v9 = vld [vmem:[%s13724_s7 + $0x210] sm:$0xff]  ;;  %vm4310_vm1 = vcmp.eq.s32.totalorder %v11346_v34, 19 }
 0x252   :  { %9143 = vmatmul.mubr.msk.f32.gmra.mrb[166].mxu0 %vm3938_vm2, %v11081_v16  ;;  %10047 = vmatprep.subr.bf16.mxu1 %v10046_v25  ;;  %v10086_v60 = vpack.c.bf16 %v6382_v46, %v6381_v9  ;;  %vm4311_vm2 = vcmp.eq.s32.totalorder %v11348_v35, 19 }
 0x253   :  { %10517 = vmatpush3.bf16.msra.mxu0 %v11459_v54  ;;  %8312 = vmatmul.mubr.f32.gmra.mrb[30].mxu1 %v12158_v45 }
 0x254   :  { %10049 = vmatpush3.bf16.msra.mxu1 %v10046_v25  ;;  %10519 = vmatprep.subr.bf16.mxu0 %v11477_v10  ;;  %v12320_v42 = vpop.f32.mrb[62].mxu0  ;;  %v6394_v25 = vld [vmem:[%s13724_s7 + $0x278] sm:$0xff] }
 0x255   :  { %8402 = vmatprep.mubr.f32.mxu1 %v12182_v47  ;;  %9145 = vmatprep.mubr.msk.f32.mxu0 %vm3939_vm3, %v11081_v16  ;;  %v12324_v45 = vpop.f32.mrb[63].mxu0  ;;  %v6383_v47 = vld [vmem:[%s13724_s7 + $0x220] sm:$0xff]  ;;  %vm4312_vm3 = vcmp.eq.s32.totalorder %v11350_v38, 19 }
 0x256   :  { %9146 = vmatmul.mubr.msk.f32.gmra.mrb[168].mxu0 %vm3940_vm4, %v11081_v16  ;;  %10083 = vmatprep.subr.bf16.mxu1 %v10082_v56  ;;  %v10090_v50 = vpack.c.bf16 %v6384_v6, %v6383_v47  ;;  %vm4313_vm4 = vcmp.eq.s32.totalorder %v11352_v39, 19 }
 0x257   :  { %10521 = vmatpush3.bf16.msra.mxu0 %v11477_v10  ;;  %8403 = vmatmul.mubr.f32.vlgmr.msra.gmra.mrb[16].mxu1 %v12178_v53 }
 0x258   :  { %10085 = vmatpush3.bf16.msra.mxu1 %v10082_v56  ;;  %10523 = vmatprep.subr.bf16.mxu0 %v11495_v49  ;;  %v12338_v11 = vpop.f32.mrb[64].mxu0  ;;  %v6426_v56 = vld [vmem:[%s13724_s7 + $0x288] sm:$0xff] }
 0x259   :  { %8405 = vmatprep.mubr.f32.mxu1 %v12200_v7  ;;  %9148 = vmatprep.mubr.msk.f32.mxu0 %vm3941_vm5, %v11081_v16  ;;  %v12342_v53 = vpop.f32.mrb[65].mxu0  ;;  %v6386_v7 = vld [vmem:[%s13724_s7 + $0x238] sm:$0xff]  ;;  %vm4671_vm5 = vcmp.eq.s32.totalorder %v11324_v13, 24 }
 0x25a   :  { %9149 = vmatmul.mubr.msk.f32.gmra.mrb[170].mxu0 %vm3942_vm6, %v11081_v16  ;;  %10087 = vmatprep.subr.bf16.mxu1 %v10086_v60  ;;  %vm4672_vm6 = vcmp.eq.s32.totalorder %v11326_v14, 24 }
 0x25b   :  { %10525 = vmatpush3.bf16.msra.mxu0 %v11495_v49  ;;  %8406 = vmatmul.mubr.f32.gmra.mrb[18].mxu1 %v12196_v62  ;;  %v10094_v62 = vpack.c.bf16 %v6386_v7, %v6385_v21  ;;  %v6431_v7 = vld [vmem:[%s13724_s7 + $0x2b0] sm:$0xff] }
 0x25c   :  { %10089 = vmatpush3.bf16.msra.mxu1 %v10086_v60  ;;  %10527 = vmatprep.subr.bf16.mxu0 %v11508_v0  ;;  %v12354_v58 = vpop.f32.mrb[66].mxu0  ;;  %v6428_v60 = vld [vmem:[%s13724_s7 + $0x298] sm:$0xff] }
 0x25d   :  { %8408 = vmatprep.mubr.f32.mxu1 %v12216_v20  ;;  %9151 = vmatprep.mubr.f32.mxu0 %v11080_v1  ;;  %v12358_v29 = vpop.f32.mrb[67].mxu0  ;;  %v6387_v20 = vld [vmem:[%s13724_s7 + $0x240] sm:$0xff] }
 0x25e   :  { %9152 = vmatmul.mubr.f32.gmra.mrb[172].mxu0 %v11080_v1  ;;  %10091 = vmatprep.subr.bf16.mxu1 %v10090_v50  ;;  %v10098_v48 = vpack.c.bf16 %v6388_v37, %v6387_v20  ;;  %v6434_v37 = vld [vmem:[%s13724_s7 + $0x2c8] sm:$0xff] }
 0x25f   :  { %10529 = vmatpush3.bf16.msra.mxu0 %v11508_v0  ;;  %8409 = vmatmul.mubr.f32.gmra.mrb[20].mxu1 %v12212_v8 }
 0x260   :  { %10093 = vmatpush3.bf16.msra.mxu1 %v10090_v50  ;;  %10563 = vmatprep.subr.bf16.mxu0 %v11387_v59  ;;  %v12372_v4 = vpop.f32.mrb[68].mxu0  ;;  %v6430_v50 = vld [vmem:[%s13724_s7 + $0x2a8] sm:$0xff] }
 0x261   :  { %8411 = vmatprep.mubr.f32.mxu1 %v12234_v2  ;;  %9242 = vmatprep.mubr.msk.f32.mxu0 %vm4300_vm7, %v11081_v16  ;;  %v12376_v8 = vpop.f32.mrb[69].mxu0  ;;  %v6389_v2 = vld [vmem:[%s13724_s7 + $0x250] sm:$0xff]  ;;  %vm4673_vm7 = vcmp.eq.s32.totalorder %v11330_v18, 24 }
 0x262   :  { %9243 = vmatmul.mubr.msk.f32.vlgmr.msra.gmra.mrb[174].mxu0 %vm4301_vm8, %v11081_v16  ;;  %10095 = vmatprep.subr.bf16.mxu1 %v10094_v62  ;;  %v10102_v3 = vpack.c.bf16 %v6390_v55, %v6389_v2  ;;  %vm4674_vm8 = vcmp.eq.s32.totalorder %v11332_v19, 24  ;;  %v6436_v55 = vld [vmem:[%s13724_s7 + $0x2d8] sm:$0xff] }
 0x263   :  { %10565 = vmatpush3.bf16.msra.mxu0 %v11387_v59  ;;  %8412 = vmatmul.mubr.f32.gmra.mrb[22].mxu1 %v12230_v24 }
 0x264   :  { %10097 = vmatpush3.bf16.msra.mxu1 %v10094_v62  ;;  %10567 = vmatprep.subr.bf16.mxu0 %v11405_v5  ;;  %v12390_v15 = vpop.f32.mrb[70].mxu0 }
 0x265   :  { %8414 = vmatprep.mubr.f32.mxu1 %v12252_v44  ;;  %9245 = vmatprep.mubr.msk.f32.mxu0 %vm4302_vm9, %v11081_v16  ;;  %v12394_v24 = vpop.f32.mrb[71].mxu0  ;;  %v6391_v44 = vld [vmem:[%s13724_s7 + $0x260] sm:$0xff]  ;;  %vm4675_vm9 = vcmp.eq.s32.totalorder %v11334_v22, 24 }
 0x266   :  { %9246 = vmatmul.mubr.msk.f32.gmra.mrb[176].mxu0 %vm4303_vm10, %v11081_v16  ;;  %10099 = vmatprep.subr.bf16.mxu1 %v10098_v48  ;;  %v10106_v40 = vpack.c.bf16 %v6392_v12, %v6391_v44  ;;  %vm4676_vm10 = vcmp.eq.s32.totalorder %v11336_v23, 24  ;;  %v6438_v12 = vld [vmem:[%s13724_s7 + $0x2e8] sm:$0xff] }
 0x267   :  { %10569 = vmatpush3.bf16.msra.mxu0 %v11405_v5  ;;  %8415 = vmatmul.mubr.f32.gmra.mrb[24].mxu1 %v12248_v41 }
 0x268   :  { %10101 = vmatpush3.bf16.msra.mxu1 %v10098_v48  ;;  %10571 = vmatprep.subr.bf16.mxu0 %v11423_v17  ;;  %v12408_v33 = vpop.f32.mrb[72].mxu0 }
 0x269   :  { %8417 = vmatprep.mubr.f32.mxu1 %v12270_v43  ;;  %9248 = vmatprep.mubr.msk.f32.mxu0 %vm4304_vm11, %v11081_v16  ;;  %v12412_v41 = vpop.f32.mrb[73].mxu0  ;;  %v6393_v43 = vld [vmem:[%s13724_s7 + $0x270] sm:$0xff]  ;;  %vm4677_vm11 = vcmp.eq.s32.totalorder %v11338_v26, 24 }
 0x26a   :  { %9249 = vmatmul.mubr.msk.f32.gmra.mrb[178].mxu0 %vm4305_vm12, %v11081_v16  ;;  %10103 = vmatprep.subr.bf16.mxu1 %v10102_v3  ;;  %v10110_v51 = vpack.c.bf16 %v6394_v25, %v6393_v43  ;;  %vm4678_vm12 = vcmp.eq.s32.totalorder %v11340_v27, 24  ;;  %v6440_v25 = vld [vmem:[%s13724_s7 + $0x2f8] sm:$0xff] }
 0x26b   :  { %10573 = vmatpush3.bf16.msra.mxu0 %v11423_v17  ;;  %8418 = vmatmul.mubr.f32.gmra.mrb[26].mxu1 %v12266_v61 }
 0x26c   :  { %10105 = vmatpush3.bf16.msra.mxu1 %v10102_v3  ;;  %10575 = vmatprep.subr.bf16.mxu0 %v11441_v36  ;;  %v12426_v52 = vpop.f32.mrb[74].mxu0 }
 0x26d   :  { %8420 = vmatprep.mubr.f32.mxu1 %v12288_v63  ;;  %9251 = vmatprep.mubr.msk.f32.mxu0 %vm4306_vm13, %v11081_v16  ;;  %v12430_v61 = vpop.f32.mrb[75].mxu0  ;;  %v6425_v63 = vld [vmem:[%s13724_s7 + $0x280] sm:$0xff]  ;;  %vm4679_vm13 = vcmp.eq.s32.totalorder %v11342_v30, 24 }
 0x26e   :  { %9252 = vmatmul.mubr.msk.f32.gmra.mrb[180].mxu0 %vm4307_vm14, %v11081_v16  ;;  %10107 = vmatprep.subr.bf16.mxu1 %v10106_v40  ;;  %v10146_v46 = vpack.c.bf16 %v6426_v56, %v6425_v63  ;;  %vm4680_vm14 = vcmp.eq.s32.totalorder %v11344_v31, 24  ;;  %v6472_v56 = vld [vmem:[%s13724_s7 + $0x308] sm:$0xff] }
 0x26f   :  { %10577 = vmatpush3.bf16.msra.mxu0 %v11441_v36  ;;  %8421 = vmatmul.mubr.f32.gmra.mrb[28].mxu1 %v12284_v32 }
 0x270   :  { %10109 = vmatpush3.bf16.msra.mxu1 %v10106_v40  ;;  %10579 = vmatprep.subr.bf16.mxu0 %v11459_v54  ;;  %v12444_v9 = vpop.f32.mrb[76].mxu0 }
 0x271   :  { %8423 = vmatprep.mubr.f32.mxu1 %v12306_v28  ;;  %9254 = vmatprep.mubr.msk.f32.mxu0 %vm4308_vm15, %v11081_v16  ;;  %v12448_v32 = vpop.f32.mrb[77].mxu0  ;;  %v6427_v28 = vld [vmem:[%s13724_s7 + $0x290] sm:$0xff]  ;;  %vm4681_vm15 = vcmp.eq.s32.totalorder %v11346_v34, 24 }
 0x272   :  { %9255 = vmatmul.mubr.msk.f32.gmra.mrb[182].mxu0 %vm4309_vm0, %v11081_v16  ;;  %10111 = vmatprep.subr.bf16.mxu1 %v10110_v51  ;;  %v10150_v6 = vpack.c.bf16 %v6428_v60, %v6427_v28  ;;  %vm4682_vm0 = vcmp.eq.s32.totalorder %v11348_v35, 24  ;;  %v6474_v60 = vld [vmem:[%s13724_s7 + $0x318] sm:$0xff] }
 0x273   :  { %10581 = vmatpush3.bf16.msra.mxu0 %v11459_v54  ;;  %8424 = vmatmul.mubr.f32.gmra.mrb[30].mxu1 %v12302_v57 }
 0x274   :  { %10113 = vmatpush3.bf16.msra.mxu1 %v10110_v51  ;;  %10583 = vmatprep.subr.bf16.mxu0 %v11477_v10  ;;  %v12462_v47 = vpop.f32.mrb[78].mxu0 }
 0x275   :  { %8514 = vmatprep.mubr.f32.mxu1 %v12324_v45  ;;  %9257 = vmatprep.mubr.msk.f32.mxu0 %vm4310_vm1, %v11081_v16  ;;  %v12466_v57 = vpop.f32.mrb[79].mxu0  ;;  %v6429_v45 = vld [vmem:[%s13724_s7 + $0x2a0] sm:$0xff]  ;;  %vm4683_vm1 = vcmp.eq.s32.totalorder %v11350_v38, 24 }
 0x276   :  { %9258 = vmatmul.mubr.msk.f32.gmra.mrb[184].mxu0 %vm4311_vm2, %v11081_v16  ;;  %10147 = vmatprep.subr.bf16.mxu1 %v10146_v46  ;;  %v10154_v39 = vpack.c.bf16 %v6430_v50, %v6429_v45  ;;  %v6475_v50 = vld [vmem:[%s13724_s7 + $0x320] sm:$0xff]  ;;  %vm5042_vm2 = vcmp.eq.s32.totalorder %v11324_v13, 25 }
 0x277   :  { %10585 = vmatpush3.bf16.msra.mxu0 %v11477_v10  ;;  %8515 = vmatmul.mubr.f32.vlgmr.msra.gmra.mrb[16].mxu1 %v12320_v42 }
 0x278   :  { %10149 = vmatpush3.bf16.msra.mxu1 %v10146_v46  ;;  %10587 = vmatprep.subr.bf16.mxu0 %v11495_v49  ;;  %v12480_v21 = vpop.f32.mrb[80].mxu0 }
 0x279   :  { %8517 = vmatprep.mubr.f32.mxu1 %v12342_v53  ;;  %9260 = vmatprep.mubr.msk.f32.mxu0 %vm4312_vm3, %v11081_v16  ;;  %v12484_v42 = vpop.f32.mrb[81].mxu0  ;;  %v6432_v53 = vld [vmem:[%s13724_s7 + $0x2b8] sm:$0xff]  ;;  %vm5043_vm3 = vcmp.eq.s32.totalorder %v11326_v14, 25 }
 0x27a   :  { %9261 = vmatmul.mubr.msk.f32.gmra.mrb[186].mxu0 %vm4313_vm4, %v11081_v16  ;;  %10151 = vmatprep.subr.bf16.mxu1 %v10150_v6  ;;  %vm5044_vm4 = vcmp.eq.s32.totalorder %v11330_v18, 25 }
 0x27b   :  { %10589 = vmatpush3.bf16.msra.mxu0 %v11495_v49  ;;  %8518 = vmatmul.mubr.f32.gmra.mrb[18].mxu1 %v12338_v11  ;;  %v10158_v11 = vpack.c.bf16 %v6432_v53, %v6431_v7  ;;  %v6477_v53 = vld [vmem:[%s13724_s7 + $0x330] sm:$0xff] }
 0x27c   :  { %10153 = vmatpush3.bf16.msra.mxu1 %v10150_v6  ;;  %10591 = vmatprep.subr.bf16.mxu0 %v11508_v0  ;;  %v12496_v62 = vpop.f32.mrb[82].mxu0 }
 0x27d   :  { %8520 = vmatprep.mubr.f32.mxu1 %v12358_v29  ;;  %9263 = vmatprep.mubr.f32.mxu0 %v11080_v1  ;;  %v12500_v20 = vpop.f32.mrb[83].mxu0  ;;  %v6433_v29 = vld [vmem:[%s13724_s7 + $0x2c0] sm:$0xff] }
 0x27e   :  { %9264 = vmatmul.mubr.f32.gmra.mrb[188].mxu0 %v11080_v1  ;;  %10155 = vmatprep.subr.bf16.mxu1 %v10154_v39  ;;  %v10162_v2 = vpack.c.bf16 %v6434_v37, %v6433_v29  ;;  %v6480_v37 = vld [vmem:[%s13724_s7 + $0x348] sm:$0xff] }
 0x27f   :  { %10593 = vmatpush3.bf16.msra.mxu0 %v11508_v0  ;;  %8521 = vmatmul.mubr.f32.gmra.mrb[20].mxu1 %v12354_v58 }
 0x280   :  { %10157 = vmatpush3.bf16.msra.mxu1 %v10154_v39  ;;  %10627 = vmatprep.subr.bf16.mxu0 %v11387_v59  ;;  %v12514_v48 = vpop.f32.mrb[84].mxu0 }
 0x281   :  { %8523 = vmatprep.mubr.f32.mxu1 %v12376_v8  ;;  %9354 = vmatprep.mubr.msk.f32.mxu0 %vm4671_vm5, %v11081_v16  ;;  %v12518_v58 = vpop.f32.mrb[85].mxu0  ;;  %v6435_v8 = vld [vmem:[%s13724_s7 + $0x2d0] sm:$0xff]  ;;  %vm5045_vm5 = vcmp.eq.s32.totalorder %v11332_v19, 25 }
 0x282   :  { %9355 = vmatmul.mubr.msk.f32.vlgmr.msra.gmra.mrb[190].mxu0 %vm4672_vm6, %v11081_v16  ;;  %10159 = vmatprep.subr.bf16.mxu1 %v10158_v11  ;;  %v10166_v44 = vpack.c.bf16 %v6436_v55, %v6435_v8  ;;  %v6482_v55 = vld [vmem:[%s13724_s7 + $0x358] sm:$0xff]  ;;  %vm5046_vm6 = vcmp.eq.s32.totalorder %v11334_v22, 25 }
 0x283   :  { %10629 = vmatpush3.bf16.msra.mxu0 %v11387_v59  ;;  %8524 = vmatmul.mubr.f32.gmra.mrb[22].mxu1 %v12372_v4 }
 0x284   :  { %10161 = vmatpush3.bf16.msra.mxu1 %v10158_v11  ;;  %10631 = vmatprep.subr.bf16.mxu0 %v11405_v5  ;;  %v12532_v3 = vpop.f32.mrb[86].mxu0 }
 0x285   :  { %8526 = vmatprep.mubr.f32.mxu1 %v12394_v24  ;;  %9357 = vmatprep.mubr.msk.f32.mxu0 %vm4673_vm7, %v11081_v16  ;;  %v12536_v4 = vpop.f32.mrb[87].mxu0  ;;  %v6437_v24 = vld [vmem:[%s13724_s7 + $0x2e0] sm:$0xff]  ;;  %vm5047_vm7 = vcmp.eq.s32.totalorder %v11336_v23, 25 }
 0x286   :  { %9358 = vmatmul.mubr.msk.f32.gmra.mrb[192].mxu0 %vm4674_vm8, %v11081_v16  ;;  %10163 = vmatprep.subr.bf16.mxu1 %v10162_v2  ;;  %v10170_v43 = vpack.c.bf16 %v6438_v12, %v6437_v24  ;;  %v6484_v12 = vld [vmem:[%s13724_s7 + $0x368] sm:$0xff]  ;;  %vm5048_vm8 = vcmp.eq.s32.totalorder %v11338_v26, 25 }
 0x287   :  { %10633 = vmatpush3.bf16.msra.mxu0 %v11405_v5  ;;  %8527 = vmatmul.mubr.f32.gmra.mrb[24].mxu1 %v12390_v15 }
 0x288   :  { %10165 = vmatpush3.bf16.msra.mxu1 %v10162_v2  ;;  %10635 = vmatprep.subr.bf16.mxu0 %v11423_v17  ;;  %v12550_v40 = vpop.f32.mrb[88].mxu0 }
 0x289   :  { %8529 = vmatprep.mubr.f32.mxu1 %v12412_v41  ;;  %9360 = vmatprep.mubr.msk.f32.mxu0 %vm4675_vm9, %v11081_v16  ;;  %v12554_v15 = vpop.f32.mrb[89].mxu0  ;;  %v6439_v41 = vld [vmem:[%s13724_s7 + $0x2f0] sm:$0xff]  ;;  %vm5049_vm9 = vcmp.eq.s32.totalorder %v11340_v27, 25 }
 0x28a   :  { %9361 = vmatmul.mubr.msk.f32.gmra.mrb[194].mxu0 %vm4676_vm10, %v11081_v16  ;;  %10167 = vmatprep.subr.bf16.mxu1 %v10166_v44  ;;  %v10174_v63 = vpack.c.bf16 %v6440_v25, %v6439_v41  ;;  %v6486_v25 = vld [vmem:[%s13724_s7 + $0x378] sm:$0xff]  ;;  %vm5050_vm10 = vcmp.eq.s32.totalorder %v11342_v30, 25 }
 0x28b   :  { %10637 = vmatpush3.bf16.msra.mxu0 %v11423_v17  ;;  %8530 = vmatmul.mubr.f32.gmra.mrb[26].mxu1 %v12408_v33 }
 0x28c   :  { %10169 = vmatpush3.bf16.msra.mxu1 %v10166_v44  ;;  %10639 = vmatprep.subr.bf16.mxu0 %v11441_v36  ;;  %v12568_v51 = vpop.f32.mrb[90].mxu0 }
 0x28d   :  { %8532 = vmatprep.mubr.f32.mxu1 %v12430_v61  ;;  %9363 = vmatprep.mubr.msk.f32.mxu0 %vm4677_vm11, %v11081_v16  ;;  %v12572_v33 = vpop.f32.mrb[91].mxu0  ;;  %v6471_v61 = vld [vmem:[%s13724_s7 + $0x300] sm:$0xff]  ;;  %vm5051_vm11 = vcmp.eq.s32.totalorder %v11344_v31, 25 }
 0x28e   :  { %9364 = vmatmul.mubr.msk.f32.gmra.mrb[196].mxu0 %vm4678_vm12, %v11081_v16  ;;  %10171 = vmatprep.subr.bf16.mxu1 %v10170_v43  ;;  %v10210_v28 = vpack.c.bf16 %v6472_v56, %v6471_v61  ;;  %v6518_v56 = vld [vmem:[%s13724_s7 + $0x388] sm:$0xff]  ;;  %vm5052_vm12 = vcmp.eq.s32.totalorder %v11346_v34, 25 }
 0x28f   :  { %10641 = vmatpush3.bf16.msra.mxu0 %v11441_v36  ;;  %8533 = vmatmul.mubr.f32.gmra.mrb[28].mxu1 %v12426_v52 }
 0x290   :  { %10173 = vmatpush3.bf16.msra.mxu1 %v10170_v43  ;;  %10643 = vmatprep.subr.bf16.mxu0 %v11459_v54  ;;  %v12586_v46 = vpop.f32.mrb[92].mxu0 }
 0x291   :  { %8535 = vmatprep.mubr.f32.mxu1 %v12448_v32  ;;  %9366 = vmatprep.mubr.msk.f32.mxu0 %vm4679_vm13, %v11081_v16  ;;  %v12590_v52 = vpop.f32.mrb[93].mxu0  ;;  %v6473_v32 = vld [vmem:[%s13724_s7 + $0x310] sm:$0xff]  ;;  %vm5053_vm13 = vcmp.eq.s32.totalorder %v11348_v35, 25 }
 0x292   :  { %9367 = vmatmul.mubr.msk.f32.gmra.mrb[198].mxu0 %vm4680_vm14, %v11081_v16  ;;  %10175 = vmatprep.subr.bf16.mxu1 %v10174_v63  ;;  %v10214_v45 = vpack.c.bf16 %v6474_v60, %v6473_v32  ;;  %v6520_v60 = vld [vmem:[%s13724_s7 + $0x398] sm:$0xff]  ;;  %vm5054_vm14 = vcmp.eq.s32.totalorder %v11350_v38, 25 }
 0x293   :  { %10645 = vmatpush3.bf16.msra.mxu0 %v11459_v54  ;;  %8536 = vmatmul.mubr.f32.gmra.mrb[30].mxu1 %v12444_v9 }
 0x294   :  { %10177 = vmatpush3.bf16.msra.mxu1 %v10174_v63  ;;  %10647 = vmatprep.subr.bf16.mxu0 %v11477_v10  ;;  %v12604_v6 = vpop.f32.mrb[94].mxu0 }
 0x295   :  { %8626 = vmatprep.mubr.f32.mxu1 %v12466_v57  ;;  %9369 = vmatprep.mubr.msk.f32.mxu0 %vm4681_vm15, %v11081_v16  ;;  %v12608_v9 = vpop.f32.mrb[95].mxu0  ;;  %v6476_v57 = vld [vmem:[%s13724_s7 + $0x328] sm:$0xff]  ;;  %vm5413_vm15 = vcmp.eq.s32.totalorder %v11324_v13, 26 }
 0x296   :  { %9370 = vmatmul.mubr.msk.f32.gmra.mrb[200].mxu0 %vm4682_vm0, %v11081_v16  ;;  %10211 = vmatprep.subr.bf16.mxu1 %v10210_v28  ;;  %vm5414_vm0 = vcmp.eq.s32.totalorder %v11326_v14, 26 }
 0x297   :  { %10649 = vmatpush3.bf16.msra.mxu0 %v11477_v10  ;;  %8627 = vmatmul.mubr.f32.vlgmr.msra.gmra.mrb[16].mxu1 %v12462_v47  ;;  %v10218_v47 = vpack.c.bf16 %v6476_v57, %v6475_v50  ;;  %v6521_v57 = vld [vmem:[%s13724_s7 + $0x3a0] sm:$0xff] }
 0x298   :  { %10213 = vmatpush3.bf16.msra.mxu1 %v10210_v28  ;;  %10651 = vmatprep.subr.bf16.mxu0 %v11495_v49  ;;  %v12621_v39 = vpop.f32.mrb[96].mxu0 }
 0x299   :  { %8629 = vmatprep.mubr.f32.mxu1 %v12484_v42  ;;  %9372 = vmatprep.mubr.msk.f32.mxu0 %vm4683_vm1, %v11081_v16  ;;  %v12625_v7 = vpop.f32.mrb[97].mxu0  ;;  %v6478_v42 = vld [vmem:[%s13724_s7 + $0x338] sm:$0xff]  ;;  %vm5415_vm1 = vcmp.eq.s32.totalorder %v11330_v18, 26 }
 0x29a   :  { %9373 = vmatmul.mubr.f32.gmra.mrb[202].mxu0 %v11080_v1  ;;  %10215 = vmatprep.subr.bf16.mxu1 %v10214_v45 }
 0x29b   :  { %10653 = vmatpush3.bf16.msra.mxu0 %v11495_v49  ;;  %8630 = vmatmul.mubr.f32.gmra.mrb[18].mxu1 %v12480_v21  ;;  %v10222_v21 = vpack.c.bf16 %v6478_v42, %v6477_v53  ;;  %v6523_v42 = vld [vmem:[%s13724_s7 + $0x3b0] sm:$0xff] }
 0x29c   :  { %10217 = vmatpush3.bf16.msra.mxu1 %v10214_v45  ;;  %10655 = vmatprep.subr.bf16.mxu0 %v11508_v0  ;;  %v12637_v11 = vpop.f32.mrb[98].mxu0 }
 0x29d   :  { %8632 = vmatprep.mubr.f32.mxu1 %v12500_v20  ;;  %9375 = vmatprep.mubr.f32.mxu0 %v11080_v1  ;;  %v12641_v29 = vpop.f32.mrb[99].mxu0  ;;  %v6479_v20 = vld [vmem:[%s13724_s7 + $0x340] sm:$0xff] }
 0x29e   :  { %9376 = vmatmul.mubr.f32.gmra.mrb[204].mxu0 %v11080_v1  ;;  %10219 = vmatprep.subr.bf16.mxu1 %v10218_v47  ;;  %v10226_v8 = vpack.c.bf16 %v6480_v37, %v6479_v20  ;;  %v6526_v37 = vld [vmem:[%s13724_s7 + $0x3c8] sm:$0xff] }
 0x29f   :  { %10657 = vmatpush3.bf16.msra.mxu0 %v11508_v0  ;;  %8633 = vmatmul.mubr.f32.gmra.mrb[20].mxu1 %v12496_v62 }
 0x2a0   :  { %10221 = vmatpush3.bf16.msra.mxu1 %v10218_v47  ;;  %10691 = vmatprep.subr.bf16.mxu0 %v11387_v59  ;;  %v12655_v2 = vpop.f32.mrb[100].mxu0 }
 0x2a1   :  { %8635 = vmatprep.mubr.f32.mxu1 %v12518_v58  ;;  %9466 = vmatprep.mubr.msk.f32.mxu0 %vm5042_vm2, %v11081_v16  ;;  %v12659_v62 = vpop.f32.mrb[101].mxu0  ;;  %v6481_v58 = vld [vmem:[%s13724_s7 + $0x350] sm:$0xff]  ;;  %vm5416_vm2 = vcmp.eq.s32.totalorder %v11332_v19, 26 }
 0x2a2   :  { %9467 = vmatmul.mubr.msk.f32.vlgmr.msra.gmra.mrb[206].mxu0 %vm5043_vm3, %v11081_v16  ;;  %10223 = vmatprep.subr.bf16.mxu1 %v10222_v21  ;;  %v10230_v24 = vpack.c.bf16 %v6482_v55, %v6481_v58  ;;  %v6528_v55 = vld [vmem:[%s13724_s7 + $0x3d8] sm:$0xff]  ;;  %vm5417_vm3 = vcmp.eq.s32.totalorder %v11334_v22, 26 }
 0x2a3   :  { %10693 = vmatpush3.bf16.msra.mxu0 %v11387_v59  ;;  %8636 = vmatmul.mubr.f32.gmra.mrb[22].mxu1 %v12514_v48 }
 0x2a4   :  { %10225 = vmatpush3.bf16.msra.mxu1 %v10222_v21  ;;  %10695 = vmatprep.subr.bf16.mxu0 %v11405_v5  ;;  %v12673_v44 = vpop.f32.mrb[102].mxu0 }
 0x2a5   :  { %8638 = vmatprep.mubr.f32.mxu1 %v12536_v4  ;;  %9469 = vmatprep.mubr.msk.f32.mxu0 %vm5044_vm4, %v11081_v16  ;;  %v12677_v48 = vpop.f32.mrb[103].mxu0  ;;  %v6483_v4 = vld [vmem:[%s13724_s7 + $0x360] sm:$0xff]  ;;  %vm5418_vm4 = vcmp.eq.s32.totalorder %v11336_v23, 26 }
 0x2a6   :  { %9470 = vmatmul.mubr.msk.f32.gmra.mrb[208].mxu0 %vm5045_vm5, %v11081_v16  ;;  %10227 = vmatprep.subr.bf16.mxu1 %v10226_v8  ;;  %v10234_v41 = vpack.c.bf16 %v6484_v12, %v6483_v4  ;;  %v6530_v4 = vld [vmem:[%s13724_s7 + $0x3e8] sm:$0xff]  ;;  %vm5419_vm5 = vcmp.eq.s32.totalorder %v11338_v26, 26 }
 0x2a7   :  { %10697 = vmatpush3.bf16.msra.mxu0 %v11405_v5  ;;  %8639 = vmatmul.mubr.f32.gmra.mrb[24].mxu1 %v12532_v3 }
 0x2a8   :  { %10229 = vmatpush3.bf16.msra.mxu1 %v10226_v8  ;;  %10699 = vmatprep.subr.bf16.mxu0 %v11423_v17  ;;  %v12691_v43 = vpop.f32.mrb[104].mxu0 }
 0x2a9   :  { %8641 = vmatprep.mubr.f32.mxu1 %v12554_v15  ;;  %9472 = vmatprep.mubr.msk.f32.mxu0 %vm5046_vm6, %v11081_v16  ;;  %v12695_v3 = vpop.f32.mrb[105].mxu0  ;;  %v6485_v15 = vld [vmem:[%s13724_s7 + $0x370] sm:$0xff]  ;;  %vm5420_vm6 = vcmp.eq.s32.totalorder %v11340_v27, 26 }
 0x2aa   :  { %9473 = vmatmul.mubr.msk.f32.gmra.mrb[210].mxu0 %vm5047_vm7, %v11081_v16  ;;  %10231 = vmatprep.subr.bf16.mxu1 %v10230_v24  ;;  %v10238_v61 = vpack.c.bf16 %v6486_v25, %v6485_v15  ;;  %vm5421_vm7 = vcmp.eq.s32.totalorder %v11342_v30, 26  ;;  %v6561_v25 = vld [vmem:[%s13724_s7 + $0x400] sm:$0xff] }
 0x2ab   :  { %10701 = vmatpush3.bf16.msra.mxu0 %v11423_v17  ;;  %8642 = vmatmul.mubr.f32.gmra.mrb[26].mxu1 %v12550_v40 }
 0x2ac   :  { %10233 = vmatpush3.bf16.msra.mxu1 %v10230_v24  ;;  %10703 = vmatprep.subr.bf16.mxu0 %v11441_v36  ;;  %v12709_v63 = vpop.f32.mrb[106].mxu0 }
 0x2ad   :  { %8644 = vmatprep.mubr.f32.mxu1 %v12572_v33  ;;  %9475 = vmatprep.mubr.msk.f32.mxu0 %vm5048_vm8, %v11081_v16  ;;  %v12713_v40 = vpop.f32.mrb[107].mxu0  ;;  %v6517_v33 = vld [vmem:[%s13724_s7 + $0x380] sm:$0xff]  ;;  %vm5422_vm8 = vcmp.eq.s32.totalorder %v11344_v31, 26 }
 0x2ae   :  { %9476 = vmatmul.mubr.msk.f32.gmra.mrb[212].mxu0 %vm5049_vm9, %v11081_v16  ;;  %10235 = vmatprep.subr.bf16.mxu1 %v10234_v41  ;;  %v10274_v32 = vpack.c.bf16 %v6518_v56, %v6517_v33  ;;  %vm5423_vm9 = vcmp.eq.s32.totalorder %v11346_v34, 26  ;;  %v6563_v33 = vld [vmem:[%s13724_s7 + $0x410] sm:$0xff]  ;;  %v6564_v56 = vld [vmem:[%s13724_s7 + $0x418] sm:$0xff] }
 0x2af   :  { %10705 = vmatpush3.bf16.msra.mxu0 %v11441_v36  ;;  %8645 = vmatmul.mubr.f32.gmra.mrb[28].mxu1 %v12568_v51 }
 0x2b0   :  { %10237 = vmatpush3.bf16.msra.mxu1 %v10234_v41  ;;  %10707 = vmatprep.subr.bf16.mxu0 %v11459_v54  ;;  %v12727_v28 = vpop.f32.mrb[108].mxu0  ;;  %v6532_v41 = vld [vmem:[%s13724_s7 + $0x3f8] sm:$0xff] }
 0x2b1   :  { %8647 = vmatprep.mubr.f32.mxu1 %v12590_v52  ;;  %9478 = vmatprep.mubr.msk.f32.mxu0 %vm5050_vm10, %v11081_v16  ;;  %v12731_v51 = vpop.f32.mrb[109].mxu0  ;;  %v6519_v52 = vld [vmem:[%s13724_s7 + $0x390] sm:$0xff]  ;;  %vm5424_vm10 = vcmp.eq.s32.totalorder %v11348_v35, 26 }
 0x2b2   :  { %9479 = vmatmul.mubr.msk.f32.gmra.mrb[214].mxu0 %vm5051_vm11, %v11081_v16  ;;  %10239 = vmatprep.subr.bf16.mxu1 %v10238_v61  ;;  %v10278_v50 = vpack.c.bf16 %v6520_v60, %v6519_v52  ;;  %vm5425_vm11 = vcmp.eq.s32.totalorder %v11350_v38, 26  ;;  %v6566_v52 = vld [vmem:[%s13724_s7 + $0x428] sm:$0xff] }
 0x2b3   :  { %10709 = vmatpush3.bf16.msra.mxu0 %v11459_v54  ;;  %8648 = vmatmul.mubr.f32.gmra.mrb[30].mxu1 %v12586_v46 }
 0x2b4   :  { %10241 = vmatpush3.bf16.msra.mxu1 %v10238_v61  ;;  %10711 = vmatprep.subr.bf16.mxu0 %v11477_v10  ;;  %v12745_v45 = vpop.f32.mrb[110].mxu0 }
 0x2b5   :  { %8738 = vmatprep.mubr.f32.mxu1 %v12608_v9  ;;  %9481 = vmatprep.mubr.msk.f32.mxu0 %vm5052_vm12, %v11081_v16  ;;  %v12749_v46 = vpop.f32.mrb[111].mxu0  ;;  %v6522_v9 = vld [vmem:[%s13724_s7 + $0x3a8] sm:$0xff]  ;;  %vm5784_vm12 = vcmp.eq.s32.totalorder %v11324_v13, 27 }
 0x2b6   :  { %9482 = vmatmul.mubr.msk.f32.gmra.mrb[216].mxu0 %vm5053_vm13, %v11081_v16  ;;  %10275 = vmatprep.subr.bf16.mxu1 %v10274_v32  ;;  %vm5785_vm13 = vcmp.eq.s32.totalorder %v11326_v14, 27  ;;  %v6572_v14 = vld [vmem:[%s13724_s7 + $0x458] sm:$0xff] }
 0x2b7   :  { %10713 = vmatpush3.bf16.msra.mxu0 %v11477_v10  ;;  %8739 = vmatmul.mubr.f32.vlgmr.msra.gmra.mrb[16].mxu1 %v12604_v6  ;;  %v10282_v6 = vpack.c.bf16 %v6522_v9, %v6521_v57 }
 0x2b8   :  { %10277 = vmatpush3.bf16.msra.mxu1 %v10274_v32  ;;  %10715 = vmatprep.subr.bf16.mxu0 %v11495_v49  ;;  %v12762_v47 = vpop.f32.mrb[112].mxu0  ;;  %v6565_v32 = vld [vmem:[%s13724_s7 + $0x420] sm:$0xff] }
 0x2b9   :  { %8741 = vmatprep.mubr.f32.mxu1 %v12625_v7  ;;  %9484 = vmatprep.mubr.msk.f32.mxu0 %vm5054_vm14, %v11081_v16  ;;  %v12766_v53 = vpop.f32.mrb[113].mxu0  ;;  %v6524_v7 = vld [vmem:[%s13724_s7 + $0x3b8] sm:$0xff]  ;;  %vm5786_vm14 = vcmp.eq.s32.totalorder %v11330_v18, 27 }
 0x2ba   :  { %9485 = vmatmul.mubr.f32.gmra.mrb[218].mxu0 %v11080_v1  ;;  %10279 = vmatprep.subr.bf16.mxu1 %v10278_v50 }
 0x2bb   :  { %10717 = vmatpush3.bf16.msra.mxu0 %v11495_v49  ;;  %8742 = vmatmul.mubr.f32.gmra.mrb[18].mxu1 %v12621_v39  ;;  %v10286_v39 = vpack.c.bf16 %v6524_v7, %v6523_v42 }
 0x2bc   :  { %10281 = vmatpush3.bf16.msra.mxu1 %v10278_v50  ;;  %10719 = vmatprep.subr.bf16.mxu0 %v11508_v0  ;;  %v12778_v21 = vpop.f32.mrb[114].mxu0  ;;  %v6568_v50 = vld [vmem:[%s13724_s7 + $0x438] sm:$0xff] }
 0x2bd   :  { %8744 = vmatprep.mubr.f32.mxu1 %v12641_v29  ;;  %9487 = vmatprep.mubr.f32.mxu0 %v11080_v1  ;;  %v12782_v20 = vpop.f32.mrb[115].mxu0  ;;  %v6525_v29 = vld [vmem:[%s13724_s7 + $0x3c0] sm:$0xff] }
 0x2be   :  { %9488 = vmatmul.mubr.f32.gmra.mrb[220].mxu0 %v11080_v1  ;;  %10283 = vmatprep.subr.bf16.mxu1 %v10282_v6  ;;  %v10290_v58 = vpack.c.bf16 %v6526_v37, %v6525_v29  ;;  %v6575_v29 = vld [vmem:[%s13724_s7 + $0x470] sm:$0xff]  ;;  %v6576_v37 = vld [vmem:[%s13724_s7 + $0x478] sm:$0xff] }
 0x2bf   :  { %10721 = vmatpush3.bf16.msra.mxu0 %v11508_v0  ;;  %8745 = vmatmul.mubr.f32.gmra.mrb[20].mxu1 %v12637_v11 }
 0x2c0   :  { %10285 = vmatpush3.bf16.msra.mxu1 %v10282_v6  ;;  %10755 = vmatprep.subr.bf16.mxu0 %v11387_v59  ;;  %v12796_v8 = vpop.f32.mrb[116].mxu0 }
 0x2c1   :  { %8747 = vmatprep.mubr.f32.mxu1 %v12659_v62  ;;  %9578 = vmatprep.mubr.msk.f32.mxu0 %vm5413_vm15, %v11081_v16  ;;  %v12800_v11 = vpop.f32.mrb[117].mxu0  ;;  %v6527_v62 = vld [vmem:[%s13724_s7 + $0x3d0] sm:$0xff]  ;;  %vm5787_vm15 = vcmp.eq.s32.totalorder %v11332_v19, 27  ;;  %v6574_v19 = vld [vmem:[%s13724_s7 + $0x468] sm:$0xff] }
 0x2c2   :  { %9579 = vmatmul.mubr.msk.f32.vlgmr.msra.gmra.mrb[222].mxu0 %vm5414_vm0, %v11081_v16  ;;  %10287 = vmatprep.subr.bf16.mxu1 %v10286_v39  ;;  %vm5788_vm0 = vcmp.eq.s32.totalorder %v11334_v22, 27 }
 0x2c3   :  { %10757 = vmatpush3.bf16.msra.mxu0 %v11387_v59  ;;  %8748 = vmatmul.mubr.f32.gmra.mrb[22].mxu1 %v12655_v2  ;;  %v10294_v2 = vpack.c.bf16 %v6528_v55, %v6527_v62  ;;  %v6607_v55 = vld [vmem:[%s13724_s7 + $0x490] sm:$0xff] }
 0x2c4   :  { %10289 = vmatpush3.bf16.msra.mxu1 %v10286_v39  ;;  %10759 = vmatprep.subr.bf16.mxu0 %v11405_v5  ;;  %v12814_v24 = vpop.f32.mrb[118].mxu0 }
 0x2c5   :  { %8750 = vmatprep.mubr.f32.mxu1 %v12677_v48  ;;  %9581 = vmatprep.mubr.msk.f32.mxu0 %vm5415_vm1, %v11081_v16  ;;  %v12818_v59 = vpop.f32.mrb[119].mxu0  ;;  %v6529_v48 = vld [vmem:[%s13724_s7 + $0x3e0] sm:$0xff]  ;;  %vm5789_vm1 = vcmp.eq.s32.totalorder %v11336_v23, 27 }
 0x2c6   :  { %9582 = vmatmul.mubr.msk.f32.gmra.mrb[224].mxu0 %vm5416_vm2, %v11081_v16  ;;  %10291 = vmatprep.subr.bf16.mxu1 %v10290_v58  ;;  %vm5790_vm2 = vcmp.eq.s32.totalorder %v11338_v26, 27  ;;  %v10366_v26 = vpack.c.bf16 %v6576_v37, %v6575_v29  ;;  %v6864_v29 = vld [vmem:[%s13724_s7 + $0x798] sm:$0xff]  ;;  %v6655_v37 = vld [vmem:[%s13724_s7 + $0x530] sm:$0xff] }
 0x2c7   :  { %10761 = vmatpush3.bf16.msra.mxu0 %v11405_v5  ;;  %8751 = vmatmul.mubr.f32.gmra.mrb[24].mxu1 %v12673_v44  ;;  %v10298_v44 = vpack.c.bf16 %v6530_v4, %v6529_v48  ;;  %v6610_v48 = vld [vmem:[%s13724_s7 + $0x4a8] sm:$0xff] }
 0x2c8   :  { %10293 = vmatpush3.bf16.msra.mxu1 %v10290_v58  ;;  %10763 = vmatprep.subr.bf16.mxu0 %v11423_v17  ;;  %v12832_v12 = vpop.f32.mrb[120].mxu0  ;;  %v6606_v58 = vld [vmem:[%s13724_s7 + $0x488] sm:$0xff] }
 0x2c9   :  { %8753 = vmatprep.mubr.f32.mxu1 %v12695_v3  ;;  %9584 = vmatprep.mubr.msk.f32.mxu0 %vm5417_vm3, %v11081_v16  ;;  %v12836_v5 = vpop.f32.mrb[121].mxu0  ;;  %v6531_v3 = vld [vmem:[%s13724_s7 + $0x3f0] sm:$0xff]  ;;  %vm5791_vm3 = vcmp.eq.s32.totalorder %v11340_v27, 27 }
 0x2ca   :  { %9585 = vmatmul.mubr.msk.f32.gmra.mrb[226].mxu0 %vm5418_vm4, %v11081_v16  ;;  %10295 = vmatprep.subr.bf16.mxu1 %v10294_v2  ;;  %vm5792_vm4 = vcmp.eq.s32.totalorder %v11342_v30, 27 }
 0x2cb   :  { %10765 = vmatpush3.bf16.msra.mxu0 %v11423_v17  ;;  %8754 = vmatmul.mubr.f32.gmra.mrb[26].mxu1 %v12691_v43  ;;  %v10302_v43 = vpack.c.bf16 %v6532_v41, %v6531_v3  ;;  %v6613_v41 = vld [vmem:[%s13724_s7 + $0x4c0] sm:$0xff] }
 0x2cc   :  { %10297 = vmatpush3.bf16.msra.mxu1 %v10294_v2  ;;  %10767 = vmatprep.subr.bf16.mxu0 %v11441_v36  ;;  %v12850_v15 = vpop.f32.mrb[122].mxu0  ;;  %v6609_v2 = vld [vmem:[%s13724_s7 + $0x4a0] sm:$0xff] }
 0x2cd   :  { %8756 = vmatprep.mubr.f32.mxu1 %v12713_v40  ;;  %9587 = vmatprep.mubr.msk.f32.mxu0 %vm5419_vm5, %v11081_v16  ;;  %v12854_v17 = vpop.f32.mrb[123].mxu0  ;;  %v6562_v40 = vld [vmem:[%s13724_s7 + $0x408] sm:$0xff]  ;;  %vm5793_vm5 = vcmp.eq.s32.totalorder %v11344_v31, 27 }
 0x2ce   :  { %9588 = vmatmul.mubr.msk.f32.gmra.mrb[228].mxu0 %vm5420_vm6, %v11081_v16  ;;  %10299 = vmatprep.subr.bf16.mxu1 %v10298_v44  ;;  %vm5794_vm6 = vcmp.eq.s32.totalorder %v11346_v34, 27 }
 0x2cf   :  { %10769 = vmatpush3.bf16.msra.mxu0 %v11441_v36  ;;  %8757 = vmatmul.mubr.f32.gmra.mrb[28].mxu1 %v12709_v63  ;;  %v10338_v63 = vpack.c.bf16 %v6562_v40, %v6561_v25  ;;  %v6615_v40 = vld [vmem:[%s13724_s7 + $0x4d0] sm:$0xff] }
 0x2d0   :  { %10301 = vmatpush3.bf16.msra.mxu1 %v10298_v44  ;;  %10771 = vmatprep.subr.bf16.mxu0 %v11459_v54  ;;  %v12868_v61 = vpop.f32.mrb[124].mxu0 }
 0x2d1   :  { %8759 = vmatprep.mubr.f32.mxu1 %v12731_v51  ;;  %9590 = vmatprep.mubr.msk.f32.mxu0 %vm5421_vm7, %v11081_v16  ;;  %v12872_v36 = vpop.f32.mrb[125].mxu0  ;;  %vm5795_vm7 = vcmp.eq.s32.totalorder %v11348_v35, 27  ;;  %v10410_v35 = vpack.c.bf16 %v6610_v48, %v6609_v2  ;;  %v6867_v2 = vld [vmem:[%s13724_s7 + $0x7b0] sm:$0xff]  ;;  %v6868_v48 = vld [vmem:[%s13724_s7 + $0x7b8] sm:$0xff] }
 0x2d2   :  { %9591 = vmatmul.mubr.msk.f32.gmra.mrb[230].mxu0 %vm5422_vm8, %v11081_v16  ;;  %10303 = vmatprep.subr.bf16.mxu1 %v10302_v43  ;;  %vm5796_vm8 = vcmp.eq.s32.totalorder %v11350_v38, 27 }
 0x2d3   :  { %10773 = vmatpush3.bf16.msra.mxu0 %v11459_v54  ;;  %8760 = vmatmul.mubr.f32.gmra.mrb[30].mxu1 %v12727_v28  ;;  %v10342_v28 = vpack.c.bf16 %v6564_v56, %v6563_v33  ;;  %v6617_v33 = vld [vmem:[%s13724_s7 + $0x4e0] sm:$0xff]  ;;  %v6618_v56 = vld [vmem:[%s13724_s7 + $0x4e8] sm:$0xff] }
 0x2d4   :  { %10305 = vmatpush3.bf16.msra.mxu1 %v10302_v43  ;;  %10775 = vmatprep.subr.bf16.mxu0 %v11477_v10  ;;  %v12886_v51 = vpop.f32.mrb[126].mxu0 }
 0x2d5   :  { %8850 = vmatprep.mubr.f32.mxu1 %v12749_v46  ;;  %9593 = vmatprep.mubr.msk.f32.mxu0 %vm5423_vm9, %v11081_v16  ;;  %v12890_v54 = vpop.f32.mrb[127].mxu0  ;;  %v6567_v46 = vld [vmem:[%s13724_s7 + $0x430] sm:$0xff] }
 0x2d6   :  { %9594 = vmatmul.mubr.msk.f32.gmra.mrb[232].mxu0 %vm5424_vm10, %v11081_v16  ;;  %10339 = vmatprep.subr.bf16.mxu1 %v10338_v63  ;;  %v10350_v9 = vpack.c.bf16 %v6568_v50, %v6567_v46  ;;  %v6649_v46 = vld [vmem:[%s13724_s7 + $0x500] sm:$0xff]  ;;  %v6650_v50 = vld [vmem:[%s13724_s7 + $0x508] sm:$0xff] }
 0x2d7   :  { %10777 = vmatpush3.bf16.msra.mxu0 %v11477_v10  ;;  %8851 = vmatmul.mubr.f32.vlgmr.msra.gmra.mrb[16].mxu1 %v12745_v45  ;;  %v10346_v45 = vpack.c.bf16 %v6566_v52, %v6565_v32  ;;  %v6619_v32 = vld [vmem:[%s13724_s7 + $0x4f0] sm:$0xff]  ;;  %v6620_v52 = vld [vmem:[%s13724_s7 + $0x4f8] sm:$0xff] }
 0x2d8   :  { %10341 = vmatpush3.bf16.msra.mxu1 %v10338_v63  ;;  %10779 = vmatprep.subr.bf16.mxu0 %v11495_v49  ;;  %v12903_v60 = vpop.f32.mrb[128].mxu0 }
 0x2d9   :  { %8853 = vmatprep.mubr.f32.mxu1 %v12766_v53  ;;  %9596 = vmatprep.mubr.msk.f32.mxu0 %vm5425_vm11, %v11081_v16  ;;  %v12907_v10 = vpop.f32.mrb[129].mxu0 }
 0x2da   :  { %9597 = vmatmul.mubr.f32.gmra.mrb[234].mxu0 %v11080_v1  ;;  %10343 = vmatprep.subr.bf16.mxu1 %v10342_v28 }
 0x2db   :  { %10781 = vmatpush3.bf16.msra.mxu0 %v11495_v49  ;;  %8854 = vmatmul.mubr.f32.gmra.mrb[18].mxu1 %v12762_v47  ;;  %v6569_v49 = vld [vmem:[%s13724_s7 + $0x440] sm:$0xff]  ;;  %v6570_v47 = vld [vmem:[%s13724_s7 + $0x448] sm:$0xff] }
 0x2dc   :  { %10345 = vmatpush3.bf16.msra.mxu1 %v10342_v28  ;;  %10783 = vmatprep.subr.bf16.mxu0 %v11508_v0  ;;  %v12919_v57 = vpop.f32.mrb[130].mxu0  ;;  %v10354_v6 = vpack.c.bf16 %v6570_v47, %v6569_v49  ;;  %v6651_v49 = vld [vmem:[%s13724_s7 + $0x510] sm:$0xff]  ;;  %v6652_v47 = vld [vmem:[%s13724_s7 + $0x518] sm:$0xff] }
 0x2dd   :  { %8856 = vmatprep.mubr.f32.mxu1 %v12782_v20  ;;  %9599 = vmatprep.mubr.f32.mxu0 %v11080_v1  ;;  %v12923_v53 = vpop.f32.mrb[131].mxu0  ;;  %v6573_v20 = vld [vmem:[%s13724_s7 + $0x460] sm:$0xff] }
 0x2de   :  { %9600 = vmatmul.mubr.f32.gmra.mrb[236].mxu0 %v11080_v1  ;;  %10347 = vmatprep.subr.bf16.mxu1 %v10346_v45  ;;  %v10362_v22 = vpack.c.bf16 %v6574_v19, %v6573_v20 }
 0x2df   :  { %10785 = vmatpush3.bf16.msra.mxu0 %v11508_v0  ;;  %8857 = vmatmul.mubr.f32.gmra.mrb[20].mxu1 %v12778_v21  ;;  %v6571_v0 = vld [vmem:[%s13724_s7 + $0x450] sm:$0xff] }
 0x2e0   :  { %10349 = vmatpush3.bf16.msra.mxu1 %v10346_v45  ;;  %8859 = vmatprep.mubr.f32.mxu1 %v12800_v11  ;;  %v12938_v13 = vpop.f32.mrb[132].mxu0  ;;  %v10358_v7 = vpack.c.bf16 %v6572_v14, %v6571_v0  ;;  %v6605_v11 = vld [vmem:[%s13724_s7 + $0x480] sm:$0xff]  ;;  %v6862_v14 = vld [vmem:[%s13724_s7 + $0x788] sm:$0xff] }
 0x2e1   :  { %9690 = vmatprep.mubr.msk.f32.mxu0 %vm5784_vm12, %v11081_v16  ;;  %10351 = vmatprep.subr.bf16.mxu1 %v10350_v9  ;;  %v12941_v42 = vpop.f32.mrb[133].mxu0  ;;  %v10402_v30 = vpack.c.bf16 %v6606_v58, %v6605_v11  ;;  %v6861_v0 = vld [vmem:[%s13724_s7 + $0x780] sm:$0xff] }
 0x2e2   :  { %9691 = vmatmul.mubr.msk.f32.vlgmr.msra.gmra.mrb[238].mxu0 %vm5785_vm13, %v11081_v16  ;;  %v13136_v20 = vpack.c.bf16 %v6862_v14, %v6861_v0 }
 0x2e3   :  { %8860 = vmatmul.mubr.f32.gmra.mrb[22].mxu1 %v12796_v8  ;;  %9693 = vmatprep.mubr.msk.f32.mxu0 %vm5786_vm14, %v11081_v16 }
 0x2e4   :  { %10353 = vmatpush3.bf16.msra.mxu1 %v10350_v9  ;;  %8862 = vmatprep.mubr.f32.mxu1 %v12818_v59  ;;  %v12955_v18 = vpop.f32.mrb[134].mxu0  ;;  %v10466_v9 = vpack.c.bf16 %v6650_v50, %v6649_v46 }
 0x2e5   :  { %10355 = vmatprep.subr.bf16.mxu1 %v10354_v6  ;;  %v12957_v21 = vpop.f32.mrb[135].mxu0  ;;  %10787 = vmatprep.subr.bf16.mxu0 %v13136_v20 }
 0x2e6   :  { %9694 = vmatmul.mubr.msk.f32.gmra.mrb[240].mxu0 %vm5787_vm15, %v11081_v16 }
 0x2e7   :  { %8863 = vmatmul.mubr.f32.gmra.mrb[24].mxu1 %v12814_v24  ;;  %9696 = vmatprep.mubr.msk.f32.mxu0 %vm5788_vm0, %v11081_v16  ;;  %v6608_v24 = vld [vmem:[%s13724_s7 + $0x498] sm:$0xff] }
 0x2e8   :  { %10357 = vmatpush3.bf16.msra.mxu1 %v10354_v6  ;;  %8865 = vmatprep.mubr.f32.mxu1 %v12836_v5  ;;  %v10406_v31 = vpack.c.bf16 %v6608_v24, %v6607_v55  ;;  %v6612_v5 = vld [vmem:[%s13724_s7 + $0x4b8] sm:$0xff]  ;;  %v10470_v6 = vpack.c.bf16 %v6652_v47, %v6651_v49  ;;  %v6658_v55 = vld [vmem:[%s13724_s7 + $0x548] sm:$0xff]  ;;  %v6695_v49 = vld [vmem:[%s13724_s7 + $0x590] sm:$0xff] }
 0x2e9   :  { %10359 = vmatprep.subr.bf16.mxu1 %v10358_v7  ;;  %v12971_v39 = vpop.f32.mrb[136].mxu0  ;;  %10789 = vmatpush3.bf16.msra.mxu0 %v13136_v20 }
 0x2ea   :  { %9697 = vmatmul.mubr.msk.f32.gmra.mrb[242].mxu0 %vm5789_vm1, %v11081_v16  ;;  %v12980_v23 = vpop.f32.mrb[137].mxu0 }
 0x2eb   :  { %8866 = vmatmul.mubr.f32.gmra.mrb[26].mxu1 %v12832_v12  ;;  %9699 = vmatprep.mubr.msk.f32.mxu0 %vm5790_vm2, %v11081_v16  ;;  %v6611_v12 = vld [vmem:[%s13724_s7 + $0x4b0] sm:$0xff] }
 0x2ec   :  { %10361 = vmatpush3.bf16.msra.mxu1 %v10358_v7  ;;  %8868 = vmatprep.mubr.f32.mxu1 %v12854_v17  ;;  %v6654_v7 = vld [vmem:[%s13724_s7 + $0x528] sm:$0xff] }
 0x2ed   :  { %10363 = vmatprep.subr.bf16.mxu1 %v10362_v22  ;;  %v12987_v8 = vpop.f32.mrb[138].mxu0 }
 0x2ee   :  { %9700 = vmatmul.mubr.msk.f32.gmra.mrb[244].mxu0 %vm5791_vm3, %v11081_v16  ;;  %v12996_v27 = vpop.f32.mrb[139].mxu0 }
 0x2ef   :  { %8869 = vmatmul.mubr.f32.gmra.mrb[28].mxu1 %v12850_v15  ;;  %9702 = vmatprep.mubr.msk.f32.mxu0 %vm5792_vm4, %v11081_v16  ;;  %v6614_v15 = vld [vmem:[%s13724_s7 + $0x4c8] sm:$0xff] }
 0x2f0   :  { %10365 = vmatpush3.bf16.msra.mxu1 %v10362_v22  ;;  %8871 = vmatprep.mubr.f32.mxu1 %v12872_v36  ;;  %v10418_v43 = vpack.c.bf16 %v6614_v15, %v6613_v41  ;;  %v6661_v41 = vld [vmem:[%s13724_s7 + $0x560] sm:$0xff]  ;;  %v6662_v15 = vld [vmem:[%s13724_s7 + $0x568] sm:$0xff] }
 0x2f1   :  { %10367 = vmatprep.subr.bf16.mxu1 %v10366_v26  ;;  %v13003_v62 = vpop.f32.mrb[140].mxu0 }
 0x2f2   :  { %v13011_v59 = vpop.f32.mrb[141].mxu0  ;;  %9703 = vmatmul.mubr.msk.f32.gmra.mrb[246].mxu0 %vm5793_vm5, %v11081_v16 }
 0x2f3   :  { %8872 = vmatmul.mubr.f32.gmra.mrb[30].mxu1 %v12868_v61  ;;  %9705 = vmatprep.mubr.msk.f32.mxu0 %vm5794_vm6, %v11081_v16  ;;  %v6616_v61 = vld [vmem:[%s13724_s7 + $0x4d8] sm:$0xff] }
 0x2f4   :  { %10369 = vmatpush3.bf16.msra.mxu1 %v10366_v26  ;;  %8962 = vmatprep.mubr.f32.mxu1 %v12890_v54  ;;  %v10426_v54 = vpack.c.bf16 %v6618_v56, %v6617_v33 }
 0x2f5   :  { %10403 = vmatprep.subr.bf16.mxu1 %v10402_v30  ;;  %v13019_v34 = vpop.f32.mrb[142].mxu0 }
 0x2f6   :  { %v13027_v4 = vpop.f32.mrb[143].mxu0  ;;  %9706 = vmatmul.mubr.msk.f32.gmra.mrb[248].mxu0 %vm5795_vm7, %v11081_v16 }
 0x2f7   :  { %8963 = vmatmul.mubr.f32.vlgmr.msra.gmra.mrb[16].mxu1 %v12886_v51  ;;  %9708 = vmatprep.mubr.msk.f32.mxu0 %vm5796_vm8, %v11081_v16  ;;  %v10414_v16 = vpack.c.bf16 %v6612_v5, %v6611_v12  ;;  %v13202_v12 = vpack.c.bf16 %v6868_v48, %v6867_v2  ;;  %v6705_v2 = vld [vmem:[%s13724_s7 + $0x5e0] sm:$0xff]  ;;  %v6706_v48 = vld [vmem:[%s13724_s7 + $0x5e8] sm:$0xff] }
 0x2f8   :  { %10405 = vmatpush3.bf16.msra.mxu1 %v10402_v30  ;;  %8965 = vmatprep.mubr.f32.mxu1 %v12907_v10  ;;  %v10430_v10 = vpack.c.bf16 %v6620_v52, %v6619_v32  ;;  %v6866_v30 = vld [vmem:[%s13724_s7 + $0x7a8] sm:$0xff]  ;;  %v6873_v32 = vld [vmem:[%s13724_s7 + $0x7e0] sm:$0xff] }
 0x2f9   :  { %10407 = vmatprep.subr.bf16.mxu1 %v10406_v31  ;;  %v13033_v38 = vpop.f32.mrb[144].mxu0  ;;  %v6874_v52 = vld [vmem:[%s13724_s7 + $0x7e8] sm:$0xff] }
 0x2fa   :  { %v13041_v44 = vpop.f32.mrb[145].mxu0  ;;  %9709 = vmatmul.mubr.f32.gmra.mrb[250].mxu0 %v11080_v1  ;;  %v13268_v46 = vpack.c.bf16 %v6874_v52, %v6873_v32 }
 0x2fb   :  { %8966 = vmatmul.mubr.f32.gmra.mrb[18].mxu1 %v12903_v60  ;;  %9711 = vmatprep.mubr.f32.mxu0 %v11080_v1 }
 0x2fc   :  { %10409 = vmatpush3.bf16.msra.mxu1 %v10406_v31  ;;  %8968 = vmatprep.mubr.f32.mxu1 %v12923_v53 }
 0x2fd   :  { %10411 = vmatprep.subr.bf16.mxu1 %v10410_v35  ;;  %v13047_v3 = vpop.f32.mrb[146].mxu0 }
 0x2fe   :  { %v13055_v17 = vpop.f32.mrb[147].mxu0  ;;  %9712 = vmatmul.mubr.f32.gmra.mrb[252].mxu0 %v11080_v1  ;;  %v10422_v1 = vpack.c.bf16 %v6616_v61, %v6615_v40  ;;  %v6871_v61 = vld [vmem:[%s13724_s7 + $0x7d0] sm:$0xff] }
 0x2ff   :  { %8969 = vmatmul.mubr.f32.gmra.mrb[20].mxu1 %v12919_v57 }
 0x300   :  { %10413 = vmatpush3.bf16.msra.mxu1 %v10410_v35  ;;  %8971 = vmatprep.mubr.f32.mxu1 %v12941_v42  ;;  %v6660_v35 = vld [vmem:[%s13724_s7 + $0x558] sm:$0xff] }
 0x301   :  { %10415 = vmatprep.subr.bf16.mxu1 %v10414_v16  ;;  %v13060_v25 = vpop.f32.mrb[148].mxu0 }
 0x302   :  { %v13068_v36 = vpop.f32.mrb[149].mxu0 }
 0x303   :  { %8972 = vmatmul.mubr.f32.gmra.mrb[22].mxu1 %v12938_v13 }
 0x304   :  { %10417 = vmatpush3.bf16.msra.mxu1 %v10414_v16  ;;  %8974 = vmatprep.mubr.f32.mxu1 %v12957_v21  ;;  %v6869_v16 = vld [vmem:[%s13724_s7 + $0x7c0] sm:$0xff] }
 0x305   :  { %10419 = vmatprep.subr.bf16.mxu1 %v10418_v43  ;;  %v13072_v63 = vpop.f32.mrb[150].mxu0 }
 0x306   :  { %v13080_v51 = vpop.f32.mrb[151].mxu0 }
 0x307   :  { %8975 = vmatmul.mubr.f32.gmra.mrb[24].mxu1 %v12955_v18  ;;  %v6653_v18 = vld [vmem:[%s13724_s7 + $0x520] sm:$0xff] }
 0x308   :  { %10421 = vmatpush3.bf16.msra.mxu1 %v10418_v43  ;;  %8977 = vmatprep.mubr.f32.mxu1 %v12980_v23  ;;  %v10474_v19 = vpack.c.bf16 %v6654_v7, %v6653_v18  ;;  %v6656_v23 = vld [vmem:[%s13724_s7 + $0x538] sm:$0xff]  ;;  %v6697_v18 = vld [vmem:[%s13724_s7 + $0x5a0] sm:$0xff]  ;;  %v6698_v7 = vld [vmem:[%s13724_s7 + $0x5a8] sm:$0xff] }
 0x309   :  { %10423 = vmatprep.subr.bf16.mxu1 %v10422_v1  ;;  %v13084_v28 = vpop.f32.mrb[152].mxu0  ;;  %v10478_v11 = vpack.c.bf16 %v6656_v23, %v6655_v37 }
 0x30a   :  { %v13092_v60 = vpop.f32.mrb[153].mxu0 }
 0x30b   :  { %8978 = vmatmul.mubr.f32.gmra.mrb[26].mxu1 %v12971_v39  ;;  %v6863_v39 = vld [vmem:[%s13724_s7 + $0x790] sm:$0xff] }
 0x30c   :  { %10425 = vmatpush3.bf16.msra.mxu1 %v10422_v1  ;;  %8980 = vmatprep.mubr.f32.mxu1 %v12996_v27  ;;  %v6865_v27 = vld [vmem:[%s13724_s7 + $0x7a0] sm:$0xff]  ;;  %v6663_v1 = vld [vmem:[%s13724_s7 + $0x570] sm:$0xff] }
 0x30d   :  { %10427 = vmatprep.subr.bf16.mxu1 %v10426_v54  ;;  %v13096_v45 = vpop.f32.mrb[154].mxu0 }
 0x30e   :  { %v13104_v57 = vpop.f32.mrb[155].mxu0 }
 0x30f   :  { %8981 = vmatmul.mubr.f32.gmra.mrb[28].mxu1 %v12987_v8  ;;  %v13158_v8 = vpack.c.bf16 %v6864_v29, %v6863_v39  ;;  %v6699_v39 = vld [vmem:[%s13724_s7 + $0x5b0] sm:$0xff]  ;;  %v6700_v29 = vld [vmem:[%s13724_s7 + $0x5b8] sm:$0xff] }
 0x310   :  { %10429 = vmatpush3.bf16.msra.mxu1 %v10426_v54  ;;  %8983 = vmatprep.mubr.f32.mxu1 %v13011_v59  ;;  %v13180_v59 = vpack.c.bf16 %v6866_v30, %v6865_v27 }
 0x311   :  { %10431 = vmatprep.subr.bf16.mxu1 %v10430_v10  ;;  %v13108_v53 = vpop.f32.mrb[156].mxu0  ;;  %10791 = vmatprep.subr.bf16.mxu0 %v13158_v8 }
 0x312   :  { %v13116_v13 = vpop.f32.mrb[157].mxu0  ;;  %10793 = vmatpush3.bf16.msra.mxu0 %v13158_v8 }
 0x313   :  { %8984 = vmatmul.mubr.f32.gmra.mrb[30].mxu1 %v13003_v62  ;;  %v6657_v62 = vld [vmem:[%s13724_s7 + $0x540] sm:$0xff]  ;;  %10795 = vmatprep.subr.bf16.mxu0 %v13180_v59 }
 0x314   :  { %10433 = vmatpush3.bf16.msra.mxu1 %v10430_v10  ;;  %9074 = vmatprep.mubr.f32.mxu1 %v13027_v4  ;;  %v10482_v31 = vpack.c.bf16 %v6658_v55, %v6657_v62  ;;  %v6659_v4 = vld [vmem:[%s13724_s7 + $0x550] sm:$0xff]  ;;  %v6704_v55 = vld [vmem:[%s13724_s7 + $0x5d8] sm:$0xff] }
 0x315   :  { %10467 = vmatprep.subr.bf16.mxu1 %v10466_v9  ;;  %v13120_v42 = vpop.f32.mrb[158].mxu0  ;;  %v10486_v5 = vpack.c.bf16 %v6660_v35, %v6659_v4  ;;  %v6703_v62 = vld [vmem:[%s13724_s7 + $0x5d0] sm:$0xff] }
 0x316   :  { %v13134_v21 = vpop.f32.mrb[159].mxu0  ;;  %10797 = vmatpush3.bf16.msra.mxu0 %v13180_v59 }
 0x317   :  { %9075 = vmatmul.mubr.f32.vlgmr.msra.gmra.mrb[16].mxu1 %v13019_v34  ;;  %10799 = vmatprep.subr.bf16.mxu0 %v13202_v12 }
 0x318   :  { %10469 = vmatpush3.bf16.msra.mxu1 %v10466_v9  ;;  %9077 = vmatprep.mubr.f32.mxu1 %v13041_v44  ;;  %v6875_v9 = vld [vmem:[%s13724_s7 + $0x7f0] sm:$0xff] }
 0x319   :  { %10471 = vmatprep.subr.bf16.mxu1 %v10470_v6  ;;  %v13140_v22 = vpop.f32.mrb[160].mxu0 }
 0x31a   :  { %v13155_v26 = vpop.f32.mrb[161].mxu0  ;;  %10801 = vmatpush3.bf16.msra.mxu0 %v13202_v12 }
 0x31b   :  { %9078 = vmatmul.mubr.f32.gmra.mrb[18].mxu1 %v13033_v38 }
 0x31c   :  { %10473 = vmatpush3.bf16.msra.mxu1 %v10470_v6  ;;  %9080 = vmatprep.mubr.f32.mxu1 %v13055_v17 }
 0x31d   :  { %10475 = vmatprep.subr.bf16.mxu1 %v10474_v19  ;;  %v13162_v58 = vpop.f32.mrb[162].mxu0 }
 0x31e   :  { %v13177_v24 = vpop.f32.mrb[163].mxu0 }
 0x31f   :  { %9081 = vmatmul.mubr.f32.gmra.mrb[20].mxu1 %v13047_v3  ;;  %v6870_v3 = vld [vmem:[%s13724_s7 + $0x7c8] sm:$0xff] }
 0x320   :  { %10477 = vmatpush3.bf16.msra.mxu1 %v10474_v19  ;;  %9083 = vmatprep.mubr.f32.mxu1 %v13068_v36  ;;  %v13224_v43 = vpack.c.bf16 %v6870_v3, %v6869_v16  ;;  %v6872_v36 = vld [vmem:[%s13724_s7 + $0x7d8] sm:$0xff] }
 0x321   :  { %10479 = vmatprep.subr.bf16.mxu1 %v10478_v11  ;;  %v13184_v34 = vpop.f32.mrb[164].mxu0  ;;  %v13246_v56 = vpack.c.bf16 %v6872_v36, %v6871_v61  ;;  %v6737_v61 = vld [vmem:[%s13724_s7 + $0x610] sm:$0xff]  ;;  %v6738_v36 = vld [vmem:[%s13724_s7 + $0x618] sm:$0xff] }
 0x322   :  { %v13199_v38 = vpop.f32.mrb[165].mxu0  ;;  %10803 = vmatprep.subr.bf16.mxu0 %v13224_v43 }
 0x323   :  { %9084 = vmatmul.mubr.f32.gmra.mrb[22].mxu1 %v13060_v25  ;;  %v10490_v25 = vpack.c.bf16 %v6662_v15, %v6661_v41  ;;  %10805 = vmatpush3.bf16.msra.mxu0 %v13224_v43  ;;  %v6735_v41 = vld [vmem:[%s13724_s7 + $0x600] sm:$0xff]  ;;  %v6736_v15 = vld [vmem:[%s13724_s7 + $0x608] sm:$0xff] }
 0x324   :  { %10481 = vmatpush3.bf16.msra.mxu1 %v10478_v11  ;;  %9086 = vmatprep.mubr.f32.mxu1 %v13080_v51  ;;  %v6702_v11 = vld [vmem:[%s13724_s7 + $0x5c8] sm:$0xff] }
 0x325   :  { %10483 = vmatprep.subr.bf16.mxu1 %v10482_v31  ;;  %v13206_v44 = vpop.f32.mrb[166].mxu0  ;;  %10807 = vmatprep.subr.bf16.mxu0 %v13246_v56 }
 0x326   :  { %v13221_v17 = vpop.f32.mrb[167].mxu0 }
 0x327   :  { %9087 = vmatmul.mubr.f32.gmra.mrb[24].mxu1 %v13072_v63  ;;  %v6664_v63 = vld [vmem:[%s13724_s7 + $0x578] sm:$0xff]  ;;  %10809 = vmatpush3.bf16.msra.mxu0 %v13246_v56 }
 0x328   :  { %10485 = vmatpush3.bf16.msra.mxu1 %v10482_v31  ;;  %9089 = vmatprep.mubr.f32.mxu1 %v13092_v60  ;;  %v10494_v51 = vpack.c.bf16 %v6664_v63, %v6663_v1  ;;  %v6694_v60 = vld [vmem:[%s13724_s7 + $0x588] sm:$0xff]  ;;  %v10598_v63 = vpack.c.bf16 %v6738_v36, %v6737_v61 }
 0x329   :  { %10487 = vmatprep.subr.bf16.mxu1 %v10486_v5  ;;  %v13228_v40 = vpop.f32.mrb[168].mxu0  ;;  %10811 = vmatprep.subr.bf16.mxu0 %v13268_v46  ;;  %v6786_v61 = vld [vmem:[%s13724_s7 + $0x6c8] sm:$0xff] }
 0x32a   :  { %v13243_v33 = vpop.f32.mrb[169].mxu0 }
 0x32b   :  { %9090 = vmatmul.mubr.f32.gmra.mrb[26].mxu1 %v13084_v28  ;;  %v6693_v28 = vld [vmem:[%s13724_s7 + $0x580] sm:$0xff]  ;;  %10813 = vmatpush3.bf16.msra.mxu0 %v13268_v46 }
 0x32c   :  { %10489 = vmatpush3.bf16.msra.mxu1 %v10486_v5  ;;  %9092 = vmatprep.mubr.f32.mxu1 %v13104_v57  ;;  %v10530_v50 = vpack.c.bf16 %v6694_v60, %v6693_v28  ;;  %v6708_v5 = vld [vmem:[%s13724_s7 + $0x5f8] sm:$0xff]  ;;  %v6741_v60 = vld [vmem:[%s13724_s7 + $0x630] sm:$0xff] }
 0x32d   :  { %10491 = vmatprep.subr.bf16.mxu1 %v10490_v25  ;;  %v13250_v54 = vpop.f32.mrb[170].mxu0 }
 0x32e   :  { %v13265_v10 = vpop.f32.mrb[171].mxu0 }
 0x32f   :  { %9093 = vmatmul.mubr.f32.gmra.mrb[28].mxu1 %v13096_v45  ;;  %v6696_v45 = vld [vmem:[%s13724_s7 + $0x598] sm:$0xff] }
 0x330   :  { %10493 = vmatpush3.bf16.msra.mxu1 %v10490_v25  ;;  %9095 = vmatprep.mubr.f32.mxu1 %v13116_v13  ;;  %v6876_v13 = vld [vmem:[%s13724_s7 + $0x7f8] sm:$0xff]  ;;  %v10534_v0 = vpack.c.bf16 %v6696_v45, %v6695_v49  ;;  %v10594_v25 = vpack.c.bf16 %v6736_v15, %v6735_v41  ;;  %v6743_v49 = vld [vmem:[%s13724_s7 + $0x640] sm:$0xff]  ;;  %v6744_v45 = vld [vmem:[%s13724_s7 + $0x648] sm:$0xff] }
 0x331   :  { %10495 = vmatprep.subr.bf16.mxu1 %v10494_v51  ;;  %v13272_v57 = vpop.f32.mrb[172].mxu0  ;;  %v13291_v6 = vpack.c.bf16 %v6876_v13, %v6875_v9  ;;  %v10610_v13 = vpack.c.bf16 %v6744_v45, %v6743_v49  ;;  %v6784_v41 = vld [vmem:[%s13724_s7 + $0x6b8] sm:$0xff] }
 0x332   :  { %v13284_v47 = vpop.f32.mrb[173].mxu0  ;;  %v6792_v49 = vld [vmem:[%s13724_s7 + $0x6f8] sm:$0xff] }
 0x333   :  { %9096 = vmatmul.mubr.f32.gmra.mrb[30].mxu1 %v13108_v53  ;;  %10815 = vmatprep.subr.bf16.mxu0 %v13291_v6 }
 0x334   :  { %10497 = vmatpush3.bf16.msra.mxu1 %v10494_v51  ;;  %9186 = vmatprep.mubr.f32.mxu1 %v13134_v21  ;;  %v10538_v21 = vpack.c.bf16 %v6698_v7, %v6697_v18  ;;  %v6739_v51 = vld [vmem:[%s13724_s7 + $0x620] sm:$0xff]  ;;  %v6746_v18 = vld [vmem:[%s13724_s7 + $0x658] sm:$0xff] }
 0x335   :  { %10531 = vmatprep.subr.bf16.mxu1 %v10530_v50  ;;  %v13294_v14 = vpop.f32.mrb[174].mxu0  ;;  %10817 = vmatpush3.bf16.msra.mxu0 %v13291_v6 }
 0x336   :  { %v13303_v53 = vpop.f32.mrb[175].mxu0 }
 0x337   :  { %9187 = vmatmul.mubr.f32.vlgmr.msra.gmra.mrb[16].mxu1 %v13120_v42  ;;  %v10542_v42 = vpack.c.bf16 %v6700_v29, %v6699_v39  ;;  %v6748_v39 = vld [vmem:[%s13724_s7 + $0x668] sm:$0xff] }
 0x338   :  { %10533 = vmatpush3.bf16.msra.mxu1 %v10530_v50  ;;  %9189 = vmatprep.mubr.f32.mxu1 %v13155_v26  ;;  %v6701_v26 = vld [vmem:[%s13724_s7 + $0x5c0] sm:$0xff] }
 0x339   :  { %10535 = vmatprep.subr.bf16.mxu1 %v10534_v0  ;;  %v13308_v19 = vpop.f32.mrb[176].mxu0 }
 0x33a   :  { %v13316_v37 = vpop.f32.mrb[177].mxu0 }
 0x33b   :  { %9190 = vmatmul.mubr.f32.gmra.mrb[18].mxu1 %v13140_v22  ;;  %v10546_v22 = vpack.c.bf16 %v6702_v11, %v6701_v26  ;;  %v6750_v26 = vld [vmem:[%s13724_s7 + $0x678] sm:$0xff] }
 0x33c   :  { %10537 = vmatpush3.bf16.msra.mxu1 %v10534_v0  ;;  %9192 = vmatprep.mubr.f32.mxu1 %v13177_v24 }
 0x33d   :  { %10539 = vmatprep.subr.bf16.mxu1 %v10538_v21  ;;  %v13320_v23 = vpop.f32.mrb[178].mxu0 }
 0x33e   :  { %v13328_v27 = vpop.f32.mrb[179].mxu0 }
 0x33f   :  { %9193 = vmatmul.mubr.f32.gmra.mrb[20].mxu1 %v13162_v58  ;;  %v10550_v58 = vpack.c.bf16 %v6704_v55, %v6703_v62  ;;  %v6778_v62 = vld [vmem:[%s13724_s7 + $0x688] sm:$0xff] }
 0x340   :  { %10541 = vmatpush3.bf16.msra.mxu1 %v10538_v21  ;;  %9195 = vmatprep.mubr.f32.mxu1 %v13199_v38  ;;  %v6707_v38 = vld [vmem:[%s13724_s7 + $0x5f0] sm:$0xff] }
 0x341   :  { %10543 = vmatprep.subr.bf16.mxu1 %v10542_v42  ;;  %v13332_v30 = vpop.f32.mrb[180].mxu0 }
 0x342   :  { %v13340_v24 = vpop.f32.mrb[181].mxu0 }
 0x343   :  { %9196 = vmatmul.mubr.f32.gmra.mrb[22].mxu1 %v13184_v34  ;;  %v10554_v34 = vpack.c.bf16 %v6706_v48, %v6705_v2  ;;  %v6780_v2 = vld [vmem:[%s13724_s7 + $0x698] sm:$0xff] }
 0x344   :  { %10545 = vmatpush3.bf16.msra.mxu1 %v10542_v42  ;;  %9198 = vmatprep.mubr.f32.mxu1 %v13221_v17 }
 0x345   :  { %10547 = vmatprep.subr.bf16.mxu1 %v10546_v22  ;;  %v13344_v31 = vpop.f32.mrb[182].mxu0 }
 0x346   :  { %v13352_v4 = vpop.f32.mrb[183].mxu0 }
 0x347   :  { %9199 = vmatmul.mubr.f32.gmra.mrb[24].mxu1 %v13206_v44  ;;  %v10558_v44 = vpack.c.bf16 %v6708_v5, %v6707_v38  ;;  %v6782_v38 = vld [vmem:[%s13724_s7 + $0x6a8] sm:$0xff] }
 0x348   :  { %10549 = vmatpush3.bf16.msra.mxu1 %v10546_v22  ;;  %9201 = vmatprep.mubr.f32.mxu1 %v13243_v33 }
 0x349   :  { %10551 = vmatprep.subr.bf16.mxu1 %v10550_v58  ;;  %v13356_v35 = vpop.f32.mrb[184].mxu0 }
 0x34a   :  { %v13364_v16 = vpop.f32.mrb[185].mxu0 }
 0x34b   :  { %9202 = vmatmul.mubr.f32.gmra.mrb[26].mxu1 %v13228_v40 }
 0x34c   :  { %10553 = vmatpush3.bf16.msra.mxu1 %v10550_v58  ;;  %9204 = vmatprep.mubr.f32.mxu1 %v13265_v10  ;;  %v6742_v10 = vld [vmem:[%s13724_s7 + $0x638] sm:$0xff] }
 0x34d   :  { %10555 = vmatprep.subr.bf16.mxu1 %v10554_v34  ;;  %v13368_v3 = vpop.f32.mrb[186].mxu0 }
 0x34e   :  { %v13376_v17 = vpop.f32.mrb[187].mxu0 }
 0x34f   :  { %9205 = vmatmul.mubr.f32.gmra.mrb[28].mxu1 %v13250_v54  ;;  %v6740_v54 = vld [vmem:[%s13724_s7 + $0x628] sm:$0xff] }
 0x350   :  { %10557 = vmatpush3.bf16.msra.mxu1 %v10554_v34  ;;  %9207 = vmatprep.mubr.f32.mxu1 %v13284_v47  ;;  %v10602_v52 = vpack.c.bf16 %v6740_v54, %v6739_v51  ;;  %v6788_v51 = vld [vmem:[%s13724_s7 + $0x6d8] sm:$0xff] }
 0x351   :  { %10559 = vmatprep.subr.bf16.mxu1 %v10558_v44  ;;  %v13380_v40 = vpop.f32.mrb[188].mxu0 }
 0x352   :  { %v13388_v1 = vpop.f32.mrb[189].mxu0 }
 0x353   :  { %9208 = vmatmul.mubr.f32.gmra.mrb[30].mxu1 %v13272_v57  ;;  %v10606_v57 = vpack.c.bf16 %v6742_v10, %v6741_v60  ;;  %v6790_v60 = vld [vmem:[%s13724_s7 + $0x6e8] sm:$0xff] }
 0x354   :  { %10561 = vmatpush3.bf16.msra.mxu1 %v10558_v44  ;;  %9298 = vmatprep.mubr.f32.mxu1 %v13303_v53 }
 0x355   :  { %10595 = vmatprep.subr.bf16.mxu1 %v10594_v25  ;;  %v13392_v33 = vpop.f32.mrb[190].mxu0 }
 0x356   :  { %v13400_v32 = vpop.f32.mrb[191].mxu0 }
 0x357   :  { %9299 = vmatmul.mubr.f32.vlgmr.msra.gmra.mrb[16].mxu1 %v13294_v14  ;;  %v6745_v14 = vld [vmem:[%s13724_s7 + $0x650] sm:$0xff] }
 0x358   :  { %10597 = vmatpush3.bf16.msra.mxu1 %v10594_v25  ;;  %9301 = vmatprep.mubr.f32.mxu1 %v13316_v37  ;;  %v10614_v53 = vpack.c.bf16 %v6746_v18, %v6745_v14  ;;  %v6820_v14 = vld [vmem:[%s13724_s7 + $0x708] sm:$0xff] }
 0x359   :  { %10599 = vmatprep.subr.bf16.mxu1 %v10598_v63  ;;  %v13404_v28 = vpop.f32.mrb[192].mxu0 }
 0x35a   :  { %v13412_v50 = vpop.f32.mrb[193].mxu0 }
 0x35b   :  { %9302 = vmatmul.mubr.f32.gmra.mrb[18].mxu1 %v13308_v19  ;;  %v6747_v19 = vld [vmem:[%s13724_s7 + $0x660] sm:$0xff] }
 0x35c   :  { %10601 = vmatpush3.bf16.msra.mxu1 %v10598_v63  ;;  %9304 = vmatprep.mubr.f32.mxu1 %v13328_v27  ;;  %v10618_v37 = vpack.c.bf16 %v6748_v39, %v6747_v19  ;;  %v6822_v19 = vld [vmem:[%s13724_s7 + $0x718] sm:$0xff] }
 0x35d   :  { %10603 = vmatprep.subr.bf16.mxu1 %v10602_v52  ;;  %v13416_v9 = vpop.f32.mrb[194].mxu0 }
 0x35e   :  { %v13424_v47 = vpop.f32.mrb[195].mxu0 }
 0x35f   :  { %9305 = vmatmul.mubr.f32.gmra.mrb[20].mxu1 %v13320_v23  ;;  %v6749_v23 = vld [vmem:[%s13724_s7 + $0x670] sm:$0xff] }
 0x360   :  { %10605 = vmatpush3.bf16.msra.mxu1 %v10602_v52  ;;  %9307 = vmatprep.mubr.f32.mxu1 %v13340_v24  ;;  %v10622_v27 = vpack.c.bf16 %v6750_v26, %v6749_v23  ;;  %v6824_v23 = vld [vmem:[%s13724_s7 + $0x728] sm:$0xff] }
 0x361   :  { %10607 = vmatprep.subr.bf16.mxu1 %v10606_v57  ;;  %v13428_v0 = vpop.f32.mrb[196].mxu0 }
 0x362   :  { %v13436_v7 = vpop.f32.mrb[197].mxu0 }
 0x363   :  { %9308 = vmatmul.mubr.f32.gmra.mrb[22].mxu1 %v13332_v30  ;;  %v6777_v30 = vld [vmem:[%s13724_s7 + $0x680] sm:$0xff] }
 0x364   :  { %10609 = vmatpush3.bf16.msra.mxu1 %v10606_v57  ;;  %9310 = vmatprep.mubr.f32.mxu1 %v13352_v4  ;;  %v10658_v24 = vpack.c.bf16 %v6778_v62, %v6777_v30  ;;  %v6826_v30 = vld [vmem:[%s13724_s7 + $0x738] sm:$0xff] }
 0x365   :  { %10611 = vmatprep.subr.bf16.mxu1 %v10610_v13  ;;  %v13440_v21 = vpop.f32.mrb[198].mxu0 }
 0x366   :  { %v13448_v29 = vpop.f32.mrb[199].mxu0 }
 0x367   :  { %9311 = vmatmul.mubr.f32.gmra.mrb[24].mxu1 %v13344_v31  ;;  %v6779_v31 = vld [vmem:[%s13724_s7 + $0x690] sm:$0xff] }
 0x368   :  { %10613 = vmatpush3.bf16.msra.mxu1 %v10610_v13  ;;  %9313 = vmatprep.mubr.f32.mxu1 %v13364_v16  ;;  %v10662_v4 = vpack.c.bf16 %v6780_v2, %v6779_v31  ;;  %v6828_v31 = vld [vmem:[%s13724_s7 + $0x748] sm:$0xff] }
 0x369   :  { %10615 = vmatprep.subr.bf16.mxu1 %v10614_v53  ;;  %v13452_v42 = vpop.f32.mrb[200].mxu0 }
 0x36a   :  { %v13460_v11 = vpop.f32.mrb[201].mxu0 }
 0x36b   :  { %9314 = vmatmul.mubr.f32.gmra.mrb[26].mxu1 %v13356_v35  ;;  %v6781_v35 = vld [vmem:[%s13724_s7 + $0x6a0] sm:$0xff] }
 0x36c   :  { %10617 = vmatpush3.bf16.msra.mxu1 %v10614_v53  ;;  %9316 = vmatprep.mubr.f32.mxu1 %v13376_v17  ;;  %v10666_v16 = vpack.c.bf16 %v6782_v38, %v6781_v35  ;;  %v6830_v35 = vld [vmem:[%s13724_s7 + $0x758] sm:$0xff] }
 0x36d   :  { %10619 = vmatprep.subr.bf16.mxu1 %v10618_v37  ;;  %v13464_v22 = vpop.f32.mrb[202].mxu0 }
 0x36e   :  { %v13472_v55 = vpop.f32.mrb[203].mxu0 }
 0x36f   :  { %9317 = vmatmul.mubr.f32.gmra.mrb[28].mxu1 %v13368_v3  ;;  %v6783_v3 = vld [vmem:[%s13724_s7 + $0x6b0] sm:$0xff] }
 0x370   :  { %10621 = vmatpush3.bf16.msra.mxu1 %v10618_v37  ;;  %9319 = vmatprep.mubr.f32.mxu1 %v13388_v1  ;;  %v10670_v17 = vpack.c.bf16 %v6784_v41, %v6783_v3  ;;  %v6831_v3 = vld [vmem:[%s13724_s7 + $0x760] sm:$0xff]  ;;  %v6832_v41 = vld [vmem:[%s13724_s7 + $0x768] sm:$0xff] }
 0x371   :  { %10623 = vmatprep.subr.bf16.mxu1 %v10622_v27  ;;  %v13476_v58 = vpop.f32.mrb[204].mxu0 }
 0x372   :  { %v13484_v48 = vpop.f32.mrb[205].mxu0 }
 0x373   :  { %9320 = vmatmul.mubr.f32.gmra.mrb[30].mxu1 %v13380_v40  ;;  %v6785_v40 = vld [vmem:[%s13724_s7 + $0x6c0] sm:$0xff] }
 0x374   :  { %10625 = vmatpush3.bf16.msra.mxu1 %v10622_v27  ;;  %9410 = vmatprep.mubr.f32.mxu1 %v13400_v32  ;;  %v10674_v1 = vpack.c.bf16 %v6786_v61, %v6785_v40  ;;  %v6833_v40 = vld [vmem:[%s13724_s7 + $0x770] sm:$0xff]  ;;  %v6834_v61 = vld [vmem:[%s13724_s7 + $0x778] sm:$0xff] }
 0x375   :  { %10659 = vmatprep.subr.bf16.mxu1 %v10658_v24  ;;  %v13488_v34 = vpop.f32.mrb[206].mxu0 }
 0x376   :  { %v13496_v5 = vpop.f32.mrb[207].mxu0 }
 0x377   :  { %9411 = vmatmul.mubr.f32.vlgmr.msra.gmra.mrb[16].mxu1 %v13392_v33  ;;  %v6787_v33 = vld [vmem:[%s13724_s7 + $0x6d0] sm:$0xff] }
 0x378   :  { %10661 = vmatpush3.bf16.msra.mxu1 %v10658_v24  ;;  %9413 = vmatprep.mubr.f32.mxu1 %v13412_v50  ;;  %v10678_v32 = vpack.c.bf16 %v6788_v51, %v6787_v33 }
 0x379   :  { %10663 = vmatprep.subr.bf16.mxu1 %v10662_v4  ;;  %v13500_v44 = vpop.f32.mrb[208].mxu0 }
 0x37a   :  { %v13508_v15 = vpop.f32.mrb[209].mxu0 }
 0x37b   :  { %9414 = vmatmul.mubr.f32.gmra.mrb[18].mxu1 %v13404_v28  ;;  %v6789_v28 = vld [vmem:[%s13724_s7 + $0x6e0] sm:$0xff] }
 0x37c   :  { %10665 = vmatpush3.bf16.msra.mxu1 %v10662_v4  ;;  %9416 = vmatprep.mubr.f32.mxu1 %v13424_v47  ;;  %v10682_v50 = vpack.c.bf16 %v6790_v60, %v6789_v28 }
 0x37d   :  { %10667 = vmatprep.subr.bf16.mxu1 %v10666_v16  ;;  %v13512_v25 = vpop.f32.mrb[210].mxu0 }
 0x37e   :  { %v13520_v36 = vpop.f32.mrb[211].mxu0 }
 0x37f   :  { %9417 = vmatmul.mubr.f32.gmra.mrb[20].mxu1 %v13416_v9  ;;  %v6791_v9 = vld [vmem:[%s13724_s7 + $0x6f0] sm:$0xff] }
 0x380   :  { %10669 = vmatpush3.bf16.msra.mxu1 %v10666_v16  ;;  %9419 = vmatprep.mubr.f32.mxu1 %v13436_v7  ;;  %v10686_v47 = vpack.c.bf16 %v6792_v49, %v6791_v9 }
 0x381   :  { %10671 = vmatprep.subr.bf16.mxu1 %v10670_v17  ;;  %v13524_v63 = vpop.f32.mrb[212].mxu0 }
 0x382   :  { %v13532_v54 = vpop.f32.mrb[213].mxu0 }
 0x383   :  { %9420 = vmatmul.mubr.f32.gmra.mrb[22].mxu1 %v13428_v0  ;;  %v6819_v0 = vld [vmem:[%s13724_s7 + $0x700] sm:$0xff] }
 0x384   :  { %10673 = vmatpush3.bf16.msra.mxu1 %v10670_v17  ;;  %9422 = vmatprep.mubr.f32.mxu1 %v13448_v29  ;;  %v10722_v7 = vpack.c.bf16 %v6820_v14, %v6819_v0  ;;  %v10746_v17 = vpack.c.bf16 %v6832_v41, %v6831_v3 }
 0x385   :  { %10675 = vmatprep.subr.bf16.mxu1 %v10674_v1  ;;  %v13536_v52 = vpop.f32.mrb[214].mxu0 }
 0x386   :  { %v13544_v10 = vpop.f32.mrb[215].mxu0 }
 0x387   :  { %9423 = vmatmul.mubr.f32.gmra.mrb[24].mxu1 %v13440_v21  ;;  %v6821_v21 = vld [vmem:[%s13724_s7 + $0x710] sm:$0xff] }
 0x388   :  { %10677 = vmatpush3.bf16.msra.mxu1 %v10674_v1  ;;  %9425 = vmatprep.mubr.f32.mxu1 %v13460_v11  ;;  %v10726_v29 = vpack.c.bf16 %v6822_v19, %v6821_v21  ;;  %v10750_v1 = vpack.c.bf16 %v6834_v61, %v6833_v40 }
 0x389   :  { %10679 = vmatprep.subr.bf16.mxu1 %v10678_v32  ;;  %v13548_v57 = vpop.f32.mrb[216].mxu0 }
 0x38a   :  { %v13556_v45 = vpop.f32.mrb[217].mxu0 }
 0x38b   :  { %9426 = vmatmul.mubr.f32.gmra.mrb[26].mxu1 %v13452_v42  ;;  %v6823_v42 = vld [vmem:[%s13724_s7 + $0x720] sm:$0xff] }
 0x38c   :  { %10681 = vmatpush3.bf16.msra.mxu1 %v10678_v32  ;;  %9428 = vmatprep.mubr.f32.mxu1 %v13472_v55  ;;  %v10730_v11 = vpack.c.bf16 %v6824_v23, %v6823_v42 }
 0x38d   :  { %10683 = vmatprep.subr.bf16.mxu1 %v10682_v50  ;;  %v13560_v13 = vpop.f32.mrb[218].mxu0 }
 0x38e   :  { %v13568_v18 = vpop.f32.mrb[219].mxu0 }
 0x38f   :  { %9429 = vmatmul.mubr.f32.gmra.mrb[28].mxu1 %v13464_v22  ;;  %v6825_v22 = vld [vmem:[%s13724_s7 + $0x730] sm:$0xff] }
 0x390   :  { %10685 = vmatpush3.bf16.msra.mxu1 %v10682_v50  ;;  %9431 = vmatprep.mubr.f32.mxu1 %v13484_v48  ;;  %v10734_v55 = vpack.c.bf16 %v6826_v30, %v6825_v22 }
 0x391   :  { %10687 = vmatprep.subr.bf16.mxu1 %v10686_v47  ;;  %v13572_v53 = vpop.f32.mrb[220].mxu0 }
 0x392   :  { %v13580_v39 = vpop.f32.mrb[221].mxu0 }
 0x393   :  { %9432 = vmatmul.mubr.f32.gmra.mrb[30].mxu1 %v13476_v58  ;;  %v6827_v58 = vld [vmem:[%s13724_s7 + $0x740] sm:$0xff] }
 0x394   :  { %10689 = vmatpush3.bf16.msra.mxu1 %v10686_v47  ;;  %9522 = vmatprep.mubr.f32.mxu1 %v13496_v5  ;;  %v10738_v48 = vpack.c.bf16 %v6828_v31, %v6827_v58 }
 0x395   :  { %10723 = vmatprep.subr.bf16.mxu1 %v10722_v7  ;;  %v13584_v37 = vpop.f32.mrb[222].mxu0 }
 0x396   :  { %v5527_v26 = vpop.f32.mrb[223].mxu0 }
 0x397   :  { %9523 = vmatmul.mubr.f32.vlgmr.msra.gmra.mrb[16].mxu1 %v13488_v34  ;;  %v6829_v34 = vld [vmem:[%s13724_s7 + $0x750] sm:$0xff] }
 0x398   :  { %10725 = vmatpush3.bf16.msra.mxu1 %v10722_v7  ;;  %9525 = vmatprep.mubr.f32.mxu1 %v13508_v15  ;;  %v10742_v5 = vpack.c.bf16 %v6830_v35, %v6829_v34 }
 0x399   :  { %10727 = vmatprep.subr.bf16.mxu1 %v10726_v29  ;;  %v13594_v27 = vpop.f32.mrb[224].mxu0 }
 0x39a   :  { %v5537_v62 = vpop.f32.mrb[225].mxu0 }
 0x39b   :  { %9526 = vmatmul.mubr.f32.gmra.mrb[18].mxu1 %v13500_v44 }
 0x39c   :  { %10729 = vmatpush3.bf16.msra.mxu1 %v10726_v29  ;;  %9528 = vmatprep.mubr.f32.mxu1 %v13520_v36 }
 0x39d   :  { %10731 = vmatprep.subr.bf16.mxu1 %v10730_v11  ;;  %v13604_v24 = vpop.f32.mrb[226].mxu0 }
 0x39e   :  { %v5547_v2 = vpop.f32.mrb[227].mxu0 }
 0x39f   :  { %9529 = vmatmul.mubr.f32.gmra.mrb[20].mxu1 %v13512_v25 }
 0x3a0   :  { %10733 = vmatpush3.bf16.msra.mxu1 %v10730_v11  ;;  %9531 = vmatprep.mubr.f32.mxu1 %v13532_v54 }
 0x3a1   :  { %10735 = vmatprep.subr.bf16.mxu1 %v10734_v55  ;;  %v13614_v4 = vpop.f32.mrb[228].mxu0 }
 0x3a2   :  { %v5557_v38 = vpop.f32.mrb[229].mxu0 }
 0x3a3   :  { %9532 = vmatmul.mubr.f32.gmra.mrb[22].mxu1 %v13524_v63 }
 0x3a4   :  { %10737 = vmatpush3.bf16.msra.mxu1 %v10734_v55  ;;  %9534 = vmatprep.mubr.f32.mxu1 %v13544_v10 }
 0x3a5   :  { %10739 = vmatprep.subr.bf16.mxu1 %v10738_v48  ;;  %v13624_v16 = vpop.f32.mrb[230].mxu0 }
 0x3a6   :  { %v5567_v44 = vpop.f32.mrb[231].mxu0 }
 0x3a7   :  { %9535 = vmatmul.mubr.f32.gmra.mrb[24].mxu1 %v13536_v52 }
 0x3a8   :  { %10741 = vmatpush3.bf16.msra.mxu1 %v10738_v48  ;;  %9537 = vmatprep.mubr.f32.mxu1 %v13556_v45 }
 0x3a9   :  { %10743 = vmatprep.subr.bf16.mxu1 %v10742_v5  ;;  %v9595_v15 = vpop.f32.mrb[232].mxu0 }
 0x3aa   :  { %v5577_v25 = vpop.f32.mrb[233].mxu0 }
 0x3ab   :  { %9538 = vmatmul.mubr.f32.gmra.mrb[26].mxu1 %v13548_v57 }
 0x3ac   :  { %10745 = vmatpush3.bf16.msra.mxu1 %v10742_v5  ;;  %9540 = vmatprep.mubr.f32.mxu1 %v13568_v18 }
 0x3ad   :  { %10747 = vmatprep.subr.bf16.mxu1 %v10746_v17  ;;  %v9598_v36 = vpop.f32.mrb[234].mxu0 }
 0x3ae   :  { %v5587_v63 = vpop.f32.mrb[235].mxu0 }
 0x3af   :  { %9541 = vmatmul.mubr.f32.gmra.mrb[28].mxu1 %v13560_v13 }
 0x3b0   :  { %10749 = vmatpush3.bf16.msra.mxu1 %v10746_v17  ;;  %9543 = vmatprep.mubr.f32.mxu1 %v13580_v39 }
 0x3b1   :  { %v9601_v33 = vpop.f32.mrb[236].mxu0  ;;  %10751 = vmatprep.subr.bf16.mxu1 %v10750_v1 }
 0x3b2   :  { %v5597_v51 = vpop.f32.mrb[237].mxu0 }
 0x3b3   :  { %9544 = vmatmul.mubr.f32.gmra.mrb[30].mxu1 %v13572_v53 }
 0x3b4   :  { %10753 = vmatpush3.bf16.msra.mxu1 %v10750_v1  ;;  %9634 = vmatprep.mubr.f32.mxu1 %v5527_v26 }
 0x3b5   :  { %v9692_v54 = vpop.f32.mrb[238].mxu0  ;;  %10818 = vmatprep.subr.bf16.mxu1 %v13136_v20 }
 0x3b6   :  { %v5898_v32 = vpop.f32.mrb[239].mxu0 }
 0x3b7   :  { %9746 = vmatprep.mubr.f32.mxu0 %v5898_v32  ;;  %9635 = vmatmul.mubr.f32.vlgmr.msra.gmra.mrb[16].mxu1 %v13584_v37 }
 0x3b8   :  { %10826 = vmatpush3.bf16.msra.mxu1 %v13136_v20  ;;  %9747 = vmatmul.mubr.f32.vlgmr.msra.gmra.mrb[254].mxu0 %v9692_v54 }
 0x3b9   :  { %9637 = vmatprep.mubr.f32.mxu1 %v5537_v62  ;;  %v9695_v52 = vpop.f32.mrb[240].mxu0  ;;  %10819 = vmatprep.subr.bf16.mxu1 %v13158_v8 }
 0x3ba   :  { %v5908_v28 = vpop.f32.mrb[241].mxu0 }
 0x3bb   :  { %9749 = vmatprep.mubr.f32.mxu0 %v5908_v28  ;;  %9638 = vmatmul.mubr.f32.gmra.mrb[18].mxu1 %v13594_v27 }
 0x3bc   :  { %10827 = vmatpush3.bf16.msra.mxu1 %v13158_v8  ;;  %9750 = vmatmul.mubr.f32.gmra.mrb[0].mxu0 %v9695_v52 }
 0x3bd   :  { %9640 = vmatprep.mubr.f32.mxu1 %v5547_v2  ;;  %v9698_v60 = vpop.f32.mrb[242].mxu0  ;;  %10820 = vmatprep.subr.bf16.mxu1 %v13180_v59 }
 0x3be   :  { %v5918_v10 = vpop.f32.mrb[243].mxu0 }
 0x3bf   :  { %9752 = vmatprep.mubr.f32.mxu0 %v5918_v10  ;;  %9641 = vmatmul.mubr.f32.gmra.mrb[20].mxu1 %v13604_v24 }
 0x3c0   :  { %10828 = vmatpush3.bf16.msra.mxu1 %v13180_v59  ;;  %9753 = vmatmul.mubr.f32.gmra.mrb[2].mxu0 %v9698_v60 }
 0x3c1   :  { %9643 = vmatprep.mubr.f32.mxu1 %v5557_v38  ;;  %v9701_v20 = vpop.f32.mrb[244].mxu0  ;;  %10821 = vmatprep.subr.bf16.mxu1 %v13202_v12 }
 0x3c2   :  { %v5928_v50 = vpop.f32.mrb[245].mxu0 }
 0x3c3   :  { %9755 = vmatprep.mubr.f32.mxu0 %v5928_v50  ;;  %9644 = vmatmul.mubr.f32.gmra.mrb[22].mxu1 %v13614_v4 }
 0x3c4   :  { %10829 = vmatpush3.bf16.msra.mxu1 %v13202_v12  ;;  %9756 = vmatmul.mubr.f32.gmra.mrb[4].mxu0 %v9701_v20 }
 0x3c5   :  { %9646 = vmatprep.mubr.f32.mxu1 %v5567_v44  ;;  %10822 = vmatprep.subr.bf16.mxu1 %v13224_v43  ;;  %v9704_v8 = vpop.f32.mrb[246].mxu0 }
 0x3c6   :  { %v5938_v57 = vpop.f32.mrb[247].mxu0 }
 0x3c7   :  { %9647 = vmatmul.mubr.f32.gmra.mrb[24].mxu1 %v13624_v16 }
 0x3c8   :  { %10830 = vmatpush3.bf16.msra.mxu1 %v13224_v43  ;;  %9649 = vmatprep.mubr.f32.mxu1 %v5577_v25 }
 0x3c9   :  { %10823 = vmatprep.subr.bf16.mxu1 %v13246_v56  ;;  %v9707_v59 = vpop.f32.mrb[248].mxu0 }
 0x3ca   :  { %v5948_v9 = vpop.f32.mrb[249].mxu0 }
 0x3cb   :  { %9650 = vmatmul.mubr.f32.gmra.mrb[26].mxu1 %v9595_v15 }
 0x3cc   :  { %10831 = vmatpush3.bf16.msra.mxu1 %v13246_v56  ;;  %9652 = vmatprep.mubr.f32.mxu1 %v5587_v63 }
 0x3cd   :  { %10824 = vmatprep.subr.bf16.mxu1 %v13268_v46  ;;  %v9710_v12 = vpop.f32.mrb[250].mxu0 }
 0x3ce   :  { %v5958_v49 = vpop.f32.mrb[251].mxu0 }
 0x3cf   :  { %9653 = vmatmul.mubr.f32.gmra.mrb[28].mxu1 %v9598_v36 }
 0x3d0   :  { %10832 = vmatpush3.bf16.msra.mxu1 %v13268_v46  ;;  %9655 = vmatprep.mubr.f32.mxu1 %v5597_v51  ;;  %v6877_v46 = vld [vmem:[%s13726_s8] ss:$0 sm:$0xff] }
 0x3d1   :  { %10825 = vmatprep.subr.bf16.mxu1 %v13291_v6  ;;  %v9713_v43 = vpop.f32.mrb[252].mxu0 }
 0x3d2   :  { %v5968_v45 = vpop.f32.mrb[253].mxu0 }
 0x3d3   :  { %9656 = vmatmul.mubr.f32.gmra.mrb[30].mxu1 %v9601_v33 }
 0x3d4   :  { %10833 = vmatpush3.bf16.msra.mxu1 %v13291_v6  ;;  %9758 = vmatprep.mubr.f32.mxu1 %v5938_v57 }
 0x3d7   :  { %9759 = vmatmul.mubr.f32.vlgmr.msra.gmra.mrb[24].mxu1 %v9704_v8 }
 0x3d8   :  { %9761 = vmatprep.mubr.f32.mxu1 %v5948_v9 }
 0x3db   :  { %9762 = vmatmul.mubr.f32.gmra.mrb[26].mxu1 %v9707_v59 }
 0x3dc   :  { %9764 = vmatprep.mubr.f32.mxu1 %v5958_v49 }
 0x3df   :  { %9765 = vmatmul.mubr.f32.gmra.mrb[28].mxu1 %v9710_v12 }
 0x3e0   :  { %9767 = vmatprep.mubr.f32.mxu1 %v5968_v45 }
 0x3e3   :  { %9768 = vmatmul.mubr.f32.gmra.mrb[30].mxu1 %v9713_v43 }
 0x48a   :  { %v9636_v56 = vpop.f32.mrb[16].mxu1 }
 0x48b   :  { %v9748_v47 = vpop.f32.mrb[254].mxu0  ;;  %v5689_v13 = vpop.f32.mrb[17].mxu1 }
 0x48c   :  { %v10834_v0 = vadd.f32 %v9748_v47, %v9636_v56  ;;  %v6060_v14 = vpop.f32.mrb[255].mxu0 }
 0x48d   :  { %v10835_v18 = vadd.f32 %v6060_v14, %v5689_v13 }
 0x48e   :  { %v6163_v7 = vadd.f32 %v10834_v0, %v6877_v46  ;;  %v9639_v6 = vpop.f32.mrb[18].mxu1 }
 0x48f   :  { %v6162_v53 = vadd.f32 %v10835_v18, %v6877_v46  ;;  %v9751_v21 = vpop.f32.mrb[0].mxu0  ;;  %v5699_v19 = vpop.f32.mrb[19].mxu1 }
 0x490   :  { %6179 = vst [vmem:[%s13727_s10 + $0x8] sm:$0xff] %v6163_v7  ;;  %v10836_v39 = vadd.f32 %v9751_v21, %v9639_v6  ;;  %v6070_v29 = vpop.f32.mrb[1].mxu0 }
 0x491   :  { %6178 = vst [vmem:[%s13727_s10] sm:$0xff] %v6162_v53  ;;  %v10837_v37 = vadd.f32 %v6070_v29, %v5699_v19 }
 0x492   :  { %v6165_v42 = vadd.f32 %v10836_v39, %v6877_v46  ;;  %v9642_v23 = vpop.f32.mrb[20].mxu1 }
 0x493   :  { %v6164_v26 = vadd.f32 %v10837_v37, %v6877_v46  ;;  %v9754_v11 = vpop.f32.mrb[2].mxu0  ;;  %v5709_v27 = vpop.f32.mrb[21].mxu1 }
 0x494   :  { %6181 = vst [vmem:[%s13727_s10 + $0x18] sm:$0xff] %v6165_v42  ;;  %v10838_v22 = vadd.f32 %v9754_v11, %v9642_v23  ;;  %v6080_v30 = vpop.f32.mrb[3].mxu0 }
 0x495   :  { %6180 = vst [vmem:[%s13727_s10 + $0x10] sm:$0xff] %v6164_v26  ;;  %v10839_v62 = vadd.f32 %v6080_v30, %v5709_v27 }
 0x496   :  { %v6167_v55 = vadd.f32 %v10838_v22, %v6877_v46  ;;  %v9645_v24 = vpop.f32.mrb[22].mxu1 }
 0x497   :  { %v6166_v58 = vadd.f32 %v10839_v62, %v6877_v46  ;;  %v9757_v31 = vpop.f32.mrb[4].mxu0  ;;  %v5719_v2 = vpop.f32.mrb[23].mxu1 }
 0x498   :  { %6183 = vst [vmem:[%s13727_s10 + $0x28] sm:$0xff] %v6167_v55  ;;  %v10840_v48 = vadd.f32 %v9757_v31, %v9645_v24  ;;  %v6090_v4 = vpop.f32.mrb[5].mxu0 }
 0x499   :  { %6182 = vst [vmem:[%s13727_s10 + $0x20] sm:$0xff] %v6166_v58  ;;  %v10841_v34 = vadd.f32 %v6090_v4, %v5719_v2 }
 0x49a   :  { %v6169_v35 = vadd.f32 %v10840_v48, %v6877_v46 }
 0x49b   :  { %v6168_v38 = vadd.f32 %v10841_v34, %v6877_v46 }
 0x49c   :  { %6185 = vst [vmem:[%s13727_s10 + $0x38] sm:$0xff] %v6169_v35 }
 0x49d   :  { %6184 = vst [vmem:[%s13727_s10 + $0x30] sm:$0xff] %v6168_v38 }
 0x4aa   :  { %v9760_v5 = vpop.f32.mrb[24].mxu1 }
 0x4ab   :  { %v6171_v16 = vadd.f32 %v9760_v5, %v6877_v46  ;;  %v6100_v44 = vpop.f32.mrb[25].mxu1 }
 0x4ac   :  { %v6170_v3 = vadd.f32 %v6877_v46, %v6100_v44 }
 0x4ad   :  { %6187 = vst [vmem:[%s13727_s10 + $0x48] sm:$0xff] %v6171_v16 }
 0x4ae   :  { %6186 = vst [vmem:[%s13727_s10 + $0x40] sm:$0xff] %v6170_v3  ;;  %v9763_v41 = vpop.f32.mrb[26].mxu1 }
 0x4af   :  { %v6173_v15 = vadd.f32 %v9763_v41, %v6877_v46  ;;  %v6110_v17 = vpop.f32.mrb[27].mxu1 }
 0x4b0   :  { %v6172_v25 = vadd.f32 %v6877_v46, %v6110_v17 }
 0x4b1   :  { %6189 = vst [vmem:[%s13727_s10 + $0x58] sm:$0xff] %v6173_v15 }
 0x4b2   :  { %6188 = vst [vmem:[%s13727_s10 + $0x50] sm:$0xff] %v6172_v25  ;;  %v9766_v40 = vpop.f32.mrb[28].mxu1 }
 0x4b3   :  { %v6175_v61 = vadd.f32 %v9766_v40, %v6877_v46  ;;  %v6120_v36 = vpop.f32.mrb[29].mxu1 }
 0x4b4   :  { %v6174_v1 = vadd.f32 %v6877_v46, %v6120_v36 }
 0x4b5   :  { %6191 = vst [vmem:[%s13727_s10 + $0x68] sm:$0xff] %v6175_v61 }
 0x4b6   :  { %6190 = vst [vmem:[%s13727_s10 + $0x60] sm:$0xff] %v6174_v1  ;;  %v9769_v63 = vpop.f32.mrb[30].mxu1 }
 0x4b7   :  { %v6177_v33 = vadd.f32 %v9769_v63, %v6877_v46  ;;  %v6130_v51 = vpop.f32.mrb[31].mxu1 }
 0x4b8   :  { %v6176_v54 = vadd.f32 %v6877_v46, %v6130_v51 }
 0x4b9   :  { %6193 = vst [vmem:[%s13727_s10 + $0x78] sm:$0xff] %v6177_v33 }
 0x4ba   :  { %6192 = vst [vmem:[%s13727_s10 + $0x70] sm:$0xff] %v6176_v54 }

</bundles_post_ra>
